<compile_context>
chip_gen: v7x
topology: tpu7x:2x2x1
jax: 0.10.0
libtpu: 0.0.40
codegen_flags: <defaults>
</compile_context>

<pallas_src>
import functools

import jax
import jax.numpy as jnp
from jax.experimental import pallas as pl
from jax.experimental.pallas import tpu as pltpu


def _round_up(x, m):
    return (x + m - 1) // m * m


def _pick_block(n, target=512):
    """Largest power-of-two block <= target that divides n (else n itself)."""
    for cand in (target, 256, 128, 64, 32, 16, 8):
        if cand <= n and n % cand == 0:
            return cand
    return n


# ----------------------------------------------------------------------------
# JAX glue: layout plumbing only (no heavy compute)
# ----------------------------------------------------------------------------
def bilinear_resize_align_corners(x, out_h, out_w):
    """F.interpolate(..., mode='bilinear', align_corners=True) equivalent."""
    B, C, H, W = x.shape

    def idx(out_n, in_n):
        if out_n == 1:
            pos = jnp.zeros((1,), jnp.float32)
        else:
            pos = jnp.arange(out_n, dtype=jnp.float32) * ((in_n - 1) / (out_n - 1))
        lo = jnp.floor(pos).astype(jnp.int32)
        hi = jnp.minimum(lo + 1, in_n - 1)
        frac = pos - lo.astype(jnp.float32)
        return lo, hi, frac

    y0, y1, fy = idx(out_h, H)
    x0, x1, fx = idx(out_w, W)
    r0 = x[:, :, y0, :]
    r1 = x[:, :, y1, :]
    rows = r0 + (r1 - r0) * fy[None, None, :, None]
    c0 = rows[:, :, :, x0]
    c1 = rows[:, :, :, x1]
    return c0 + (c1 - c0) * fx[None, None, None, :]


def im2col_3x3(x, dilation):
    """x: (B, C, H, W) -> (B, H*W, C*9), element order [c, kh, kw]."""
    B, C, H, W = x.shape
    d = dilation
    xp = jnp.pad(x, ((0, 0), (0, 0), (d, d), (d, d)))
    cols = []
    for kh in range(3):
        for kw in range(3):
            cols.append(xp[:, :, kh * d:kh * d + H, kw * d:kw * d + W])
    col = jnp.stack(cols, axis=2)                  # (B, C, 9, H, W)
    col = jnp.transpose(col, (0, 3, 4, 1, 2))      # (B, H, W, C, 9)
    return col.reshape(B, H * W, C * 9)


def extract_background_patches(x, rate):
    """extract_patches(background, kernel=2*rate, stride=rate) with pad 1.

    x: (B, C, H, W) -> (B, (H//rate)*(W//rate), C*(2*rate)**2), order [c, ky, kx].
    """
    B, C, H, W = x.shape
    k = 2 * rate
    h, w = H // rate, W // rate
    xp = jnp.pad(x, ((0, 0), (0, 0), (1, 1), (1, 1)))
    cols = []
    for ky in range(k):
        for kx in range(k):
            cols.append(xp[:, :, ky:ky + rate * h:rate, kx:kx + rate * w:rate])
    col = jnp.stack(cols, axis=2)                  # (B, C, k*k, h, w)
    col = jnp.transpose(col, (0, 3, 4, 1, 2))      # (B, h, w, C, k*k)
    return col.reshape(B, h * w, C * k * k)


def overlap_add_rate2(out_patches, B, C, H, W, h, w):
    """Transposed-conv scatter (kernel=4, stride=2, padding=1) as reshape + 4 adds."""
    # (B, P, C*16) -> (B, i, j, c, a, r, b, s) with ky = 2a+r, kx = 2b+s
    p = out_patches.reshape(B, h, w, C, 2, 2, 2, 2)
    p = jnp.transpose(p, (0, 3, 1, 2, 4, 6, 5, 7))        # (B, C, i, j, a, b, r, s)
    cells = None
    for ay in (0, 1):
        for bx in (0, 1):
            q = p[:, :, :, :, ay, bx]                      # (B, C, h, w, 2, 2)
            q = jnp.pad(q, ((0, 0), (0, 0), (ay, 1 - ay), (bx, 1 - bx),
                            (0, 0), (0, 0)))
            cells = q if cells is None else cells + q      # (B, C, h+1, w+1, 2, 2)
    po = jnp.transpose(cells, (0, 1, 2, 4, 3, 5)).reshape(
        B, C, 2 * (h + 1), 2 * (w + 1))
    return po[:, :, 1:1 + H, 1:1 + W]


def conv_transpose_overlap_add(out_patches, B, C, H, W, h, w, rate):
    """Generic fallback scatter (only rate=2 is consistent with the reference)."""
    k = 2 * rate
    p = out_patches.reshape(B, h, w, C, k, k)
    p = jnp.transpose(p, (0, 3, 4, 5, 1, 2))       # (B, C, k, k, h, w)
    out = jnp.zeros((B, C, H + 2, W + 2), jnp.float32)
    for ky in range(k):
        for kx in range(k):
            out = out.at[:, :, ky:ky + rate * h:rate,
                               kx:kx + rate * w:rate].add(p[:, :, ky, kx])
    return out[:, :, 1:1 + H, 1:1 + W]


# ----------------------------------------------------------------------------
# Pallas kernel 1: RAL (region affinity learning), tiled two-pass softmax.
#   grid = (B, num_q_blocks, 2 * num_k_blocks)
#   phase 0 (k <  nK): streaming softmax stats (running max m, running sum l)
#   phase 1 (k >= nK): attn = clamp(exp(s - m) / l, 1e-8); out += attn @ bg / 4
# ----------------------------------------------------------------------------
def _ral_kernel(fq_ref, fk_ref, bg_ref, out_ref, m_sc, l_sc, *, scale, nK):
    k = pl.program_id(2)

    @pl.when(k == 0)
    def _():
        m_sc[...] = jnp.full_like(m_sc, -jnp.inf)
        l_sc[...] = jnp.zeros_like(l_sc)

    @pl.when(k == nK)
    def _():
        out_ref[...] = jnp.zeros_like(out_ref)

    # scores for this (query block, key block): fq @ (fk / max(||fk||, 1e-4))^T
    fk = fk_ref[0]                                            # (bk, Kf) f32
    ss = jnp.sum(fk * fk, axis=1, keepdims=True)              # (bk, 1)
    inv_norm = jnp.minimum(jax.lax.rsqrt(ss), 1e4)            # == 1/max(||.||,1e-4)
    fkn = (fk * inv_norm).astype(jnp.bfloat16)
    fq = fq_ref[0].astype(jnp.bfloat16)                       # (bq, Kf)
    s = jax.lax.dot_general(fq, fkn, (((1,), (1,)), ((), ())),
                            preferred_element_type=jnp.float32) * scale

    @pl.when(k < nK)
    def _():
        m_prev = m_sc[...]
        m_new = jnp.maximum(m_prev, jnp.max(s, axis=1, keepdims=True))
        l_sc[...] = (l_sc[...] * jnp.exp(m_prev - m_new)
                     + jnp.sum(jnp.exp(s - m_new), axis=1, keepdims=True))
        m_sc[...] = m_new

    @pl.when(k >= nK)
    def _():
        attn = jnp.exp(s - m_sc[...]) * pl.reciprocal(l_sc[...], approx=True)
        attn = jnp.maximum(attn, 1e-8)                        # reference clamp
        out_ref[0] = out_ref[0] + jnp.dot(
            attn.astype(jnp.bfloat16), bg_ref[0],
            preferred_element_type=jnp.float32) * 0.25


def ral_pallas(fgcol, bgcol_bf16, softmax_scale):
    B, P, Kf = fgcol.shape
    _, _, Kb = bgcol_bf16.shape
    bq = _pick_block(P)
    bk = _pick_block(P)
    nQ, nK = P // bq, P // bk

    kernel = functools.partial(_ral_kernel, scale=softmax_scale, nK=nK)
    return pl.pallas_call(
        kernel,
        out_shape=jax.ShapeDtypeStruct((B, P, Kb), jnp.float32),
        grid=(B, nQ, 2 * nK),
        in_specs=[
            pl.BlockSpec((1, bq, Kf), lambda b, q, k: (b, q, 0)),
            pl.BlockSpec((1, bk, Kf), lambda b, q, k: (b, k % nK, 0)),
            # bgcol is only needed in phase 1; keep its block pinned during
            # phase 0 so it is not redundantly re-fetched.
            pl.BlockSpec((1, bk, Kb),
                         lambda b, q, k: (b, jnp.maximum(k - nK, 0), 0)),
        ],
        out_specs=pl.BlockSpec((1, bq, Kb), lambda b, q, k: (b, q, 0)),
        scratch_shapes=[pltpu.VMEM((bq, 1), jnp.float32),
                        pltpu.VMEM((bq, 1), jnp.float32)],
        compiler_params=pltpu.CompilerParams(
            dimension_semantics=("parallel", "parallel", "arbitrary"),
            vmem_limit_bytes=64 * 1024 * 1024),
    )(fgcol, fgcol, bgcol_bf16)


# ----------------------------------------------------------------------------
# Pallas kernel 2: MSFA (multi-scale feature aggregation), fused.
#   Input: one zero-padded, flattened feature slab (B, C, Lpad) f32.
#   Each dilated 3x3 conv = 9 shifted-window loads + (Cout, C) @ (C, Lq)
#   bf16 matmuls accumulated in f32.  Weight branch shares the dilation-1
#   windows.  Softmax over the 4 branches is pure VPU/EUP math.
# ----------------------------------------------------------------------------
def _msfa_kernel(x_ref, wdil_ref, bdil_ref, wc1_ref, bc1_ref, wc2_ref,
                 bc2_ref, out_ref, *, dil, dmax, Wp, Lq):
    taps = [(kh, kw) for kh in (-1, 0, 1) for kw in (-1, 0, 1)]

    cache = {}

    def window(dy, dx):
        key = (dy, dx)
        if key not in cache:
            start = (dmax + dy) * Wp + (dmax + dx)
            cache[key] = x_ref[0, :, start:start + Lq].astype(jnp.bfloat16)
        return cache[key]                                     # (C, Lq) bf16

    # 4 dilated 3x3 convs (+ ReLU), conv as 9 shifted matmuls each.
    feats = []
    for di, d in enumerate(dil):
        acc = None
        for t, (kh, kw) in enumerate(taps):
            r = jnp.dot(wdil_ref[di, t], window(kh * d, kw * d),
                        preferred_element_type=jnp.float32)   # (Cout, Lq)
            acc = r if acc is None else acc + r
        feats.append(jnp.maximum(acc + bdil_ref[di], 0.0))

    # weight branch: 3x3 conv (dilation 1, shares windows) + ReLU
    hacc = None
    for t, (kh, kw) in enumerate(taps):
        r = jnp.dot(wc1_ref[t], window(kh, kw),
                    preferred_element_type=jnp.float32)
        hacc = r if hacc is None else hacc + r
    hmid = jnp.maximum(hacc + bc1_ref[...], 0.0).astype(jnp.bfloat16)

    # 1x1 conv -> 4 logits, ReLU, softmax over the 4 branches (VPU/EUP only).
    logits = []
    for i in range(len(dil)):
        li = jnp.dot(wc2_ref[i], hmid, preferred_element_type=jnp.float32)
        logits.append(jnp.maximum(li + bc2_ref[i], 0.0))      # (1, Lq)
    m = jnp.maximum(jnp.maximum(logits[0], logits[1]),
                    jnp.maximum(logits[2], logits[3]))
    es = [jnp.exp(l - m) for l in logits]
    inv = pl.reciprocal(es[0] + es[1] + es[2] + es[3], approx=True)

    out = (es[0] * inv) * feats[0]
    for i in range(1, len(dil)):
        out = out + (es[i] * inv) * feats[i]
    out_ref[0] = out                                          # (Cout, Lq) lane-dense


def msfa_pallas(ral_out, params, dilation_rate_list):
    B, C, H, W = ral_out.shape
    dil = tuple(dilation_rate_list)
    assert len(dil) == 4, "MSFA weighted sum is defined for 4 dilation branches"
    nd = len(dil)
    dmax = max(dil)
    Hp, Wp = H + 2 * dmax, W + 2 * dmax

    Lq = _round_up(H * Wp, 128)                 # lane-dense output width
    smax = 2 * dmax * Wp + 2 * dmax             # largest tap shift
    Lpad = _round_up(Lq + smax, 128)

    xpad = jnp.pad(ral_out, ((0, 0), (0, 0), (dmax, dmax), (dmax, dmax)))
    xflat = xpad.reshape(B, C, Hp * Wp)
    xflat = jnp.pad(xflat, ((0, 0), (0, 0), (0, Lpad - Hp * Wp)))

    Cout = params["wc1"].shape[1]
    kernel = functools.partial(_msfa_kernel, dil=dil, dmax=dmax, Wp=Wp, Lq=Lq)

    # TODO(synk): for very large H*W, add halo-aware spatial tiling (manual DMA
    # double-buffering) so the (C, Lpad) slab need not be fully VMEM-resident.
    out_flat = pl.pallas_call(
        kernel,
        out_shape=jax.ShapeDtypeStruct((B, Cout, Lq), jnp.float32),
        grid=(B,),
        in_specs=[
            pl.BlockSpec((1, C, Lpad), lambda b: (b, 0, 0)),
            pl.BlockSpec((nd, 9, Cout, C), lambda b: (0, 0, 0, 0)),
            pl.BlockSpec((nd, Cout, 1), lambda b: (0, 0, 0)),
            pl.BlockSpec((9, Cout, C), lambda b: (0, 0, 0)),
            pl.BlockSpec((Cout, 1), lambda b: (0, 0)),
            pl.BlockSpec((nd, 1, Cout), lambda b: (0, 0, 0)),
            pl.BlockSpec((nd, 1, 1), lambda b: (0, 0, 0)),
        ],
        out_specs=pl.BlockSpec((1, Cout, Lq), lambda b: (b, 0, 0)),
        compiler_params=pltpu.CompilerParams(
            dimension_semantics=("parallel",),
            vmem_limit_bytes=64 * 1024 * 1024),
    )(xflat, params["wdil"], params["bdil"], params["wc1"],
      params["bc1"], params["wc2"], params["bc2"])

    # crop junk columns and reshape straight back to NCHW
    out = out_flat[:, :, :H * Wp].reshape(B, Cout, H, Wp)[:, :, :, :W]
    return out


# ----------------------------------------------------------------------------
# Parameter init (deterministic, synthetic), pre-laid-out for the kernels
# ----------------------------------------------------------------------------
def init_params(key, in_channels, out_channels, dilation_rate_list):
    C_in, C_out = in_channels, out_channels
    nd = len(dilation_rate_list)
    ks = jax.random.split(key, 2 * nd + 4)
    scale = 0.05

    wdil, bdil = [], []
    for i in range(nd):
        w = jax.random.normal(ks[i], (C_out, C_in, 3, 3), jnp.float32) * scale
        b = jax.random.normal(ks[nd + i], (C_out,), jnp.float32) * scale
        # per-tap matmul layout: (9, C_out, C_in), tap index t = kh*3 + kw
        wdil.append(jnp.transpose(w, (2, 3, 0, 1)).reshape(9, C_out, C_in))
        bdil.append(b.reshape(C_out, 1))
    wdil = jnp.stack(wdil).astype(jnp.bfloat16)          # (nd, 9, C_out, C_in)
    bdil = jnp.stack(bdil)                                # (nd, C_out, 1) f32

    wc1 = jax.random.normal(ks[2 * nd], (C_out, C_in, 3, 3), jnp.float32) * scale
    bc1 = jax.random.normal(ks[2 * nd + 1], (C_out,), jnp.float32) * scale
    wc2 = jax.random.normal(ks[2 * nd + 2], (nd, C_out, 1, 1), jnp.float32) * scale
    bc2 = jax.random.normal(ks[2 * nd + 3], (nd,), jnp.float32) * scale

    return dict(
        wdil=wdil, bdil=bdil,
        wc1=jnp.transpose(wc1, (2, 3, 0, 1)).reshape(9, C_out, C_in)
            .astype(jnp.bfloat16),
        bc1=bc1.reshape(C_out, 1),
        wc2=wc2.reshape(nd, C_out)[:, None, :].astype(jnp.bfloat16),  # (nd,1,Cout)
        bc2=bc2.reshape(nd, 1, 1),
    )


# ----------------------------------------------------------------------------
# CFA forward = RAL + MSFA
# ----------------------------------------------------------------------------
def cfa_forward(background, foreground, params, *, rate=2, softmax_scale=10.0,
                dilation_rate_list=(1, 2, 4, 8)):
    B, C, H, W = background.shape
    h, w = H // rate, W // rate

    # --- RAL ---
    fg_small = bilinear_resize_align_corners(foreground, h, w)       # (B,C,h,w)
    fgcol = im2col_3x3(fg_small, dilation=1)                         # (B, h*w, C*9)
    bgcol = extract_background_patches(background, rate)             # (B, h*w, C*(2r)^2)
    out_patches = ral_pallas(fgcol, bgcol.astype(jnp.bfloat16), softmax_scale)
    if rate == 2:
        ral_out = overlap_add_rate2(out_patches, B, C, H, W, h, w)
    else:
        ral_out = conv_transpose_overlap_add(out_patches, B, C, H, W, h, w, rate)

    # --- MSFA ---
    return msfa_pallas(ral_out, params, dilation_rate_list)


if __name__ == "__main__":
    key = jax.random.PRNGKey(0)
    kb, kf, kp = jax.random.split(key, 3)

    B, C, H, W = 2, 4, 16, 16
    background = jax.random.normal(kb, (B, C, H, W), jnp.float32)
    foreground = jax.random.normal(kf, (B, C, H, W), jnp.float32)

    params = init_params(kp, in_channels=C, out_channels=C,
                         dilation_rate_list=[1, 2, 4, 8])

    out = jax.jit(lambda b, f: cfa_forward(b, f, params))(background, foreground)
    out = jax.block_until_ready(out)
    assert out.shape == (B, C, H, W), out.shape
    assert bool(jnp.all(jnp.isfinite(out)))
    print("KERNEL_OK")
</pallas_src>

<mosaic_0001>
module attributes {stable_mosaic.version = 11 : i64} {
  func.func @_ral_kernel(%arg0: i32, %arg1: i32, %arg2: i32, %arg3: memref<1x64x36xf32, #tpu.memory_space<vmem>>, %arg4: memref<1x64x36xf32, #tpu.memory_space<vmem>>, %arg5: memref<1x64x64xbf16, #tpu.memory_space<vmem>>, %arg6: memref<1x64x64xf32, #tpu.memory_space<vmem>>, %arg7: memref<64x1xf32, #tpu.memory_space<vmem>>, %arg8: memref<64x1xf32, #tpu.memory_space<vmem>>) attributes {dimension_semantics = [#tpu.dimension_semantics<parallel>, #tpu.dimension_semantics<parallel>, #tpu.dimension_semantics<arbitrary>], iteration_bounds = array<i64: 2, 1, 2>, scalar_prefetch = 0 : i64, scratch_operands = 2 : i64, tpu.core_type = #tpu.core_type<tc>, window_params = [{transform_indices = @transform_0, window_bounds = array<i64: 1, 64, 36>}, {transform_indices = @transform_1, window_bounds = array<i64: 1, 64, 36>}, {transform_indices = @transform_2, window_bounds = array<i64: 1, 64, 64>}, {transform_indices = @transform_3, window_bounds = array<i64: 1, 64, 64>}]} {
    %c0_i32 = arith.constant 0 : i32
    %0 = arith.cmpi eq, %arg2, %c0_i32 : i32
    %1 = arith.extui %0 : i1 to i32
    %c0_i32_0 = arith.constant 0 : i32
    %2 = arith.cmpi ne, %1, %c0_i32_0 : i32
    scf.if %2 {
      %cst_14 = arith.constant 0xFF800000 : f32
      %29 = vector.broadcast %cst_14 : f32 to vector<64x1xf32>
      %c0_15 = arith.constant 0 : index
      %c0_16 = arith.constant 0 : index
      %30 = vector.load %arg7[%c0_15, %c0_16] : memref<64x1xf32, #tpu.memory_space<vmem>>, vector<64x1xf32>
      tpu.vector_store %arg7[%c0_15, %c0_16], %29 {strides = array<i32>} : memref<64x1xf32, #tpu.memory_space<vmem>>, vector<64x1xf32>,
      %cst_17 = arith.constant 0.000000e+00 : f32
      %31 = vector.broadcast %cst_17 : f32 to vector<64x1xf32>
      %c0_18 = arith.constant 0 : index
      %c0_19 = arith.constant 0 : index
      %32 = vector.load %arg8[%c0_18, %c0_19] : memref<64x1xf32, #tpu.memory_space<vmem>>, vector<64x1xf32>
      tpu.vector_store %arg8[%c0_18, %c0_19], %31 {strides = array<i32>} : memref<64x1xf32, #tpu.memory_space<vmem>>, vector<64x1xf32>,
    } else {
    }
    %c1_i32 = arith.constant 1 : i32
    %3 = arith.cmpi eq, %arg2, %c1_i32 : i32
    %4 = arith.extui %3 : i1 to i32
    %c0_i32_1 = arith.constant 0 : i32
    %5 = arith.cmpi ne, %4, %c0_i32_1 : i32
    scf.if %5 {
      %cst_14 = arith.constant 0.000000e+00 : f32
      %29 = vector.broadcast %cst_14 : f32 to vector<1x64x64xf32>
      %c0_15 = arith.constant 0 : index
      %c0_16 = arith.constant 0 : index
      %c0_17 = arith.constant 0 : index
      %30 = vector.load %arg6[%c0_15, %c0_16, %c0_17] : memref<1x64x64xf32, #tpu.memory_space<vmem>>, vector<1x64x64xf32>
      tpu.vector_store %arg6[%c0_15, %c0_16, %c0_17], %29 {strides = array<i32>} : memref<1x64x64xf32, #tpu.memory_space<vmem>>, vector<1x64x64xf32>,
    } else {
    }
    %c0 = arith.constant 0 : index
    %c0_2 = arith.constant 0 : index
    %c0_3 = arith.constant 0 : index
    %6 = vector.load %arg4[%c0, %c0_2, %c0_3] : memref<1x64x36xf32, #tpu.memory_space<vmem>>, vector<1x64x36xf32>
    %7 = vector.shape_cast %6 : vector<1x64x36xf32> to vector<64x36xf32>
    %8 = arith.mulf %7, %7 : vector<64x36xf32>
    %cst = arith.constant dense<0.000000e+00> : vector<64xf32>
    %9 = vector.multi_reduction <add>, %8, %cst [1] : vector<64x36xf32> to vector<64xf32>
    %10 = vector.shape_cast %9 : vector<64xf32> to vector<64x1xf32>
    %11 = math.rsqrt %10 : vector<64x1xf32>
    %cst_4 = arith.constant 1.000000e+04 : f32
    %12 = vector.broadcast %cst_4 : f32 to vector<64x1xf32>
    %13 = arith.minimumf %11, %12 : vector<64x1xf32>
    %14 = vector.broadcast %13 : vector<64x1xf32> to vector<64x36xf32>
    %15 = arith.mulf %7, %14 : vector<64x36xf32>
    %16 = arith.truncf %15 : vector<64x36xf32> to vector<64x36xbf16>
    %c0_5 = arith.constant 0 : index
    %c0_6 = arith.constant 0 : index
    %c0_7 = arith.constant 0 : index
    %17 = vector.load %arg3[%c0_5, %c0_6, %c0_7] : memref<1x64x36xf32, #tpu.memory_space<vmem>>, vector<1x64x36xf32>
    %18 = vector.shape_cast %17 : vector<1x64x36xf32> to vector<64x36xf32>
    %19 = arith.truncf %18 : vector<64x36xf32> to vector<64x36xbf16>
    %cst_8 = arith.constant dense<0.000000e+00> : vector<64x64xf32>
    %20 = tpu.matmul %19, %16, %cst_8 {dimension_numbers = #tpu.dot_dimension_numbers<[1], [1], [0], [0], [0, 0, 1, 0], [], []>} : vector<64x36xbf16>, vector<64x36xbf16>, vector<64x64xf32> -> vector<64x64xf32>
    %cst_9 = arith.constant 1.000000e+01 : f32
    %21 = vector.broadcast %cst_9 : f32 to vector<64x64xf32>
    %22 = arith.mulf %20, %21 : vector<64x64xf32>
    %c1_i32_10 = arith.constant 1 : i32
    %23 = arith.cmpi slt, %arg2, %c1_i32_10 : i32
    %24 = arith.extui %23 : i1 to i32
    %c0_i32_11 = arith.constant 0 : i32
    %25 = arith.cmpi ne, %24, %c0_i32_11 : i32
    scf.if %25 {
      %c0_14 = arith.constant 0 : index
      %c0_15 = arith.constant 0 : index
      %29 = vector.load %arg7[%c0_14, %c0_15] : memref<64x1xf32, #tpu.memory_space<vmem>>, vector<64x1xf32>
      %cst_16 = arith.constant dense<0xFF800000> : vector<64xf32>
      %30 = vector.multi_reduction <maximumf>, %22, %cst_16 [1] : vector<64x64xf32> to vector<64xf32>
      %31 = vector.shape_cast %30 : vector<64xf32> to vector<64x1xf32>
      %32 = arith.maximumf %29, %31 : vector<64x1xf32>
      %c0_17 = arith.constant 0 : index
      %c0_18 = arith.constant 0 : index
      %33 = vector.load %arg8[%c0_17, %c0_18] : memref<64x1xf32, #tpu.memory_space<vmem>>, vector<64x1xf32>
      %34 = arith.subf %29, %32 : vector<64x1xf32>
      %35 = math.exp %34 : vector<64x1xf32>
      %36 = arith.mulf %33, %35 : vector<64x1xf32>
      %37 = vector.broadcast %32 : vector<64x1xf32> to vector<64x64xf32>
      %38 = arith.subf %22, %37 : vector<64x64xf32>
      %39 = math.exp %38 : vector<64x64xf32>
      %cst_19 = arith.constant dense<0.000000e+00> : vector<64xf32>
      %40 = vector.multi_reduction <add>, %39, %cst_19 [1] : vector<64x64xf32> to vector<64xf32>
      %41 = vector.shape_cast %40 : vector<64xf32> to vector<64x1xf32>
      %42 = arith.addf %36, %41 : vector<64x1xf32>
      %c0_20 = arith.constant 0 : index
      %c0_21 = arith.constant 0 : index
      %43 = vector.load %arg8[%c0_20, %c0_21] : memref<64x1xf32, #tpu.memory_space<vmem>>, vector<64x1xf32>
      tpu.vector_store %arg8[%c0_20, %c0_21], %42 {strides = array<i32>} : memref<64x1xf32, #tpu.memory_space<vmem>>, vector<64x1xf32>,
      %c0_22 = arith.constant 0 : index
      %c0_23 = arith.constant 0 : index
      %44 = vector.load %arg7[%c0_22, %c0_23] : memref<64x1xf32, #tpu.memory_space<vmem>>, vector<64x1xf32>
      tpu.vector_store %arg7[%c0_22, %c0_23], %32 {strides = array<i32>} : memref<64x1xf32, #tpu.memory_space<vmem>>, vector<64x1xf32>,
    } else {
    }
    %c1_i32_12 = arith.constant 1 : i32
    %26 = arith.cmpi sge, %arg2, %c1_i32_12 : i32
    %27 = arith.extui %26 : i1 to i32
    %c0_i32_13 = arith.constant 0 : i32
    %28 = arith.cmpi ne, %27, %c0_i32_13 : i32
    scf.if %28 {
      %c0_14 = arith.constant 0 : index
      %c0_15 = arith.constant 0 : index
      %29 = vector.load %arg7[%c0_14, %c0_15] : memref<64x1xf32, #tpu.memory_space<vmem>>, vector<64x1xf32>
      %30 = vector.broadcast %29 : vector<64x1xf32> to vector<64x64xf32>
      %31 = arith.subf %22, %30 : vector<64x64xf32>
      %32 = math.exp %31 : vector<64x64xf32>
      %c0_16 = arith.constant 0 : index
      %c0_17 = arith.constant 0 : index
      %33 = vector.load %arg8[%c0_16, %c0_17] : memref<64x1xf32, #tpu.memory_space<vmem>>, vector<64x1xf32>
      %34 = tpu.reciprocal %33 {approx = true} : vector<64x1xf32> -> vector<64x1xf32>
      %35 = vector.broadcast %34 : vector<64x1xf32> to vector<64x64xf32>
      %36 = arith.mulf %32, %35 : vector<64x64xf32>
      %cst_18 = arith.constant 9.99999993E-9 : f32
      %37 = vector.broadcast %cst_18 : f32 to vector<64x64xf32>
      %38 = arith.maximumf %36, %37 : vector<64x64xf32>
      %c0_19 = arith.constant 0 : index
      %c0_20 = arith.constant 0 : index
      %c0_21 = arith.constant 0 : index
      %39 = vector.load %arg6[%c0_19, %c0_20, %c0_21] : memref<1x64x64xf32, #tpu.memory_space<vmem>>, vector<1x64x64xf32>
      %40 = vector.shape_cast %39 : vector<1x64x64xf32> to vector<64x64xf32>
      %41 = arith.truncf %38 : vector<64x64xf32> to vector<64x64xbf16>
      %c0_22 = arith.constant 0 : index
      %c0_23 = arith.constant 0 : index
      %c0_24 = arith.constant 0 : index
      %42 = vector.load %arg5[%c0_22, %c0_23, %c0_24] : memref<1x64x64xbf16, #tpu.memory_space<vmem>>, vector<1x64x64xbf16>
      %43 = vector.shape_cast %42 : vector<1x64x64xbf16> to vector<64x64xbf16>
      %cst_25 = arith.constant dense<0.000000e+00> : vector<64x64xf32>
      %44 = tpu.matmul %41, %43, %cst_25 {dimension_numbers = #tpu.dot_dimension_numbers<[1], [0], [0], [1], [0, 0, 1, 1], [], []>} : vector<64x64xbf16>, vector<64x64xbf16>, vector<64x64xf32> -> vector<64x64xf32>
      %cst_26 = arith.constant 2.500000e-01 : f32
      %45 = vector.broadcast %cst_26 : f32 to vector<64x64xf32>
      %46 = arith.mulf %44, %45 : vector<64x64xf32>
      %47 = arith.addf %40, %46 : vector<64x64xf32>
      %c0_27 = arith.constant 0 : index
      %c0_28 = arith.constant 0 : index
      %c0_29 = arith.constant 0 : index
      %48 = vector.load %arg6[%c0_27, %c0_28, %c0_29] : memref<1x64x64xf32, #tpu.memory_space<vmem>>, vector<1x64x64xf32>
      %49 = vector.shape_cast %48 : vector<1x64x64xf32> to vector<64x64xf32>
      %50 = vector.shape_cast %47 : vector<64x64xf32> to vector<1x64x64xf32>
      tpu.vector_store %arg6[%c0_27, %c0_28, %c0_29], %50 {strides = array<i32>} : memref<1x64x64xf32, #tpu.memory_space<vmem>>, vector<1x64x64xf32>,
    } else {
    }
    return
  }
  func.func @transform_0(%arg0: i32, %arg1: i32, %arg2: i32) -> (i32, i32, i32) {
    %c0_i32 = arith.constant 0 : i32
    %c0_i32_0 = arith.constant 0 : i32
    return %arg0, %arg1, %c0_i32 : i32, i32, i32
  }
  func.func @transform_1(%arg0: i32, %arg1: i32, %arg2: i32) -> (i32, i32, i32) {
    %c1_i32 = arith.constant 1 : i32
    %c0_i32 = arith.constant 0 : i32
    %0 = arith.cmpi eq, %c1_i32, %c0_i32 : i32
    %c1_i32_0 = arith.constant 1 : i32
    %1 = arith.select %0, %c1_i32_0, %c1_i32 : i32
    %2 = arith.remsi %arg2, %1 : i32
    %c0_i32_1 = arith.constant 0 : i32
    %3 = arith.cmpi ne, %2, %c0_i32_1 : i32
    %c0_i32_2 = arith.constant 0 : i32
    %4 = arith.cmpi slt, %2, %c0_i32_2 : i32
    %c0_i32_3 = arith.constant 0 : i32
    %5 = arith.cmpi slt, %1, %c0_i32_3 : i32
    %6 = arith.xori %4, %5 : i1
    %7 = arith.andi %6, %3 : i1
    %8 = arith.addi %2, %1 : i32
    %9 = arith.select %7, %8, %2 : i32
    %c0_i32_4 = arith.constant 0 : i32
    %c0_i32_5 = arith.constant 0 : i32
    return %arg0, %9, %c0_i32_4 : i32, i32, i32
  }
  func.func @transform_2(%arg0: i32, %arg1: i32, %arg2: i32) -> (i32, i32, i32) {
    %c1_i32 = arith.constant 1 : i32
    %0 = arith.subi %arg2, %c1_i32 : i32
    %c0_i32 = arith.constant 0 : i32
    %1 = arith.maxsi %0, %c0_i32 : i32
    %c0_i32_0 = arith.constant 0 : i32
    %c0_i32_1 = arith.constant 0 : i32
    return %arg0, %1, %c0_i32_0 : i32, i32, i32
  }
  func.func @transform_3(%arg0: i32, %arg1: i32, %arg2: i32) -> (i32, i32, i32) {
    %c0_i32 = arith.constant 0 : i32
    %c0_i32_0 = arith.constant 0 : i32
    return %arg0, %arg1, %c0_i32 : i32, i32, i32
  }
}

module attributes {stable_mosaic.version = 11 : i64} {
  func.func @_msfa_kernel(%arg0: i32, %arg1: memref<1x4x1152xf32, #tpu.memory_space<vmem>>, %arg2: memref<4x9x4x4xbf16, #tpu.memory_space<vmem>>, %arg3: memref<4x4x1xf32, #tpu.memory_space<vmem>>, %arg4: memref<9x4x4xbf16, #tpu.memory_space<vmem>>, %arg5: memref<4x1xf32, #tpu.memory_space<vmem>>, %arg6: memref<4x1x4xbf16, #tpu.memory_space<vmem>>, %arg7: memref<4x1x1xf32, #tpu.memory_space<vmem>>, %arg8: memref<1x4x512xf32, #tpu.memory_space<vmem>>) attributes {dimension_semantics = [#tpu.dimension_semantics<parallel>], iteration_bounds = array<i64: 2>, scalar_prefetch = 0 : i64, scratch_operands = 0 : i64, tpu.core_type = #tpu.core_type<tc>, window_params = [{transform_indices = @transform_0, window_bounds = array<i64: 1, 4, 1152>}, {pipeline_mode = #tpu.pipeline_mode<synchronous>, transform_indices = @transform_1, window_bounds = array<i64: 4, 9, 4, 4>}, {pipeline_mode = #tpu.pipeline_mode<synchronous>, transform_indices = @transform_2, window_bounds = array<i64: 4, 4, 1>}, {pipeline_mode = #tpu.pipeline_mode<synchronous>, transform_indices = @transform_3, window_bounds = array<i64: 9, 4, 4>}, {pipeline_mode = #tpu.pipeline_mode<synchronous>, transform_indices = @transform_4, window_bounds = array<i64: 4, 1>}, {pipeline_mode = #tpu.pipeline_mode<synchronous>, transform_indices = @transform_5, window_bounds = array<i64: 4, 1, 4>}, {pipeline_mode = #tpu.pipeline_mode<synchronous>, transform_indices = @transform_6, window_bounds = array<i64: 4, 1, 1>}, {transform_indices = @transform_7, window_bounds = array<i64: 1, 4, 512>}]} {
    %c0 = arith.constant 0 : index
    %c0_0 = arith.constant 0 : index
    %c0_1 = arith.constant 0 : index
    %c0_2 = arith.constant 0 : index
    %0 = vector.load %arg2[%c0, %c0_0, %c0_1, %c0_2] : memref<4x9x4x4xbf16, #tpu.memory_space<vmem>>, vector<1x1x4x4xbf16>
    %1 = vector.shape_cast %0 : vector<1x1x4x4xbf16> to vector<4x4xbf16>
    %c0_3 = arith.constant 0 : index
    %c0_4 = arith.constant 0 : index
    %c231 = arith.constant 231 : index
    %2 = vector.load %arg1[%c0_3, %c0_4, %c231] : memref<1x4x1152xf32, #tpu.memory_space<vmem>>, vector<1x4x512xf32>
    %3 = vector.shape_cast %2 : vector<1x4x512xf32> to vector<4x512xf32>
    %4 = arith.truncf %3 : vector<4x512xf32> to vector<4x512xbf16>
    %cst = arith.constant dense<0.000000e+00> : vector<4x512xf32>
    %5 = tpu.matmul %1, %4, %cst {dimension_numbers = #tpu.dot_dimension_numbers<[1], [0], [0], [1], [0, 0, 1, 1], [], []>} : vector<4x4xbf16>, vector<4x512xbf16>, vector<4x512xf32> -> vector<4x512xf32>
    %c0_5 = arith.constant 0 : index
    %c1 = arith.constant 1 : index
    %c0_6 = arith.constant 0 : index
    %c0_7 = arith.constant 0 : index
    %6 = vector.load %arg2[%c0_5, %c1, %c0_6, %c0_7] : memref<4x9x4x4xbf16, #tpu.memory_space<vmem>>, vector<1x1x4x4xbf16>
    %7 = vector.shape_cast %6 : vector<1x1x4x4xbf16> to vector<4x4xbf16>
    %c0_8 = arith.constant 0 : index
    %c0_9 = arith.constant 0 : index
    %c232 = arith.constant 232 : index
    %8 = vector.load %arg1[%c0_8, %c0_9, %c232] : memref<1x4x1152xf32, #tpu.memory_space<vmem>>, vector<1x4x512xf32>
    %9 = vector.shape_cast %8 : vector<1x4x512xf32> to vector<4x512xf32>
    %10 = arith.truncf %9 : vector<4x512xf32> to vector<4x512xbf16>
    %cst_10 = arith.constant dense<0.000000e+00> : vector<4x512xf32>
    %11 = tpu.matmul %7, %10, %cst_10 {dimension_numbers = #tpu.dot_dimension_numbers<[1], [0], [0], [1], [0, 0, 1, 1], [], []>} : vector<4x4xbf16>, vector<4x512xbf16>, vector<4x512xf32> -> vector<4x512xf32>
    %12 = arith.addf %5, %11 : vector<4x512xf32>
    %c0_11 = arith.constant 0 : index
    %c2 = arith.constant 2 : index
    %c0_12 = arith.constant 0 : index
    %c0_13 = arith.constant 0 : index
    %13 = vector.load %arg2[%c0_11, %c2, %c0_12, %c0_13] : memref<4x9x4x4xbf16, #tpu.memory_space<vmem>>, vector<1x1x4x4xbf16>
    %14 = vector.shape_cast %13 : vector<1x1x4x4xbf16> to vector<4x4xbf16>
    %c0_14 = arith.constant 0 : index
    %c0_15 = arith.constant 0 : index
    %c233 = arith.constant 233 : index
    %15 = vector.load %arg1[%c0_14, %c0_15, %c233] : memref<1x4x1152xf32, #tpu.memory_space<vmem>>, vector<1x4x512xf32>
    %16 = vector.shape_cast %15 : vector<1x4x512xf32> to vector<4x512xf32>
    %17 = arith.truncf %16 : vector<4x512xf32> to vector<4x512xbf16>
    %cst_16 = arith.constant dense<0.000000e+00> : vector<4x512xf32>
    %18 = tpu.matmul %14, %17, %cst_16 {dimension_numbers = #tpu.dot_dimension_numbers<[1], [0], [0], [1], [0, 0, 1, 1], [], []>} : vector<4x4xbf16>, vector<4x512xbf16>, vector<4x512xf32> -> vector<4x512xf32>
    %19 = arith.addf %12, %18 : vector<4x512xf32>
    %c0_17 = arith.constant 0 : index
    %c3 = arith.constant 3 : index
    %c0_18 = arith.constant 0 : index
    %c0_19 = arith.constant 0 : index
    %20 = vector.load %arg2[%c0_17, %c3, %c0_18, %c0_19] : memref<4x9x4x4xbf16, #tpu.memory_space<vmem>>, vector<1x1x4x4xbf16>
    %21 = vector.shape_cast %20 : vector<1x1x4x4xbf16> to vector<4x4xbf16>
    %c0_20 = arith.constant 0 : index
    %c0_21 = arith.constant 0 : index
    %c263 = arith.constant 263 : index
    %22 = vector.load %arg1[%c0_20, %c0_21, %c263] : memref<1x4x1152xf32, #tpu.memory_space<vmem>>, vector<1x4x512xf32>
    %23 = vector.shape_cast %22 : vector<1x4x512xf32> to vector<4x512xf32>
    %24 = arith.truncf %23 : vector<4x512xf32> to vector<4x512xbf16>
    %cst_22 = arith.constant dense<0.000000e+00> : vector<4x512xf32>
    %25 = tpu.matmul %21, %24, %cst_22 {dimension_numbers = #tpu.dot_dimension_numbers<[1], [0], [0], [1], [0, 0, 1, 1], [], []>} : vector<4x4xbf16>, vector<4x512xbf16>, vector<4x512xf32> -> vector<4x512xf32>
    %26 = arith.addf %19, %25 : vector<4x512xf32>
    %c0_23 = arith.constant 0 : index
    %c4 = arith.constant 4 : index
    %c0_24 = arith.constant 0 : index
    %c0_25 = arith.constant 0 : index
    %27 = vector.load %arg2[%c0_23, %c4, %c0_24, %c0_25] : memref<4x9x4x4xbf16, #tpu.memory_space<vmem>>, vector<1x1x4x4xbf16>
    %28 = vector.shape_cast %27 : vector<1x1x4x4xbf16> to vector<4x4xbf16>
    %c0_26 = arith.constant 0 : index
    %c0_27 = arith.constant 0 : index
    %c264 = arith.constant 264 : index
    %29 = vector.load %arg1[%c0_26, %c0_27, %c264] : memref<1x4x1152xf32, #tpu.memory_space<vmem>>, vector<1x4x512xf32>
    %30 = vector.shape_cast %29 : vector<1x4x512xf32> to vector<4x512xf32>
    %31 = arith.truncf %30 : vector<4x512xf32> to vector<4x512xbf16>
    %cst_28 = arith.constant dense<0.000000e+00> : vector<4x512xf32>
    %32 = tpu.matmul %28, %31, %cst_28 {dimension_numbers = #tpu.dot_dimension_numbers<[1], [0], [0], [1], [0, 0, 1, 1], [], []>} : vector<4x4xbf16>, vector<4x512xbf16>, vector<4x512xf32> -> vector<4x512xf32>
    %33 = arith.addf %26, %32 : vector<4x512xf32>
    %c0_29 = arith.constant 0 : index
    %c5 = arith.constant 5 : index
    %c0_30 = arith.constant 0 : index
    %c0_31 = arith.constant 0 : index
    %34 = vector.load %arg2[%c0_29, %c5, %c0_30, %c0_31] : memref<4x9x4x4xbf16, #tpu.memory_space<vmem>>, vector<1x1x4x4xbf16>
    %35 = vector.shape_cast %34 : vector<1x1x4x4xbf16> to vector<4x4xbf16>
    %c0_32 = arith.constant 0 : index
    %c0_33 = arith.constant 0 : index
    %c265 = arith.constant 265 : index
    %36 = vector.load %arg1[%c0_32, %c0_33, %c265] : memref<1x4x1152xf32, #tpu.memory_space<vmem>>, vector<1x4x512xf32>
    %37 = vector.shape_cast %36 : vector<1x4x512xf32> to vector<4x512xf32>
    %38 = arith.truncf %37 : vector<4x512xf32> to vector<4x512xbf16>
    %cst_34 = arith.constant dense<0.000000e+00> : vector<4x512xf32>
    %39 = tpu.matmul %35, %38, %cst_34 {dimension_numbers = #tpu.dot_dimension_numbers<[1], [0], [0], [1], [0, 0, 1, 1], [], []>} : vector<4x4xbf16>, vector<4x512xbf16>, vector<4x512xf32> -> vector<4x512xf32>
    %40 = arith.addf %33, %39 : vector<4x512xf32>
    %c0_35 = arith.constant 0 : index
    %c6 = arith.constant 6 : index
    %c0_36 = arith.constant 0 : index
    %c0_37 = arith.constant 0 : index
    %41 = vector.load %arg2[%c0_35, %c6, %c0_36, %c0_37] : memref<4x9x4x4xbf16, #tpu.memory_space<vmem>>, vector<1x1x4x4xbf16>
    %42 = vector.shape_cast %41 : vector<1x1x4x4xbf16> to vector<4x4xbf16>
    %c0_38 = arith.constant 0 : index
    %c0_39 = arith.constant 0 : index
    %c295 = arith.constant 295 : index
    %43 = vector.load %arg1[%c0_38, %c0_39, %c295] : memref<1x4x1152xf32, #tpu.memory_space<vmem>>, vector<1x4x512xf32>
    %44 = vector.shape_cast %43 : vector<1x4x512xf32> to vector<4x512xf32>
    %45 = arith.truncf %44 : vector<4x512xf32> to vector<4x512xbf16>
    %cst_40 = arith.constant dense<0.000000e+00> : vector<4x512xf32>
    %46 = tpu.matmul %42, %45, %cst_40 {dimension_numbers = #tpu.dot_dimension_numbers<[1], [0], [0], [1], [0, 0, 1, 1], [], []>} : vector<4x4xbf16>, vector<4x512xbf16>, vector<4x512xf32> -> vector<4x512xf32>
    %47 = arith.addf %40, %46 : vector<4x512xf32>
    %c0_41 = arith.constant 0 : index
    %c7 = arith.constant 7 : index
    %c0_42 = arith.constant 0 : index
    %c0_43 = arith.constant 0 : index
    %48 = vector.load %arg2[%c0_41, %c7, %c0_42, %c0_43] : memref<4x9x4x4xbf16, #tpu.memory_space<vmem>>, vector<1x1x4x4xbf16>
    %49 = vector.shape_cast %48 : vector<1x1x4x4xbf16> to vector<4x4xbf16>
    %c0_44 = arith.constant 0 : index
    %c0_45 = arith.constant 0 : index
    %c296 = arith.constant 296 : index
    %50 = vector.load %arg1[%c0_44, %c0_45, %c296] : memref<1x4x1152xf32, #tpu.memory_space<vmem>>, vector<1x4x512xf32>
    %51 = vector.shape_cast %50 : vector<1x4x512xf32> to vector<4x512xf32>
    %52 = arith.truncf %51 : vector<4x512xf32> to vector<4x512xbf16>
    %cst_46 = arith.constant dense<0.000000e+00> : vector<4x512xf32>
    %53 = tpu.matmul %49, %52, %cst_46 {dimension_numbers = #tpu.dot_dimension_numbers<[1], [0], [0], [1], [0, 0, 1, 1], [], []>} : vector<4x4xbf16>, vector<4x512xbf16>, vector<4x512xf32> -> vector<4x512xf32>
    %54 = arith.addf %47, %53 : vector<4x512xf32>
    %c0_47 = arith.constant 0 : index
    %c8 = arith.constant 8 : index
    %c0_48 = arith.constant 0 : index
    %c0_49 = arith.constant 0 : index
    %55 = vector.load %arg2[%c0_47, %c8, %c0_48, %c0_49] : memref<4x9x4x4xbf16, #tpu.memory_space<vmem>>, vector<1x1x4x4xbf16>
    %56 = vector.shape_cast %55 : vector<1x1x4x4xbf16> to vector<4x4xbf16>
    %c0_50 = arith.constant 0 : index
    %c0_51 = arith.constant 0 : index
    %c297 = arith.constant 297 : index
    %57 = vector.load %arg1[%c0_50, %c0_51, %c297] : memref<1x4x1152xf32, #tpu.memory_space<vmem>>, vector<1x4x512xf32>
    %58 = vector.shape_cast %57 : vector<1x4x512xf32> to vector<4x512xf32>
    %59 = arith.truncf %58 : vector<4x512xf32> to vector<4x512xbf16>
    %cst_52 = arith.constant dense<0.000000e+00> : vector<4x512xf32>
    %60 = tpu.matmul %56, %59, %cst_52 {dimension_numbers = #tpu.dot_dimension_numbers<[1], [0], [0], [1], [0, 0, 1, 1], [], []>} : vector<4x4xbf16>, vector<4x512xbf16>, vector<4x512xf32> -> vector<4x512xf32>
    %61 = arith.addf %54, %60 : vector<4x512xf32>
    %c0_53 = arith.constant 0 : index
    %c0_54 = arith.constant 0 : index
    %c0_55 = arith.constant 0 : index
    %62 = vector.load %arg3[%c0_53, %c0_54, %c0_55] : memref<4x4x1xf32, #tpu.memory_space<vmem>>, vector<1x4x1xf32>
    %63 = vector.shape_cast %62 : vector<1x4x1xf32> to vector<4x1xf32>
    %64 = vector.broadcast %63 : vector<4x1xf32> to vector<4x512xf32>
    %65 = arith.addf %61, %64 : vector<4x512xf32>
    %cst_56 = arith.constant 0.000000e+00 : f32
    %66 = vector.broadcast %cst_56 : f32 to vector<4x512xf32>
    %67 = arith.maximumf %65, %66 : vector<4x512xf32>
    %c1_57 = arith.constant 1 : index
    %c0_58 = arith.constant 0 : index
    %c0_59 = arith.constant 0 : index
    %c0_60 = arith.constant 0 : index
    %68 = vector.load %arg2[%c1_57, %c0_58, %c0_59, %c0_60] : memref<4x9x4x4xbf16, #tpu.memory_space<vmem>>, vector<1x1x4x4xbf16>
    %69 = vector.shape_cast %68 : vector<1x1x4x4xbf16> to vector<4x4xbf16>
    %c0_61 = arith.constant 0 : index
    %c0_62 = arith.constant 0 : index
    %c198 = arith.constant 198 : index
    %70 = vector.load %arg1[%c0_61, %c0_62, %c198] : memref<1x4x1152xf32, #tpu.memory_space<vmem>>, vector<1x4x512xf32>
    %71 = vector.shape_cast %70 : vector<1x4x512xf32> to vector<4x512xf32>
    %72 = arith.truncf %71 : vector<4x512xf32> to vector<4x512xbf16>
    %cst_63 = arith.constant dense<0.000000e+00> : vector<4x512xf32>
    %73 = tpu.matmul %69, %72, %cst_63 {dimension_numbers = #tpu.dot_dimension_numbers<[1], [0], [0], [1], [0, 0, 1, 1], [], []>} : vector<4x4xbf16>, vector<4x512xbf16>, vector<4x512xf32> -> vector<4x512xf32>
    %c1_64 = arith.constant 1 : index
    %c1_65 = arith.constant 1 : index
    %c0_66 = arith.constant 0 : index
    %c0_67 = arith.constant 0 : index
    %74 = vector.load %arg2[%c1_64, %c1_65, %c0_66, %c0_67] : memref<4x9x4x4xbf16, #tpu.memory_space<vmem>>, vector<1x1x4x4xbf16>
    %75 = vector.shape_cast %74 : vector<1x1x4x4xbf16> to vector<4x4xbf16>
    %c0_68 = arith.constant 0 : index
    %c0_69 = arith.constant 0 : index
    %c200 = arith.constant 200 : index
    %76 = vector.load %arg1[%c0_68, %c0_69, %c200] : memref<1x4x1152xf32, #tpu.memory_space<vmem>>, vector<1x4x512xf32>
    %77 = vector.shape_cast %76 : vector<1x4x512xf32> to vector<4x512xf32>
    %78 = arith.truncf %77 : vector<4x512xf32> to vector<4x512xbf16>
    %cst_70 = arith.constant dense<0.000000e+00> : vector<4x512xf32>
    %79 = tpu.matmul %75, %78, %cst_70 {dimension_numbers = #tpu.dot_dimension_numbers<[1], [0], [0], [1], [0, 0, 1, 1], [], []>} : vector<4x4xbf16>, vector<4x512xbf16>, vector<4x512xf32> -> vector<4x512xf32>
    %80 = arith.addf %73, %79 : vector<4x512xf32>
    %c1_71 = arith.constant 1 : index
    %c2_72 = arith.constant 2 : index
    %c0_73 = arith.constant 0 : index
    %c0_74 = arith.constant 0 : index
    %81 = vector.load %arg2[%c1_71, %c2_72, %c0_73, %c0_74] : memref<4x9x4x4xbf16, #tpu.memory_space<vmem>>, vector<1x1x4x4xbf16>
    %82 = vector.shape_cast %81 : vector<1x1x4x4xbf16> to vector<4x4xbf16>
    %c0_75 = arith.constant 0 : index
    %c0_76 = arith.constant 0 : index
    %c202 = arith.constant 202 : index
    %83 = vector.load %arg1[%c0_75, %c0_76, %c202] : memref<1x4x1152xf32, #tpu.memory_space<vmem>>, vector<1x4x512xf32>
    %84 = vector.shape_cast %83 : vector<1x4x512xf32> to vector<4x512xf32>
    %85 = arith.truncf %84 : vector<4x512xf32> to vector<4x512xbf16>
    %cst_77 = arith.constant dense<0.000000e+00> : vector<4x512xf32>
    %86 = tpu.matmul %82, %85, %cst_77 {dimension_numbers = #tpu.dot_dimension_numbers<[1], [0], [0], [1], [0, 0, 1, 1], [], []>} : vector<4x4xbf16>, vector<4x512xbf16>, vector<4x512xf32> -> vector<4x512xf32>
    %87 = arith.addf %80, %86 : vector<4x512xf32>
    %c1_78 = arith.constant 1 : index
    %c3_79 = arith.constant 3 : index
    %c0_80 = arith.constant 0 : index
    %c0_81 = arith.constant 0 : index
    %88 = vector.load %arg2[%c1_78, %c3_79, %c0_80, %c0_81] : memref<4x9x4x4xbf16, #tpu.memory_space<vmem>>, vector<1x1x4x4xbf16>
    %89 = vector.shape_cast %88 : vector<1x1x4x4xbf16> to vector<4x4xbf16>
    %c0_82 = arith.constant 0 : index
    %c0_83 = arith.constant 0 : index
    %c262 = arith.constant 262 : index
    %90 = vector.load %arg1[%c0_82, %c0_83, %c262] : memref<1x4x1152xf32, #tpu.memory_space<vmem>>, vector<1x4x512xf32>
    %91 = vector.shape_cast %90 : vector<1x4x512xf32> to vector<4x512xf32>
    %92 = arith.truncf %91 : vector<4x512xf32> to vector<4x512xbf16>
    %cst_84 = arith.constant dense<0.000000e+00> : vector<4x512xf32>
    %93 = tpu.matmul %89, %92, %cst_84 {dimension_numbers = #tpu.dot_dimension_numbers<[1], [0], [0], [1], [0, 0, 1, 1], [], []>} : vector<4x4xbf16>, vector<4x512xbf16>, vector<4x512xf32> -> vector<4x512xf32>
    %94 = arith.addf %87, %93 : vector<4x512xf32>
    %c1_85 = arith.constant 1 : index
    %c4_86 = arith.constant 4 : index
    %c0_87 = arith.constant 0 : index
    %c0_88 = arith.constant 0 : index
    %95 = vector.load %arg2[%c1_85, %c4_86, %c0_87, %c0_88] : memref<4x9x4x4xbf16, #tpu.memory_space<vmem>>, vector<1x1x4x4xbf16>
    %96 = vector.shape_cast %95 : vector<1x1x4x4xbf16> to vector<4x4xbf16>
    %cst_89 = arith.constant dense<0.000000e+00> : vector<4x512xf32>
    %97 = tpu.matmul %96, %31, %cst_89 {dimension_numbers = #tpu.dot_dimension_numbers<[1], [0], [0], [1], [0, 0, 1, 1], [], []>} : vector<4x4xbf16>, vector<4x512xbf16>, vector<4x512xf32> -> vector<4x512xf32>
    %98 = arith.addf %94, %97 : vector<4x512xf32>
    %c1_90 = arith.constant 1 : index
    %c5_91 = arith.constant 5 : index
    %c0_92 = arith.constant 0 : index
    %c0_93 = arith.constant 0 : index
    %99 = vector.load %arg2[%c1_90, %c5_91, %c0_92, %c0_93] : memref<4x9x4x4xbf16, #tpu.memory_space<vmem>>, vector<1x1x4x4xbf16>
    %100 = vector.shape_cast %99 : vector<1x1x4x4xbf16> to vector<4x4xbf16>
    %c0_94 = arith.constant 0 : index
    %c0_95 = arith.constant 0 : index
    %c266 = arith.constant 266 : index
    %101 = vector.load %arg1[%c0_94, %c0_95, %c266] : memref<1x4x1152xf32, #tpu.memory_space<vmem>>, vector<1x4x512xf32>
    %102 = vector.shape_cast %101 : vector<1x4x512xf32> to vector<4x512xf32>
    %103 = arith.truncf %102 : vector<4x512xf32> to vector<4x512xbf16>
    %cst_96 = arith.constant dense<0.000000e+00> : vector<4x512xf32>
    %104 = tpu.matmul %100, %103, %cst_96 {dimension_numbers = #tpu.dot_dimension_numbers<[1], [0], [0], [1], [0, 0, 1, 1], [], []>} : vector<4x4xbf16>, vector<4x512xbf16>, vector<4x512xf32> -> vector<4x512xf32>
    %105 = arith.addf %98, %104 : vector<4x512xf32>
    %c1_97 = arith.constant 1 : index
    %c6_98 = arith.constant 6 : index
    %c0_99 = arith.constant 0 : index
    %c0_100 = arith.constant 0 : index
    %106 = vector.load %arg2[%c1_97, %c6_98, %c0_99, %c0_100] : memref<4x9x4x4xbf16, #tpu.memory_space<vmem>>, vector<1x1x4x4xbf16>
    %107 = vector.shape_cast %106 : vector<1x1x4x4xbf16> to vector<4x4xbf16>
    %c0_101 = arith.constant 0 : index
    %c0_102 = arith.constant 0 : index
    %c326 = arith.constant 326 : index
    %108 = vector.load %arg1[%c0_101, %c0_102, %c326] : memref<1x4x1152xf32, #tpu.memory_space<vmem>>, vector<1x4x512xf32>
    %109 = vector.shape_cast %108 : vector<1x4x512xf32> to vector<4x512xf32>
    %110 = arith.truncf %109 : vector<4x512xf32> to vector<4x512xbf16>
    %cst_103 = arith.constant dense<0.000000e+00> : vector<4x512xf32>
    %111 = tpu.matmul %107, %110, %cst_103 {dimension_numbers = #tpu.dot_dimension_numbers<[1], [0], [0], [1], [0, 0, 1, 1], [], []>} : vector<4x4xbf16>, vector<4x512xbf16>, vector<4x512xf32> -> vector<4x512xf32>
    %112 = arith.addf %105, %111 : vector<4x512xf32>
    %c1_104 = arith.constant 1 : index
    %c7_105 = arith.constant 7 : index
    %c0_106 = arith.constant 0 : index
    %c0_107 = arith.constant 0 : index
    %113 = vector.load %arg2[%c1_104, %c7_105, %c0_106, %c0_107] : memref<4x9x4x4xbf16, #tpu.memory_space<vmem>>, vector<1x1x4x4xbf16>
    %114 = vector.shape_cast %113 : vector<1x1x4x4xbf16> to vector<4x4xbf16>
    %c0_108 = arith.constant 0 : index
    %c0_109 = arith.constant 0 : index
    %c328 = arith.constant 328 : index
    %115 = vector.load %arg1[%c0_108, %c0_109, %c328] : memref<1x4x1152xf32, #tpu.memory_space<vmem>>, vector<1x4x512xf32>
    %116 = vector.shape_cast %115 : vector<1x4x512xf32> to vector<4x512xf32>
    %117 = arith.truncf %116 : vector<4x512xf32> to vector<4x512xbf16>
    %cst_110 = arith.constant dense<0.000000e+00> : vector<4x512xf32>
    %118 = tpu.matmul %114, %117, %cst_110 {dimension_numbers = #tpu.dot_dimension_numbers<[1], [0], [0], [1], [0, 0, 1, 1], [], []>} : vector<4x4xbf16>, vector<4x512xbf16>, vector<4x512xf32> -> vector<4x512xf32>
    %119 = arith.addf %112, %118 : vector<4x512xf32>
    %c1_111 = arith.constant 1 : index
    %c8_112 = arith.constant 8 : index
    %c0_113 = arith.constant 0 : index
    %c0_114 = arith.constant 0 : index
    %120 = vector.load %arg2[%c1_111, %c8_112, %c0_113, %c0_114] : memref<4x9x4x4xbf16, #tpu.memory_space<vmem>>, vector<1x1x4x4xbf16>
    %121 = vector.shape_cast %120 : vector<1x1x4x4xbf16> to vector<4x4xbf16>
    %c0_115 = arith.constant 0 : index
    %c0_116 = arith.constant 0 : index
    %c330 = arith.constant 330 : index
    %122 = vector.load %arg1[%c0_115, %c0_116, %c330] : memref<1x4x1152xf32, #tpu.memory_space<vmem>>, vector<1x4x512xf32>
    %123 = vector.shape_cast %122 : vector<1x4x512xf32> to vector<4x512xf32>
    %124 = arith.truncf %123 : vector<4x512xf32> to vector<4x512xbf16>
    %cst_117 = arith.constant dense<0.000000e+00> : vector<4x512xf32>
    %125 = tpu.matmul %121, %124, %cst_117 {dimension_numbers = #tpu.dot_dimension_numbers<[1], [0], [0], [1], [0, 0, 1, 1], [], []>} : vector<4x4xbf16>, vector<4x512xbf16>, vector<4x512xf32> -> vector<4x512xf32>
    %126 = arith.addf %119, %125 : vector<4x512xf32>
    %c1_118 = arith.constant 1 : index
    %c0_119 = arith.constant 0 : index
    %c0_120 = arith.constant 0 : index
    %127 = vector.load %arg3[%c1_118, %c0_119, %c0_120] : memref<4x4x1xf32, #tpu.memory_space<vmem>>, vector<1x4x1xf32>
    %128 = vector.shape_cast %127 : vector<1x4x1xf32> to vector<4x1xf32>
    %129 = vector.broadcast %128 : vector<4x1xf32> to vector<4x512xf32>
    %130 = arith.addf %126, %129 : vector<4x512xf32>
    %cst_121 = arith.constant 0.000000e+00 : f32
    %131 = vector.broadcast %cst_121 : f32 to vector<4x512xf32>
    %132 = arith.maximumf %130, %131 : vector<4x512xf32>
    %c2_122 = arith.constant 2 : index
    %c0_123 = arith.constant 0 : index
    %c0_124 = arith.constant 0 : index
    %c0_125 = arith.constant 0 : index
    %133 = vector.load %arg2[%c2_122, %c0_123, %c0_124, %c0_125] : memref<4x9x4x4xbf16, #tpu.memory_space<vmem>>, vector<1x1x4x4xbf16>
    %134 = vector.shape_cast %133 : vector<1x1x4x4xbf16> to vector<4x4xbf16>
    %c0_126 = arith.constant 0 : index
    %c0_127 = arith.constant 0 : index
    %c132 = arith.constant 132 : index
    %135 = vector.load %arg1[%c0_126, %c0_127, %c132] : memref<1x4x1152xf32, #tpu.memory_space<vmem>>, vector<1x4x512xf32>
    %136 = vector.shape_cast %135 : vector<1x4x512xf32> to vector<4x512xf32>
    %137 = arith.truncf %136 : vector<4x512xf32> to vector<4x512xbf16>
    %cst_128 = arith.constant dense<0.000000e+00> : vector<4x512xf32>
    %138 = tpu.matmul %134, %137, %cst_128 {dimension_numbers = #tpu.dot_dimension_numbers<[1], [0], [0], [1], [0, 0, 1, 1], [], []>} : vector<4x4xbf16>, vector<4x512xbf16>, vector<4x512xf32> -> vector<4x512xf32>
    %c2_129 = arith.constant 2 : index
    %c1_130 = arith.constant 1 : index
    %c0_131 = arith.constant 0 : index
    %c0_132 = arith.constant 0 : index
    %139 = vector.load %arg2[%c2_129, %c1_130, %c0_131, %c0_132] : memref<4x9x4x4xbf16, #tpu.memory_space<vmem>>, vector<1x1x4x4xbf16>
    %140 = vector.shape_cast %139 : vector<1x1x4x4xbf16> to vector<4x4xbf16>
    %c0_133 = arith.constant 0 : index
    %c0_134 = arith.constant 0 : index
    %c136 = arith.constant 136 : index
    %141 = vector.load %arg1[%c0_133, %c0_134, %c136] : memref<1x4x1152xf32, #tpu.memory_space<vmem>>, vector<1x4x512xf32>
    %142 = vector.shape_cast %141 : vector<1x4x512xf32> to vector<4x512xf32>
    %143 = arith.truncf %142 : vector<4x512xf32> to vector<4x512xbf16>
    %cst_135 = arith.constant dense<0.000000e+00> : vector<4x512xf32>
    %144 = tpu.matmul %140, %143, %cst_135 {dimension_numbers = #tpu.dot_dimension_numbers<[1], [0], [0], [1], [0, 0, 1, 1], [], []>} : vector<4x4xbf16>, vector<4x512xbf16>, vector<4x512xf32> -> vector<4x512xf32>
    %145 = arith.addf %138, %144 : vector<4x512xf32>
    %c2_136 = arith.constant 2 : index
    %c2_137 = arith.constant 2 : index
    %c0_138 = arith.constant 0 : index
    %c0_139 = arith.constant 0 : index
    %146 = vector.load %arg2[%c2_136, %c2_137, %c0_138, %c0_139] : memref<4x9x4x4xbf16, #tpu.memory_space<vmem>>, vector<1x1x4x4xbf16>
    %147 = vector.shape_cast %146 : vector<1x1x4x4xbf16> to vector<4x4xbf16>
    %c0_140 = arith.constant 0 : index
    %c0_141 = arith.constant 0 : index
    %c140 = arith.constant 140 : index
    %148 = vector.load %arg1[%c0_140, %c0_141, %c140] : memref<1x4x1152xf32, #tpu.memory_space<vmem>>, vector<1x4x512xf32>
    %149 = vector.shape_cast %148 : vector<1x4x512xf32> to vector<4x512xf32>
    %150 = arith.truncf %149 : vector<4x512xf32> to vector<4x512xbf16>
    %cst_142 = arith.constant dense<0.000000e+00> : vector<4x512xf32>
    %151 = tpu.matmul %147, %150, %cst_142 {dimension_numbers = #tpu.dot_dimension_numbers<[1], [0], [0], [1], [0, 0, 1, 1], [], []>} : vector<4x4xbf16>, vector<4x512xbf16>, vector<4x512xf32> -> vector<4x512xf32>
    %152 = arith.addf %145, %151 : vector<4x512xf32>
    %c2_143 = arith.constant 2 : index
    %c3_144 = arith.constant 3 : index
    %c0_145 = arith.constant 0 : index
    %c0_146 = arith.constant 0 : index
    %153 = vector.load %arg2[%c2_143, %c3_144, %c0_145, %c0_146] : memref<4x9x4x4xbf16, #tpu.memory_space<vmem>>, vector<1x1x4x4xbf16>
    %154 = vector.shape_cast %153 : vector<1x1x4x4xbf16> to vector<4x4xbf16>
    %c0_147 = arith.constant 0 : index
    %c0_148 = arith.constant 0 : index
    %c260 = arith.constant 260 : index
    %155 = vector.load %arg1[%c0_147, %c0_148, %c260] : memref<1x4x1152xf32, #tpu.memory_space<vmem>>, vector<1x4x512xf32>
    %156 = vector.shape_cast %155 : vector<1x4x512xf32> to vector<4x512xf32>
    %157 = arith.truncf %156 : vector<4x512xf32> to vector<4x512xbf16>
    %cst_149 = arith.constant dense<0.000000e+00> : vector<4x512xf32>
    %158 = tpu.matmul %154, %157, %cst_149 {dimension_numbers = #tpu.dot_dimension_numbers<[1], [0], [0], [1], [0, 0, 1, 1], [], []>} : vector<4x4xbf16>, vector<4x512xbf16>, vector<4x512xf32> -> vector<4x512xf32>
    %159 = arith.addf %152, %158 : vector<4x512xf32>
    %c2_150 = arith.constant 2 : index
    %c4_151 = arith.constant 4 : index
    %c0_152 = arith.constant 0 : index
    %c0_153 = arith.constant 0 : index
    %160 = vector.load %arg2[%c2_150, %c4_151, %c0_152, %c0_153] : memref<4x9x4x4xbf16, #tpu.memory_space<vmem>>, vector<1x1x4x4xbf16>
    %161 = vector.shape_cast %160 : vector<1x1x4x4xbf16> to vector<4x4xbf16>
    %cst_154 = arith.constant dense<0.000000e+00> : vector<4x512xf32>
    %162 = tpu.matmul %161, %31, %cst_154 {dimension_numbers = #tpu.dot_dimension_numbers<[1], [0], [0], [1], [0, 0, 1, 1], [], []>} : vector<4x4xbf16>, vector<4x512xbf16>, vector<4x512xf32> -> vector<4x512xf32>
    %163 = arith.addf %159, %162 : vector<4x512xf32>
    %c2_155 = arith.constant 2 : index
    %c5_156 = arith.constant 5 : index
    %c0_157 = arith.constant 0 : index
    %c0_158 = arith.constant 0 : index
    %164 = vector.load %arg2[%c2_155, %c5_156, %c0_157, %c0_158] : memref<4x9x4x4xbf16, #tpu.memory_space<vmem>>, vector<1x1x4x4xbf16>
    %165 = vector.shape_cast %164 : vector<1x1x4x4xbf16> to vector<4x4xbf16>
    %c0_159 = arith.constant 0 : index
    %c0_160 = arith.constant 0 : index
    %c268 = arith.constant 268 : index
    %166 = vector.load %arg1[%c0_159, %c0_160, %c268] : memref<1x4x1152xf32, #tpu.memory_space<vmem>>, vector<1x4x512xf32>
    %167 = vector.shape_cast %166 : vector<1x4x512xf32> to vector<4x512xf32>
    %168 = arith.truncf %167 : vector<4x512xf32> to vector<4x512xbf16>
    %cst_161 = arith.constant dense<0.000000e+00> : vector<4x512xf32>
    %169 = tpu.matmul %165, %168, %cst_161 {dimension_numbers = #tpu.dot_dimension_numbers<[1], [0], [0], [1], [0, 0, 1, 1], [], []>} : vector<4x4xbf16>, vector<4x512xbf16>, vector<4x512xf32> -> vector<4x512xf32>
    %170 = arith.addf %163, %169 : vector<4x512xf32>
    %c2_162 = arith.constant 2 : index
    %c6_163 = arith.constant 6 : index
    %c0_164 = arith.constant 0 : index
    %c0_165 = arith.constant 0 : index
    %171 = vector.load %arg2[%c2_162, %c6_163, %c0_164, %c0_165] : memref<4x9x4x4xbf16, #tpu.memory_space<vmem>>, vector<1x1x4x4xbf16>
    %172 = vector.shape_cast %171 : vector<1x1x4x4xbf16> to vector<4x4xbf16>
    %c0_166 = arith.constant 0 : index
    %c0_167 = arith.constant 0 : index
    %c388 = arith.constant 388 : index
    %173 = vector.load %arg1[%c0_166, %c0_167, %c388] : memref<1x4x1152xf32, #tpu.memory_space<vmem>>, vector<1x4x512xf32>
    %174 = vector.shape_cast %173 : vector<1x4x512xf32> to vector<4x512xf32>
    %175 = arith.truncf %174 : vector<4x512xf32> to vector<4x512xbf16>
    %cst_168 = arith.constant dense<0.000000e+00> : vector<4x512xf32>
    %176 = tpu.matmul %172, %175, %cst_168 {dimension_numbers = #tpu.dot_dimension_numbers<[1], [0], [0], [1], [0, 0, 1, 1], [], []>} : vector<4x4xbf16>, vector<4x512xbf16>, vector<4x512xf32> -> vector<4x512xf32>
    %177 = arith.addf %170, %176 : vector<4x512xf32>
    %c2_169 = arith.constant 2 : index
    %c7_170 = arith.constant 7 : index
    %c0_171 = arith.constant 0 : index
    %c0_172 = arith.constant 0 : index
    %178 = vector.load %arg2[%c2_169, %c7_170, %c0_171, %c0_172] : memref<4x9x4x4xbf16, #tpu.memory_space<vmem>>, vector<1x1x4x4xbf16>
    %179 = vector.shape_cast %178 : vector<1x1x4x4xbf16> to vector<4x4xbf16>
    %c0_173 = arith.constant 0 : index
    %c0_174 = arith.constant 0 : index
    %c392 = arith.constant 392 : index
    %180 = vector.load %arg1[%c0_173, %c0_174, %c392] : memref<1x4x1152xf32, #tpu.memory_space<vmem>>, vector<1x4x512xf32>
    %181 = vector.shape_cast %180 : vector<1x4x512xf32> to vector<4x512xf32>
    %182 = arith.truncf %181 : vector<4x512xf32> to vector<4x512xbf16>
    %cst_175 = arith.constant dense<0.000000e+00> : vector<4x512xf32>
    %183 = tpu.matmul %179, %182, %cst_175 {dimension_numbers = #tpu.dot_dimension_numbers<[1], [0], [0], [1], [0, 0, 1, 1], [], []>} : vector<4x4xbf16>, vector<4x512xbf16>, vector<4x512xf32> -> vector<4x512xf32>
    %184 = arith.addf %177, %183 : vector<4x512xf32>
    %c2_176 = arith.constant 2 : index
    %c8_177 = arith.constant 8 : index
    %c0_178 = arith.constant 0 : index
    %c0_179 = arith.constant 0 : index
    %185 = vector.load %arg2[%c2_176, %c8_177, %c0_178, %c0_179] : memref<4x9x4x4xbf16, #tpu.memory_space<vmem>>, vector<1x1x4x4xbf16>
    %186 = vector.shape_cast %185 : vector<1x1x4x4xbf16> to vector<4x4xbf16>
    %c0_180 = arith.constant 0 : index
    %c0_181 = arith.constant 0 : index
    %c396 = arith.constant 396 : index
    %187 = vector.load %arg1[%c0_180, %c0_181, %c396] : memref<1x4x1152xf32, #tpu.memory_space<vmem>>, vector<1x4x512xf32>
    %188 = vector.shape_cast %187 : vector<1x4x512xf32> to vector<4x512xf32>
    %189 = arith.truncf %188 : vector<4x512xf32> to vector<4x512xbf16>
    %cst_182 = arith.constant dense<0.000000e+00> : vector<4x512xf32>
    %190 = tpu.matmul %186, %189, %cst_182 {dimension_numbers = #tpu.dot_dimension_numbers<[1], [0], [0], [1], [0, 0, 1, 1], [], []>} : vector<4x4xbf16>, vector<4x512xbf16>, vector<4x512xf32> -> vector<4x512xf32>
    %191 = arith.addf %184, %190 : vector<4x512xf32>
    %c2_183 = arith.constant 2 : index
    %c0_184 = arith.constant 0 : index
    %c0_185 = arith.constant 0 : index
    %192 = vector.load %arg3[%c2_183, %c0_184, %c0_185] : memref<4x4x1xf32, #tpu.memory_space<vmem>>, vector<1x4x1xf32>
    %193 = vector.shape_cast %192 : vector<1x4x1xf32> to vector<4x1xf32>
    %194 = vector.broadcast %193 : vector<4x1xf32> to vector<4x512xf32>
    %195 = arith.addf %191, %194 : vector<4x512xf32>
    %cst_186 = arith.constant 0.000000e+00 : f32
    %196 = vector.broadcast %cst_186 : f32 to vector<4x512xf32>
    %197 = arith.maximumf %195, %196 : vector<4x512xf32>
    %c3_187 = arith.constant 3 : index
    %c0_188 = arith.constant 0 : index
    %c0_189 = arith.constant 0 : index
    %c0_190 = arith.constant 0 : index
    %198 = vector.load %arg2[%c3_187, %c0_188, %c0_189, %c0_190] : memref<4x9x4x4xbf16, #tpu.memory_space<vmem>>, vector<1x1x4x4xbf16>
    %199 = vector.shape_cast %198 : vector<1x1x4x4xbf16> to vector<4x4xbf16>
    %c0_191 = arith.constant 0 : index
    %c0_192 = arith.constant 0 : index
    %c0_193 = arith.constant 0 : index
    %200 = vector.load %arg1[%c0_191, %c0_192, %c0_193] : memref<1x4x1152xf32, #tpu.memory_space<vmem>>, vector<1x4x512xf32>
    %201 = vector.shape_cast %200 : vector<1x4x512xf32> to vector<4x512xf32>
    %202 = arith.truncf %201 : vector<4x512xf32> to vector<4x512xbf16>
    %cst_194 = arith.constant dense<0.000000e+00> : vector<4x512xf32>
    %203 = tpu.matmul %199, %202, %cst_194 {dimension_numbers = #tpu.dot_dimension_numbers<[1], [0], [0], [1], [0, 0, 1, 1], [], []>} : vector<4x4xbf16>, vector<4x512xbf16>, vector<4x512xf32> -> vector<4x512xf32>
    %c3_195 = arith.constant 3 : index
    %c1_196 = arith.constant 1 : index
    %c0_197 = arith.constant 0 : index
    %c0_198 = arith.constant 0 : index
    %204 = vector.load %arg2[%c3_195, %c1_196, %c0_197, %c0_198] : memref<4x9x4x4xbf16, #tpu.memory_space<vmem>>, vector<1x1x4x4xbf16>
    %205 = vector.shape_cast %204 : vector<1x1x4x4xbf16> to vector<4x4xbf16>
    %c0_199 = arith.constant 0 : index
    %c0_200 = arith.constant 0 : index
    %c8_201 = arith.constant 8 : index
    %206 = vector.load %arg1[%c0_199, %c0_200, %c8_201] : memref<1x4x1152xf32, #tpu.memory_space<vmem>>, vector<1x4x512xf32>
    %207 = vector.shape_cast %206 : vector<1x4x512xf32> to vector<4x512xf32>
    %208 = arith.truncf %207 : vector<4x512xf32> to vector<4x512xbf16>
    %cst_202 = arith.constant dense<0.000000e+00> : vector<4x512xf32>
    %209 = tpu.matmul %205, %208, %cst_202 {dimension_numbers = #tpu.dot_dimension_numbers<[1], [0], [0], [1], [0, 0, 1, 1], [], []>} : vector<4x4xbf16>, vector<4x512xbf16>, vector<4x512xf32> -> vector<4x512xf32>
    %210 = arith.addf %203, %209 : vector<4x512xf32>
    %c3_203 = arith.constant 3 : index
    %c2_204 = arith.constant 2 : index
    %c0_205 = arith.constant 0 : index
    %c0_206 = arith.constant 0 : index
    %211 = vector.load %arg2[%c3_203, %c2_204, %c0_205, %c0_206] : memref<4x9x4x4xbf16, #tpu.memory_space<vmem>>, vector<1x1x4x4xbf16>
    %212 = vector.shape_cast %211 : vector<1x1x4x4xbf16> to vector<4x4xbf16>
    %c0_207 = arith.constant 0 : index
    %c0_208 = arith.constant 0 : index
    %c16 = arith.constant 16 : index
    %213 = vector.load %arg1[%c0_207, %c0_208, %c16] : memref<1x4x1152xf32, #tpu.memory_space<vmem>>, vector<1x4x512xf32>
    %214 = vector.shape_cast %213 : vector<1x4x512xf32> to vector<4x512xf32>
    %215 = arith.truncf %214 : vector<4x512xf32> to vector<4x512xbf16>
    %cst_209 = arith.constant dense<0.000000e+00> : vector<4x512xf32>
    %216 = tpu.matmul %212, %215, %cst_209 {dimension_numbers = #tpu.dot_dimension_numbers<[1], [0], [0], [1], [0, 0, 1, 1], [], []>} : vector<4x4xbf16>, vector<4x512xbf16>, vector<4x512xf32> -> vector<4x512xf32>
    %217 = arith.addf %210, %216 : vector<4x512xf32>
    %c3_210 = arith.constant 3 : index
    %c3_211 = arith.constant 3 : index
    %c0_212 = arith.constant 0 : index
    %c0_213 = arith.constant 0 : index
    %218 = vector.load %arg2[%c3_210, %c3_211, %c0_212, %c0_213] : memref<4x9x4x4xbf16, #tpu.memory_space<vmem>>, vector<1x1x4x4xbf16>
    %219 = vector.shape_cast %218 : vector<1x1x4x4xbf16> to vector<4x4xbf16>
    %c0_214 = arith.constant 0 : index
    %c0_215 = arith.constant 0 : index
    %c256 = arith.constant 256 : index
    %220 = vector.load %arg1[%c0_214, %c0_215, %c256] : memref<1x4x1152xf32, #tpu.memory_space<vmem>>, vector<1x4x512xf32>
    %221 = vector.shape_cast %220 : vector<1x4x512xf32> to vector<4x512xf32>
    %222 = arith.truncf %221 : vector<4x512xf32> to vector<4x512xbf16>
    %cst_216 = arith.constant dense<0.000000e+00> : vector<4x512xf32>
    %223 = tpu.matmul %219, %222, %cst_216 {dimension_numbers = #tpu.dot_dimension_numbers<[1], [0], [0], [1], [0, 0, 1, 1], [], []>} : vector<4x4xbf16>, vector<4x512xbf16>, vector<4x512xf32> -> vector<4x512xf32>
    %224 = arith.addf %217, %223 : vector<4x512xf32>
    %c3_217 = arith.constant 3 : index
    %c4_218 = arith.constant 4 : index
    %c0_219 = arith.constant 0 : index
    %c0_220 = arith.constant 0 : index
    %225 = vector.load %arg2[%c3_217, %c4_218, %c0_219, %c0_220] : memref<4x9x4x4xbf16, #tpu.memory_space<vmem>>, vector<1x1x4x4xbf16>
    %226 = vector.shape_cast %225 : vector<1x1x4x4xbf16> to vector<4x4xbf16>
    %cst_221 = arith.constant dense<0.000000e+00> : vector<4x512xf32>
    %227 = tpu.matmul %226, %31, %cst_221 {dimension_numbers = #tpu.dot_dimension_numbers<[1], [0], [0], [1], [0, 0, 1, 1], [], []>} : vector<4x4xbf16>, vector<4x512xbf16>, vector<4x512xf32> -> vector<4x512xf32>
    %228 = arith.addf %224, %227 : vector<4x512xf32>
    %c3_222 = arith.constant 3 : index
    %c5_223 = arith.constant 5 : index
    %c0_224 = arith.constant 0 : index
    %c0_225 = arith.constant 0 : index
    %229 = vector.load %arg2[%c3_222, %c5_223, %c0_224, %c0_225] : memref<4x9x4x4xbf16, #tpu.memory_space<vmem>>, vector<1x1x4x4xbf16>
    %230 = vector.shape_cast %229 : vector<1x1x4x4xbf16> to vector<4x4xbf16>
    %c0_226 = arith.constant 0 : index
    %c0_227 = arith.constant 0 : index
    %c272 = arith.constant 272 : index
    %231 = vector.load %arg1[%c0_226, %c0_227, %c272] : memref<1x4x1152xf32, #tpu.memory_space<vmem>>, vector<1x4x512xf32>
    %232 = vector.shape_cast %231 : vector<1x4x512xf32> to vector<4x512xf32>
    %233 = arith.truncf %232 : vector<4x512xf32> to vector<4x512xbf16>
    %cst_228 = arith.constant dense<0.000000e+00> : vector<4x512xf32>
    %234 = tpu.matmul %230, %233, %cst_228 {dimension_numbers = #tpu.dot_dimension_numbers<[1], [0], [0], [1], [0, 0, 1, 1], [], []>} : vector<4x4xbf16>, vector<4x512xbf16>, vector<4x512xf32> -> vector<4x512xf32>
    %235 = arith.addf %228, %234 : vector<4x512xf32>
    %c3_229 = arith.constant 3 : index
    %c6_230 = arith.constant 6 : index
    %c0_231 = arith.constant 0 : index
    %c0_232 = arith.constant 0 : index
    %236 = vector.load %arg2[%c3_229, %c6_230, %c0_231, %c0_232] : memref<4x9x4x4xbf16, #tpu.memory_space<vmem>>, vector<1x1x4x4xbf16>
    %237 = vector.shape_cast %236 : vector<1x1x4x4xbf16> to vector<4x4xbf16>
    %c0_233 = arith.constant 0 : index
    %c0_234 = arith.constant 0 : index
    %c512 = arith.constant 512 : index
    %238 = vector.load %arg1[%c0_233, %c0_234, %c512] : memref<1x4x1152xf32, #tpu.memory_space<vmem>>, vector<1x4x512xf32>
    %239 = vector.shape_cast %238 : vector<1x4x512xf32> to vector<4x512xf32>
    %240 = arith.truncf %239 : vector<4x512xf32> to vector<4x512xbf16>
    %cst_235 = arith.constant dense<0.000000e+00> : vector<4x512xf32>
    %241 = tpu.matmul %237, %240, %cst_235 {dimension_numbers = #tpu.dot_dimension_numbers<[1], [0], [0], [1], [0, 0, 1, 1], [], []>} : vector<4x4xbf16>, vector<4x512xbf16>, vector<4x512xf32> -> vector<4x512xf32>
    %242 = arith.addf %235, %241 : vector<4x512xf32>
    %c3_236 = arith.constant 3 : index
    %c7_237 = arith.constant 7 : index
    %c0_238 = arith.constant 0 : index
    %c0_239 = arith.constant 0 : index
    %243 = vector.load %arg2[%c3_236, %c7_237, %c0_238, %c0_239] : memref<4x9x4x4xbf16, #tpu.memory_space<vmem>>, vector<1x1x4x4xbf16>
    %244 = vector.shape_cast %243 : vector<1x1x4x4xbf16> to vector<4x4xbf16>
    %c0_240 = arith.constant 0 : index
    %c0_241 = arith.constant 0 : index
    %c520 = arith.constant 520 : index
    %245 = vector.load %arg1[%c0_240, %c0_241, %c520] : memref<1x4x1152xf32, #tpu.memory_space<vmem>>, vector<1x4x512xf32>
    %246 = vector.shape_cast %245 : vector<1x4x512xf32> to vector<4x512xf32>
    %247 = arith.truncf %246 : vector<4x512xf32> to vector<4x512xbf16>
    %cst_242 = arith.constant dense<0.000000e+00> : vector<4x512xf32>
    %248 = tpu.matmul %244, %247, %cst_242 {dimension_numbers = #tpu.dot_dimension_numbers<[1], [0], [0], [1], [0, 0, 1, 1], [], []>} : vector<4x4xbf16>, vector<4x512xbf16>, vector<4x512xf32> -> vector<4x512xf32>
    %249 = arith.addf %242, %248 : vector<4x512xf32>
    %c3_243 = arith.constant 3 : index
    %c8_244 = arith.constant 8 : index
    %c0_245 = arith.constant 0 : index
    %c0_246 = arith.constant 0 : index
    %250 = vector.load %arg2[%c3_243, %c8_244, %c0_245, %c0_246] : memref<4x9x4x4xbf16, #tpu.memory_space<vmem>>, vector<1x1x4x4xbf16>
    %251 = vector.shape_cast %250 : vector<1x1x4x4xbf16> to vector<4x4xbf16>
    %c0_247 = arith.constant 0 : index
    %c0_248 = arith.constant 0 : index
    %c528 = arith.constant 528 : index
    %252 = vector.load %arg1[%c0_247, %c0_248, %c528] : memref<1x4x1152xf32, #tpu.memory_space<vmem>>, vector<1x4x512xf32>
    %253 = vector.shape_cast %252 : vector<1x4x512xf32> to vector<4x512xf32>
    %254 = arith.truncf %253 : vector<4x512xf32> to vector<4x512xbf16>
    %cst_249 = arith.constant dense<0.000000e+00> : vector<4x512xf32>
    %255 = tpu.matmul %251, %254, %cst_249 {dimension_numbers = #tpu.dot_dimension_numbers<[1], [0], [0], [1], [0, 0, 1, 1], [], []>} : vector<4x4xbf16>, vector<4x512xbf16>, vector<4x512xf32> -> vector<4x512xf32>
    %256 = arith.addf %249, %255 : vector<4x512xf32>
    %c3_250 = arith.constant 3 : index
    %c0_251 = arith.constant 0 : index
    %c0_252 = arith.constant 0 : index
    %257 = vector.load %arg3[%c3_250, %c0_251, %c0_252] : memref<4x4x1xf32, #tpu.memory_space<vmem>>, vector<1x4x1xf32>
    %258 = vector.shape_cast %257 : vector<1x4x1xf32> to vector<4x1xf32>
    %259 = vector.broadcast %258 : vector<4x1xf32> to vector<4x512xf32>
    %260 = arith.addf %256, %259 : vector<4x512xf32>
    %cst_253 = arith.constant 0.000000e+00 : f32
    %261 = vector.broadcast %cst_253 : f32 to vector<4x512xf32>
    %262 = arith.maximumf %260, %261 : vector<4x512xf32>
    %c0_254 = arith.constant 0 : index
    %c0_255 = arith.constant 0 : index
    %c0_256 = arith.constant 0 : index
    %263 = vector.load %arg4[%c0_254, %c0_255, %c0_256] : memref<9x4x4xbf16, #tpu.memory_space<vmem>>, vector<1x4x4xbf16>
    %264 = vector.shape_cast %263 : vector<1x4x4xbf16> to vector<4x4xbf16>
    %cst_257 = arith.constant dense<0.000000e+00> : vector<4x512xf32>
    %265 = tpu.matmul %264, %4, %cst_257 {dimension_numbers = #tpu.dot_dimension_numbers<[1], [0], [0], [1], [0, 0, 1, 1], [], []>} : vector<4x4xbf16>, vector<4x512xbf16>, vector<4x512xf32> -> vector<4x512xf32>
    %c1_258 = arith.constant 1 : index
    %c0_259 = arith.constant 0 : index
    %c0_260 = arith.constant 0 : index
    %266 = vector.load %arg4[%c1_258, %c0_259, %c0_260] : memref<9x4x4xbf16, #tpu.memory_space<vmem>>, vector<1x4x4xbf16>
    %267 = vector.shape_cast %266 : vector<1x4x4xbf16> to vector<4x4xbf16>
    %cst_261 = arith.constant dense<0.000000e+00> : vector<4x512xf32>
    %268 = tpu.matmul %267, %10, %cst_261 {dimension_numbers = #tpu.dot_dimension_numbers<[1], [0], [0], [1], [0, 0, 1, 1], [], []>} : vector<4x4xbf16>, vector<4x512xbf16>, vector<4x512xf32> -> vector<4x512xf32>
    %269 = arith.addf %265, %268 : vector<4x512xf32>
    %c2_262 = arith.constant 2 : index
    %c0_263 = arith.constant 0 : index
    %c0_264 = arith.constant 0 : index
    %270 = vector.load %arg4[%c2_262, %c0_263, %c0_264] : memref<9x4x4xbf16, #tpu.memory_space<vmem>>, vector<1x4x4xbf16>
    %271 = vector.shape_cast %270 : vector<1x4x4xbf16> to vector<4x4xbf16>
    %cst_265 = arith.constant dense<0.000000e+00> : vector<4x512xf32>
    %272 = tpu.matmul %271, %17, %cst_265 {dimension_numbers = #tpu.dot_dimension_numbers<[1], [0], [0], [1], [0, 0, 1, 1], [], []>} : vector<4x4xbf16>, vector<4x512xbf16>, vector<4x512xf32> -> vector<4x512xf32>
    %273 = arith.addf %269, %272 : vector<4x512xf32>
    %c3_266 = arith.constant 3 : index
    %c0_267 = arith.constant 0 : index
    %c0_268 = arith.constant 0 : index
    %274 = vector.load %arg4[%c3_266, %c0_267, %c0_268] : memref<9x4x4xbf16, #tpu.memory_space<vmem>>, vector<1x4x4xbf16>
    %275 = vector.shape_cast %274 : vector<1x4x4xbf16> to vector<4x4xbf16>
    %cst_269 = arith.constant dense<0.000000e+00> : vector<4x512xf32>
    %276 = tpu.matmul %275, %24, %cst_269 {dimension_numbers = #tpu.dot_dimension_numbers<[1], [0], [0], [1], [0, 0, 1, 1], [], []>} : vector<4x4xbf16>, vector<4x512xbf16>, vector<4x512xf32> -> vector<4x512xf32>
    %277 = arith.addf %273, %276 : vector<4x512xf32>
    %c4_270 = arith.constant 4 : index
    %c0_271 = arith.constant 0 : index
    %c0_272 = arith.constant 0 : index
    %278 = vector.load %arg4[%c4_270, %c0_271, %c0_272] : memref<9x4x4xbf16, #tpu.memory_space<vmem>>, vector<1x4x4xbf16>
    %279 = vector.shape_cast %278 : vector<1x4x4xbf16> to vector<4x4xbf16>
    %cst_273 = arith.constant dense<0.000000e+00> : vector<4x512xf32>
    %280 = tpu.matmul %279, %31, %cst_273 {dimension_numbers = #tpu.dot_dimension_numbers<[1], [0], [0], [1], [0, 0, 1, 1], [], []>} : vector<4x4xbf16>, vector<4x512xbf16>, vector<4x512xf32> -> vector<4x512xf32>
    %281 = arith.addf %277, %280 : vector<4x512xf32>
    %c5_274 = arith.constant 5 : index
    %c0_275 = arith.constant 0 : index
    %c0_276 = arith.constant 0 : index
    %282 = vector.load %arg4[%c5_274, %c0_275, %c0_276] : memref<9x4x4xbf16, #tpu.memory_space<vmem>>, vector<1x4x4xbf16>
    %283 = vector.shape_cast %282 : vector<1x4x4xbf16> to vector<4x4xbf16>
    %cst_277 = arith.constant dense<0.000000e+00> : vector<4x512xf32>
    %284 = tpu.matmul %283, %38, %cst_277 {dimension_numbers = #tpu.dot_dimension_numbers<[1], [0], [0], [1], [0, 0, 1, 1], [], []>} : vector<4x4xbf16>, vector<4x512xbf16>, vector<4x512xf32> -> vector<4x512xf32>
    %285 = arith.addf %281, %284 : vector<4x512xf32>
    %c6_278 = arith.constant 6 : index
    %c0_279 = arith.constant 0 : index
    %c0_280 = arith.constant 0 : index
    %286 = vector.load %arg4[%c6_278, %c0_279, %c0_280] : memref<9x4x4xbf16, #tpu.memory_space<vmem>>, vector<1x4x4xbf16>
    %287 = vector.shape_cast %286 : vector<1x4x4xbf16> to vector<4x4xbf16>
    %cst_281 = arith.constant dense<0.000000e+00> : vector<4x512xf32>
    %288 = tpu.matmul %287, %45, %cst_281 {dimension_numbers = #tpu.dot_dimension_numbers<[1], [0], [0], [1], [0, 0, 1, 1], [], []>} : vector<4x4xbf16>, vector<4x512xbf16>, vector<4x512xf32> -> vector<4x512xf32>
    %289 = arith.addf %285, %288 : vector<4x512xf32>
    %c7_282 = arith.constant 7 : index
    %c0_283 = arith.constant 0 : index
    %c0_284 = arith.constant 0 : index
    %290 = vector.load %arg4[%c7_282, %c0_283, %c0_284] : memref<9x4x4xbf16, #tpu.memory_space<vmem>>, vector<1x4x4xbf16>
    %291 = vector.shape_cast %290 : vector<1x4x4xbf16> to vector<4x4xbf16>
    %cst_285 = arith.constant dense<0.000000e+00> : vector<4x512xf32>
    %292 = tpu.matmul %291, %52, %cst_285 {dimension_numbers = #tpu.dot_dimension_numbers<[1], [0], [0], [1], [0, 0, 1, 1], [], []>} : vector<4x4xbf16>, vector<4x512xbf16>, vector<4x512xf32> -> vector<4x512xf32>
    %293 = arith.addf %289, %292 : vector<4x512xf32>
    %c8_286 = arith.constant 8 : index
    %c0_287 = arith.constant 0 : index
    %c0_288 = arith.constant 0 : index
    %294 = vector.load %arg4[%c8_286, %c0_287, %c0_288] : memref<9x4x4xbf16, #tpu.memory_space<vmem>>, vector<1x4x4xbf16>
    %295 = vector.shape_cast %294 : vector<1x4x4xbf16> to vector<4x4xbf16>
    %cst_289 = arith.constant dense<0.000000e+00> : vector<4x512xf32>
    %296 = tpu.matmul %295, %59, %cst_289 {dimension_numbers = #tpu.dot_dimension_numbers<[1], [0], [0], [1], [0, 0, 1, 1], [], []>} : vector<4x4xbf16>, vector<4x512xbf16>, vector<4x512xf32> -> vector<4x512xf32>
    %297 = arith.addf %293, %296 : vector<4x512xf32>
    %c0_290 = arith.constant 0 : index
    %c0_291 = arith.constant 0 : index
    %298 = vector.load %arg5[%c0_290, %c0_291] : memref<4x1xf32, #tpu.memory_space<vmem>>, vector<4x1xf32>
    %299 = vector.broadcast %298 : vector<4x1xf32> to vector<4x512xf32>
    %300 = arith.addf %297, %299 : vector<4x512xf32>
    %cst_292 = arith.constant 0.000000e+00 : f32
    %301 = vector.broadcast %cst_292 : f32 to vector<4x512xf32>
    %302 = arith.maximumf %300, %301 : vector<4x512xf32>
    %303 = arith.truncf %302 : vector<4x512xf32> to vector<4x512xbf16>
    %c0_293 = arith.constant 0 : index
    %c0_294 = arith.constant 0 : index
    %c0_295 = arith.constant 0 : index
    %304 = vector.load %arg6[%c0_293, %c0_294, %c0_295] : memref<4x1x4xbf16, #tpu.memory_space<vmem>>, vector<1x1x4xbf16>
    %305 = vector.shape_cast %304 : vector<1x1x4xbf16> to vector<1x4xbf16>
    %cst_296 = arith.constant dense<0.000000e+00> : vector<1x512xf32>
    %306 = tpu.matmul %305, %303, %cst_296 {dimension_numbers = #tpu.dot_dimension_numbers<[1], [0], [0], [1], [0, 0, 1, 1], [], []>} : vector<1x4xbf16>, vector<4x512xbf16>, vector<1x512xf32> -> vector<1x512xf32>
    %c0_297 = arith.constant 0 : index
    %c0_298 = arith.constant 0 : index
    %c0_299 = arith.constant 0 : index
    %307 = vector.load %arg7[%c0_297, %c0_298, %c0_299] : memref<4x1x1xf32, #tpu.memory_space<vmem>>, vector<1x1x1xf32>
    %308 = vector.shape_cast %307 : vector<1x1x1xf32> to vector<1x1xf32>
    %309 = vector.broadcast %308 : vector<1x1xf32> to vector<1x512xf32>
    %310 = arith.addf %306, %309 : vector<1x512xf32>
    %cst_300 = arith.constant 0.000000e+00 : f32
    %311 = vector.broadcast %cst_300 : f32 to vector<1x512xf32>
    %312 = arith.maximumf %310, %311 : vector<1x512xf32>
    %c1_301 = arith.constant 1 : index
    %c0_302 = arith.constant 0 : index
    %c0_303 = arith.constant 0 : index
    %313 = vector.load %arg6[%c1_301, %c0_302, %c0_303] : memref<4x1x4xbf16, #tpu.memory_space<vmem>>, vector<1x1x4xbf16>
    %314 = vector.shape_cast %313 : vector<1x1x4xbf16> to vector<1x4xbf16>
    %cst_304 = arith.constant dense<0.000000e+00> : vector<1x512xf32>
    %315 = tpu.matmul %314, %303, %cst_304 {dimension_numbers = #tpu.dot_dimension_numbers<[1], [0], [0], [1], [0, 0, 1, 1], [], []>} : vector<1x4xbf16>, vector<4x512xbf16>, vector<1x512xf32> -> vector<1x512xf32>
    %c1_305 = arith.constant 1 : index
    %c0_306 = arith.constant 0 : index
    %c0_307 = arith.constant 0 : index
    %316 = vector.load %arg7[%c1_305, %c0_306, %c0_307] : memref<4x1x1xf32, #tpu.memory_space<vmem>>, vector<1x1x1xf32>
    %317 = vector.shape_cast %316 : vector<1x1x1xf32> to vector<1x1xf32>
    %318 = vector.broadcast %317 : vector<1x1xf32> to vector<1x512xf32>
    %319 = arith.addf %315, %318 : vector<1x512xf32>
    %cst_308 = arith.constant 0.000000e+00 : f32
    %320 = vector.broadcast %cst_308 : f32 to vector<1x512xf32>
    %321 = arith.maximumf %319, %320 : vector<1x512xf32>
    %c2_309 = arith.constant 2 : index
    %c0_310 = arith.constant 0 : index
    %c0_311 = arith.constant 0 : index
    %322 = vector.load %arg6[%c2_309, %c0_310, %c0_311] : memref<4x1x4xbf16, #tpu.memory_space<vmem>>, vector<1x1x4xbf16>
    %323 = vector.shape_cast %322 : vector<1x1x4xbf16> to vector<1x4xbf16>
    %cst_312 = arith.constant dense<0.000000e+00> : vector<1x512xf32>
    %324 = tpu.matmul %323, %303, %cst_312 {dimension_numbers = #tpu.dot_dimension_numbers<[1], [0], [0], [1], [0, 0, 1, 1], [], []>} : vector<1x4xbf16>, vector<4x512xbf16>, vector<1x512xf32> -> vector<1x512xf32>
    %c2_313 = arith.constant 2 : index
    %c0_314 = arith.constant 0 : index
    %c0_315 = arith.constant 0 : index
    %325 = vector.load %arg7[%c2_313, %c0_314, %c0_315] : memref<4x1x1xf32, #tpu.memory_space<vmem>>, vector<1x1x1xf32>
    %326 = vector.shape_cast %325 : vector<1x1x1xf32> to vector<1x1xf32>
    %327 = vector.broadcast %326 : vector<1x1xf32> to vector<1x512xf32>
    %328 = arith.addf %324, %327 : vector<1x512xf32>
    %cst_316 = arith.constant 0.000000e+00 : f32
    %329 = vector.broadcast %cst_316 : f32 to vector<1x512xf32>
    %330 = arith.maximumf %328, %329 : vector<1x512xf32>
    %c3_317 = arith.constant 3 : index
    %c0_318 = arith.constant 0 : index
    %c0_319 = arith.constant 0 : index
    %331 = vector.load %arg6[%c3_317, %c0_318, %c0_319] : memref<4x1x4xbf16, #tpu.memory_space<vmem>>, vector<1x1x4xbf16>
    %332 = vector.shape_cast %331 : vector<1x1x4xbf16> to vector<1x4xbf16>
    %cst_320 = arith.constant dense<0.000000e+00> : vector<1x512xf32>
    %333 = tpu.matmul %332, %303, %cst_320 {dimension_numbers = #tpu.dot_dimension_numbers<[1], [0], [0], [1], [0, 0, 1, 1], [], []>} : vector<1x4xbf16>, vector<4x512xbf16>, vector<1x512xf32> -> vector<1x512xf32>
    %c3_321 = arith.constant 3 : index
    %c0_322 = arith.constant 0 : index
    %c0_323 = arith.constant 0 : index
    %334 = vector.load %arg7[%c3_321, %c0_322, %c0_323] : memref<4x1x1xf32, #tpu.memory_space<vmem>>, vector<1x1x1xf32>
    %335 = vector.shape_cast %334 : vector<1x1x1xf32> to vector<1x1xf32>
    %336 = vector.broadcast %335 : vector<1x1xf32> to vector<1x512xf32>
    %337 = arith.addf %333, %336 : vector<1x512xf32>
    %cst_324 = arith.constant 0.000000e+00 : f32
    %338 = vector.broadcast %cst_324 : f32 to vector<1x512xf32>
    %339 = arith.maximumf %337, %338 : vector<1x512xf32>
    %340 = arith.maximumf %312, %321 : vector<1x512xf32>
    %341 = arith.maximumf %330, %339 : vector<1x512xf32>
    %342 = arith.maximumf %340, %341 : vector<1x512xf32>
    %343 = arith.subf %312, %342 : vector<1x512xf32>
    %344 = math.exp %343 : vector<1x512xf32>
    %345 = arith.subf %321, %342 : vector<1x512xf32>
    %346 = math.exp %345 : vector<1x512xf32>
    %347 = arith.subf %330, %342 : vector<1x512xf32>
    %348 = math.exp %347 : vector<1x512xf32>
    %349 = arith.subf %339, %342 : vector<1x512xf32>
    %350 = math.exp %349 : vector<1x512xf32>
    %351 = arith.addf %344, %346 : vector<1x512xf32>
    %352 = arith.addf %351, %348 : vector<1x512xf32>
    %353 = arith.addf %352, %350 : vector<1x512xf32>
    %354 = tpu.reciprocal %353 {approx = true} : vector<1x512xf32> -> vector<1x512xf32>
    %355 = arith.mulf %344, %354 : vector<1x512xf32>
    %356 = vector.broadcast %355 : vector<1x512xf32> to vector<4x512xf32>
    %357 = arith.mulf %356, %67 : vector<4x512xf32>
    %358 = arith.mulf %346, %354 : vector<1x512xf32>
    %359 = vector.broadcast %358 : vector<1x512xf32> to vector<4x512xf32>
    %360 = arith.mulf %359, %132 : vector<4x512xf32>
    %361 = arith.addf %357, %360 : vector<4x512xf32>
    %362 = arith.mulf %348, %354 : vector<1x512xf32>
    %363 = vector.broadcast %362 : vector<1x512xf32> to vector<4x512xf32>
    %364 = arith.mulf %363, %197 : vector<4x512xf32>
    %365 = arith.addf %361, %364 : vector<4x512xf32>
    %366 = arith.mulf %350, %354 : vector<1x512xf32>
    %367 = vector.broadcast %366 : vector<1x512xf32> to vector<4x512xf32>
    %368 = arith.mulf %367, %262 : vector<4x512xf32>
    %369 = arith.addf %365, %368 : vector<4x512xf32>
    %c0_325 = arith.constant 0 : index
    %c0_326 = arith.constant 0 : index
    %c0_327 = arith.constant 0 : index
    %370 = vector.load %arg8[%c0_325, %c0_326, %c0_327] : memref<1x4x512xf32, #tpu.memory_space<vmem>>, vector<1x4x512xf32>
    %371 = vector.shape_cast %370 : vector<1x4x512xf32> to vector<4x512xf32>
    %372 = vector.shape_cast %369 : vector<4x512xf32> to vector<1x4x512xf32>
    tpu.vector_store %arg8[%c0_325, %c0_326, %c0_327], %372 {strides = array<i32>} : memref<1x4x512xf32, #tpu.memory_space<vmem>>, vector<1x4x512xf32>,
    return
  }
  func.func @transform_0(%arg0: i32) -> (i32, i32, i32) {
    %c0_i32 = arith.constant 0 : i32
    %c0_i32_0 = arith.constant 0 : i32
    %c0_i32_1 = arith.constant 0 : i32
    return %arg0, %c0_i32, %c0_i32_0 : i32, i32, i32
  }
  func.func @transform_1(%arg0: i32) -> (i32, i32, i32, i32) {
    %c0_i32 = arith.constant 0 : i32
    %c0_i32_0 = arith.constant 0 : i32
    %c0_i32_1 = arith.constant 0 : i32
    %c0_i32_2 = arith.constant 0 : i32
    %c0_i32_3 = arith.constant 0 : i32
    return %c0_i32, %c0_i32_0, %c0_i32_1, %c0_i32_2 : i32, i32, i32, i32
  }
  func.func @transform_2(%arg0: i32) -> (i32, i32, i32) {
    %c0_i32 = arith.constant 0 : i32
    %c0_i32_0 = arith.constant 0 : i32
    %c0_i32_1 = arith.constant 0 : i32
    %c0_i32_2 = arith.constant 0 : i32
    return %c0_i32, %c0_i32_0, %c0_i32_1 : i32, i32, i32
  }
  func.func @transform_3(%arg0: i32) -> (i32, i32, i32) {
    %c0_i32 = arith.constant 0 : i32
    %c0_i32_0 = arith.constant 0 : i32
    %c0_i32_1 = arith.constant 0 : i32
    %c0_i32_2 = arith.constant 0 : i32
    return %c0_i32, %c0_i32_0, %c0_i32_1 : i32, i32, i32
  }
  func.func @transform_4(%arg0: i32) -> (i32, i32) {
    %c0_i32 = arith.constant 0 : i32
    %c0_i32_0 = arith.constant 0 : i32
    %c0_i32_1 = arith.constant 0 : i32
    return %c0_i32, %c0_i32_0 : i32, i32
  }
  func.func @transform_5(%arg0: i32) -> (i32, i32, i32) {
    %c0_i32 = arith.constant 0 : i32
    %c0_i32_0 = arith.constant 0 : i32
    %c0_i32_1 = arith.constant 0 : i32
    %c0_i32_2 = arith.constant 0 : i32
    return %c0_i32, %c0_i32_0, %c0_i32_1 : i32, i32, i32
  }
  func.func @transform_6(%arg0: i32) -> (i32, i32, i32) {
    %c0_i32 = arith.constant 0 : i32
    %c0_i32_0 = arith.constant 0 : i32
    %c0_i32_1 = arith.constant 0 : i32
    %c0_i32_2 = arith.constant 0 : i32
    return %c0_i32, %c0_i32_0, %c0_i32_1 : i32, i32, i32
  }
  func.func @transform_7(%arg0: i32) -> (i32, i32, i32) {
    %c0_i32 = arith.constant 0 : i32
    %c0_i32_0 = arith.constant 0 : i32
    %c0_i32_1 = arith.constant 0 : i32
    return %arg0, %c0_i32, %c0_i32_0 : i32, i32, i32
  }
}

</mosaic_0001>

<bundles_post_ra>
// kernel: _lambda_.2
= control target key start
LH: loop header
LB: loop body
LE: loop exit
PB: predicated region body
PF: predicated region fallthrough
CT: control target
= control target key end

     0   :  { %s2420_s0 = inlined_call_operand.hbm [shape: f32[2,64,36], index: 0, kind: input, shape index: {}, may-alias: {0,1}]   ;;  %s2421_s1 = inlined_call_operand.hbm [shape: f32[2,64,36], index: 1, kind: input, shape index: {}, may-alias: {0,1}]   ;;  %s2422_s2 = inlined_call_operand.hbm [shape: bf16[2,64,64], index: 2, kind: input, shape index: {}]   ;;  %s2423_s3 = inlined_call_operand.hbm [shape: f32[2,64,64], index: 3, kind: output, shape index: {}]  }
   0x1   :  { %2437 = sst [smem:[#allocation19_spill]] %s2420_s0 }
   0x2   :  { %2438 = sst [smem:[#allocation20_spill]] %s2421_s1 }
   0x3   :  { %8 = vsyncpa [#allocation5], 0 }
   0x4   :  { %10 = vsyncpa [#allocation5 + $0x1], 0 }
   0x5   :  { %11 = vsyncpa [#allocation8], 0 }
   0x6   :  { %13 = vsyncpa [#allocation8 + $0x1], 0 }
   0x7   :  { %14 = vsyncpa [#allocation6], 0 }
   0x8   :  { %16 = vsyncpa [#allocation6 + $0x1], 0  ;;  %s1757_s12 = smov 0   ;;  %s1759_s13 = smov 0  }
   0x9   :  { %s1761_s14 = smov 0   ;;  %s1763_s15 = smov 0  }
   0xa   :  { %s1765_s16 = smov 0   ;;  %s1767_s17 = smov 0  }
   0xb   :  { %s1769_s18 = smov 0   ;;  %s1771_s19 = smov 0  }
   0xc   :  { %s1773_s20 = smov 0   ;;  %s1775_s21 = smov 0  }
   0xd   :  { %s1777_s22 = smov 0  }
   0xe LB: > { %2439 = sst [smem:[#allocation15_spill]] %s1692_s15  ;;  %s1813_s23 = sadd.s32 4294967295, %s1720_s22   ;;  %s1720_s22 = sphi %s1777_s22, %s22_s22   ;;  %s1716_s21 = sphi %s1775_s21, %s2480_s21   ;;  %s1712_s20 = sphi %s1773_s20, %s2479_s20   ;;  %s1708_s19 = sphi %s1771_s19, %s2478_s19   ;;  %s1704_s18 = sphi %s1769_s18, %s2477_s18   ;;  %s1700_s17 = sphi %s1767_s17, %s2476_s17   ;;  %s1696_s16 = sphi %s1765_s16, %s2475_s16   ;;  %s1692_s15 = sphi %s1763_s15, %s2474_s15   ;;  %s1688_s14 = sphi %s1761_s14, %s2473_s14   ;;  %s1684_s13 = sphi %s1759_s13, %s2472_s13   ;;  %s1680_s12 = sphi %s1757_s12, %s2471_s12  }
   0xf   : > { %s1171_s24 = sadd.s32 4294967294, %s1720_s22   ;;  %p57_p0 = scmp.ne.s32.totalorder %s1700_s17, %s1696_s16 }
  0x10   : > { %p2429_p1 = scmp.eq.s32.totalorder %s1720_s22, 0  ;;  %p63_p2 = scmp.ne.s32.totalorder %s1696_s16, %s1692_s15 }
  0x11   : > { %p2428_p3 = scmp.eq.s32.totalorder %s1813_s23, 0  ;;  %p149_p5 = scmp.eq.s32.totalorder %s1813_s23, 3 }
  0x12   : > { %p59_p4 = por %p2429_p1, %p57_p0  ;;  %p155_p7 = scmp.eq.s32.totalorder %s1171_s24, 3 }
  0x13   : > { %p1829_p6 = por %p2428_p3, %p63_p2  ;;  %p1833_p8 = por %p149_p5, %p57_p0 }
  0x14   : > { %p1837_p9 = por %p155_p7, %p63_p2  ;;  %p2427_p10 = scmp.lt.s32.totalorder %s1720_s22, 4 }
  0x15   : > { %s2440_s27 = scalar_select %p1829_p6, 1, 0 }
  0x16   : > { %s2441_s28 = scalar_select %p1833_p8, 1, 0 }
  0x17   : > { %s2442_s29 = scalar_select %p1837_p9, 1, 0 }
  0x18   : > { %s2424_s30 = sand.u32 1, %s1700_s17   ;;  %s2425_s4 = sshll.u32 %s1716_s21, 10 }
  0x19   : > { %2443 = sst [smem:[#allocation16_spill]] %s2442_s29  ;;  %s1846_s5 = sshll.u32 %s2424_s30, 6 }
  0x1a   : > { %p1850_p11 = pnand %p2427_p10, %p59_p4  ;;  %s198_s7 = sand.u32 1, %s1720_s22  }
  0x1b   : > { %s2445_s1 = sld [smem:[#allocation20_spill]]  ;;  %s202_s11 = scalar_lea.vmem [#allocation7], %s1846_s5 }
  0x1c   : > { %s209_s24 = sshll.u32 %s202_s11, 4  ;;  %s1866_s26 = scalar_lea.sflag [#allocation8], %s198_s7  ;;  %s1863_s24 = int_to_ptr.vmem [resolvable:$true] %s209_s24 }
  0x1d   : > { %p1501_p0 = pneg %p1850_p11 }
  0x21   : > { %s1860_s10 = scalar_lea.hbm %s2445_s1, %s2425_s4  ;;  %s1504_s30 = scalar_lea.hbm %s2445_s1, 2048 }
  0x22   : > { %s1499_s25 = scalar_lea.hbm %s1860_s10, 1024  ;;  %p1505_p5 = scmp.lt.u32.totalorder %s1860_s10, %s2445_s1 }
  0x23   : > { %p1500_p13 = scmp.ne.s32.totalorder %s1860_s10, %s1499_s25  ;;  %p1506_p7 = scmp.lt.u32.totalorder %s1504_s30, %s1499_s25 }
  0x24   : > { %p1508_p3 = scmp.lt.u32.totalorder %s1499_s25, %s1860_s10 }
  0x25   : > { %p1502_p2 = pnand %p1501_p0, %p1500_p13  ;;  %p1507_p10 = por %p1506_p7, %p1505_p5 }
  0x27   : > { %p1503_p4 = pneg %p1502_p2  ;;  %p1509_p1 = por %p1508_p3, %p1507_p10 }
  0x29   : > { %p1510_p12 = pnand %p1509_p1, %p1503_p4 }
  0x2b   : > { %1513 = shalt.err (!%p1510_p12)
}
  0x2c   : > { %s1514_s7 = scalar_lea.vmem %s1863_s24, 1024  ;;  %s1722_s11 = smov [#allocation7]  }
  0x2d   : > { %p1515_p13 = scmp.ne.s32.totalorder %s1863_s24, %s1514_s7  ;;  %s1519_s8 = sshll.u32 %s1722_s11, 4  ;;  %s1520_s8 = int_to_ptr.vmem [resolvable:$false] %s1519_s8 }
  0x2e   : > { %s1521_s29 = scalar_lea.vmem %s1520_s8, 2048  ;;  %p1522_p8 = scmp.lt.s32.totalorder %s1863_s24, %s1520_s8 }
  0x2f   : > { %p1517_p2 = pnand %p1515_p13, %p1501_p0  ;;  %p1523_p5 = scmp.lt.s32.totalorder %s1521_s29, %s1514_s7 }
  0x31   : > { %p1518_p9 = pneg %p1517_p2  ;;  %p1524_p7 = por %p1523_p5, %p1522_p8 }
  0x33   : > { %p1525_p3 = pnand %p1524_p7, %p1518_p9 }
  0x35   : > { %1528 = shalt.err (!%p1525_p3)
}
  0x36   : > { %s2431_s25 = smov 128   ;;  %s2432_s30 = smov 8  }
  0x37   : > { %1302 = dma.hbm_to_vmem [thread:$0]  (!%p1850_p11), %s1860_s10, 1024, %s1863_s24, %s1866_s26, %s2431_s25, %s2431_s25, %s2432_s30  }
  0x38   : > { %p243_p1 = scmp.lt.s32.totalorder %s1720_s22, 5  ;;  %p2446_p8 = scmp.ge.s32.totalorder %s1720_s22, 1 }
  0x39   : > { %s2448_s9 = sshll.u32 %s1716_s21, 10  ;;  %s2449_s0 = sld [smem:[#allocation19_spill]] }
  0x3a   : > { %p1900_p9 = pnand %p2446_p8, %p243_p1  ;;  %s179_s29 = scalar_lea.vmem [#allocation4], %s1846_s5 }
  0x3b   : > { %s188_s1 = sshll.u32 %s179_s29, 4  ;;  %s2450_s10 = sand.u32 1, %s1700_s17   ;;  %s1912_s1 = int_to_ptr.vmem [resolvable:$true] %s188_s1 }
  0x3c   : > { %s1916_s24 = scalar_lea.sflag [#allocation5], %s2450_s10 }
  0x3f   : > { %s1909_s8 = scalar_lea.hbm %s2449_s0, %s2448_s9  ;;  %s1534_s11 = scalar_lea.hbm %s2449_s0, 2048 }
  0x40   : > { %s1529_s25 = scalar_lea.hbm %s1909_s8, 1024  ;;  %p1535_p13 = scmp.lt.u32.totalorder %s1909_s8, %s2449_s0 }
  0x41   : > { %p1530_p10 = scmp.ne.s32.totalorder %s1909_s8, %s1529_s25  ;;  %p1536_p2 = scmp.lt.u32.totalorder %s1534_s11, %s1529_s25 }
  0x42   : > { %p1538_p7 = scmp.lt.u32.totalorder %s1529_s25, %s1909_s8 }
  0x43   : > { %p1532_p12 = pnand %p1530_p10, %p1501_p0  ;;  %p1537_p5 = por %p1536_p2, %p1535_p13 }
  0x45   : > { %p1533_p4 = pneg %p1532_p12  ;;  %p1539_p3 = por %p1538_p7, %p1537_p5 }
  0x47   : > { %p1540_p1 = pnand %p1539_p3, %p1533_p4 }
  0x49   : > { %1543 = shalt.err (!%p1540_p1)
}
  0x4a   : > { %s1544_s5 = scalar_lea.vmem %s1912_s1, 1024  ;;  %s1725_s29 = smov [#allocation4]  }
  0x4b   : > { %p1545_p8 = scmp.ne.s32.totalorder %s1912_s1, %s1544_s5  ;;  %s1549_s10 = sshll.u32 %s1725_s29, 4  ;;  %s1550_s10 = int_to_ptr.vmem [resolvable:$false] %s1549_s10 }
  0x4c   : > { %s1551_s15 = scalar_lea.vmem %s1550_s10, 2048  ;;  %p1552_p6 = scmp.lt.s32.totalorder %s1912_s1, %s1550_s10 }
  0x4d   : > { %p1547_p10 = pnand %p1545_p8, %p1501_p0  ;;  %p1553_p13 = scmp.lt.s32.totalorder %s1551_s15, %s1544_s5 }
  0x4f   : > { %p1548_p12 = pneg %p1547_p10  ;;  %p1554_p2 = por %p1553_p13, %p1552_p6 }
  0x51   : > { %p1555_p5 = pnand %p1554_p2, %p1548_p12 }
  0x53   : > { %1558 = shalt.err (!%p1555_p5)
}
  0x54   : > { %s2451_s25 = smov 8   ;;  %s2452_s30 = smov 128  }
  0x55   : > { %1299 = dma.hbm_to_vmem [thread:$0]  (!%p1850_p11), %s1909_s8, 1024, %s1912_s1, %s1916_s24, %s2452_s30, %s2452_s30, %s2451_s25  }
  0x56   : > { %s34_s6 = sadd.s32 1, %s1712_s20  ;;  %s110_s7 = sadd.s32 1, %s1688_s14 }
  0x57   : > { %p35_p6 = scmp.ge.s32.totalorder %s34_s6, 2  ;;  %s2454_s9 = sadd.s32 1, %s1716_s21 }
  0x58   : > { %p117_p4 = scmp.ne.s32.totalorder %s1688_s14, %s1684_s13  ;;  %p2456_p7 = scmp.eq.s32.totalorder %s1720_s22, 0 }
  0x59   : > { %s2482_s6 = smov (%p35_p6, %s34_s6), 0  ;;  %s2484_s9 = smov (!%p35_p6, %s2454_s9), %s1716_s21 }
  0x5a   : > { %2453 = sst [smem:[#allocation17_spill]] %s2482_s6  ;;  %p43_p0 = scmp.ge.s32.totalorder %s2484_s9, 2 }
  0x5b   : > { %p1960_p3 = por %p117_p4, %p2456_p7  ;;  %p123_p1 = scmp.ne.s32.totalorder %s1684_s13, %s1680_s12 }
  0x5c   : > { %s2486_s9 = smov (%p43_p0, %s2484_s9), 0  ;;  %s2458_s1 = sadd.s32 1, %s1700_s17 }
  0x5d   : > { %2455 = sst [smem:[#allocation18_spill]] %s2486_s9  ;;  %s45_s11 = ssub.s32 %s1716_s21, %s2486_s9 }
  0x5e   : > { %p48_p11 = scmp.eq.s32.totalorder %s45_s11, 0  ;;  %p2459_p8 = scmp.eq.s32.totalorder %s1813_s23, 0 }
  0x5f   : > { %s221_s29 = sand.u32 1, %s1688_s14   ;;  %s1677_s25 = sshll.u32 %s1716_s21, 9 }
  0x60   : > { %s1969_s8 = scalar_select %p48_p11, %s1700_s17, %s2458_s1  }
  0x61   : > { %p1973_p10 = por %p123_p1, %p2459_p8  ;;  %s1182_s15 = sshll.u32 %s221_s29, 5 }
  0x62   : > { %s1979_s10 = scalar_select %p48_p11, %s1688_s14, %s110_s7  }
  0x63   : > { %s2460_s24 = scalar_select %p1973_p10, 1, 0 }
  0x64   : > { %s223_s30 = scalar_lea.vmem [#allocation9], %s1182_s15  ;;  %s1985_s11 = scalar_lea.hbm %s2422_s2, %s1677_s25 }
  0x65   : > { %s235_s0 = sshll.u32 %s223_s30, 4  ;;  %p2461_p12 = scmp.lt.s32.totalorder %s1720_s22, 4  ;;  %s1987_s0 = int_to_ptr.vmem [resolvable:$true] %s235_s0 }
  0x66   : > { %s1559_s7 = scalar_lea.hbm %s1985_s11, 512  ;;  %s1564_s1 = scalar_lea.hbm %s2422_s2, 1024 }
  0x67   : > { %p1993_p13 = pnand %p2461_p12, %p1960_p3  ;;  %p1560_p2 = scmp.ne.s32.totalorder %s1985_s11, %s1559_s7 }
  0x68   : > { %p1565_p4 = scmp.lt.u32.totalorder %s1985_s11, %s2422_s2  ;;  %p1566_p7 = scmp.lt.u32.totalorder %s1564_s1, %s1559_s7 }
  0x69   : > { %p1561_p5 = pneg %p1993_p13  ;;  %p1568_p11 = scmp.lt.u32.totalorder %s1559_s7, %s1985_s11 }
  0x6a   : > { %p1567_p3 = por %p1566_p7, %p1565_p4 }
  0x6b   : > { %p1562_p6 = pnand %p1561_p5, %p1560_p2 }
  0x6c   : > { %p1569_p1 = por %p1568_p11, %p1567_p3 }
  0x6d   : > { %p1563_p0 = pneg %p1562_p6 }
  0x6f   : > { %p1570_p8 = pnand %p1569_p1, %p1563_p0 }
  0x71   : > { %1573 = shalt.err (!%p1570_p8)
}
  0x72   : > { %s1574_s15 = scalar_lea.vmem %s1987_s0, 512  ;;  %s1726_s25 = smov [#allocation9]  }
  0x73   : > { %p1575_p12 = scmp.ne.s32.totalorder %s1987_s0, %s1574_s15  ;;  %s1579_s30 = sshll.u32 %s1726_s25, 4  ;;  %s1580_s30 = int_to_ptr.vmem [resolvable:$false] %s1579_s30 }
  0x74   : > { %s1581_s6 = scalar_lea.vmem %s1580_s30, 1024  ;;  %p1582_p10 = scmp.lt.s32.totalorder %s1987_s0, %s1580_s30 }
  0x75   : > { %p1577_p2 = pnand %p1575_p12, %p1561_p5  ;;  %p1583_p4 = scmp.lt.s32.totalorder %s1581_s6, %s1574_s15 }
  0x77   : > { %p1578_p6 = pneg %p1577_p2  ;;  %p1584_p7 = por %p1583_p4, %p1582_p10 }
  0x79   : > { %p1585_p3 = pnand %p1584_p7, %p1578_p6 }
  0x7b   : > { %1588 = shalt.err (!%p1585_p3)
}
  0x7c   : > { %s1727_s7 = smov 64   ;;  %s1728_s9 = smov 4  }
  0x7d   : > { %1305 = dma.hbm_to_vmem [thread:$0]  (!%p1993_p13), %s1985_s11, 512, %s1987_s0, %s1866_s26, %s1727_s7, %s1727_s7, %s1728_s9  }
  0x7e   : > { %247 = sbr.rel (%p1900_p9) target bundleno = 1448 (0x5a8), region = 32  ;;  %s2026_s1 = sand.u32 (!%p1900_p9), 1, %s1696_s16  }
  0x7f   : > { %s1188_s5 = sshll.u32 (!%p1900_p9), %s2026_s1, 6  ;;  %s250_s29 = scalar_lea.sflag (!%p1900_p9), [#allocation5], %s2026_s1 }
  0x80   : > { %s2030_s15 = scalar_lea.vmem (!%p1900_p9), [#allocation4], %s1188_s5  ;;  %p2463_p10 = scmp.ne.s32.totalorder (!%p1900_p9), %s2440_s27, 0 }
  0x85   : > { %1662 = dma.done.wait (%p2463_p10), %s250_s29, 1024  }
  0x86   : > { %1664 = vsyncadd (%p2463_p10), %s250_s29, 4294966272  ;;  %s258_s0 = sand.u32 1, %s1813_s23   ;;  %s2037_s4 = scalar_lea.vmem [#allocation7], %s1188_s5 }
  0x87   : > { %s259_s26 = scalar_lea.sflag [#allocation8], %s258_s0 }
  0x88   : > { %1666 = dma.done.wait (%p2463_p10), %s259_s26, 1024  }
  0x89   : > { %1668 = vsyncadd (%p2463_p10), %s259_s26, 4294966272  ;;  %s269_s11 = sand.u32 1, %s1684_s13   ;;  %p2464_p9 = scmp.ne.s32.totalorder %s2460_s24, 0 }
  0x8a   : > { %s1190_s12 = sshll.u32 %s269_s11, 5 }
  0x8b   : > { %s2044_s25 = scalar_lea.vmem [#allocation9], %s1190_s12 }
  0x8c   : > { %1670 = dma.done.wait (%p2464_p9), %s259_s26, 512  }
  0x8d   : > { %1672 = vsyncadd (%p2464_p9), %s259_s26, 4294966784  ;;  %s2050_s23 = scalar_lea.vmem [#allocation10], %s1188_s5  ;;  %p1192_p13 = scmp.ne.s32.totalorder %s1704_s18, 0 }
  0x8e   : > { %vm315_vm0 = vcmask (!%p1192_p13), 7168   ;;  %v1729_v0 = vmov (!%p1192_p13), -inf   ;;  %v1730_v1 = vmov (!%p1192_p13), 0.0  }
  0x8f   : > { %314 = sbr.rel (%p1192_p13) target bundleno = 151 (0x97), region = 48  ;;  %316 = vst.msk [vmem:[#allocation2] sm:$0xff] (!%p1192_p13), %vm315_vm0, %v1729_v0  ;;  %317 = vst.msk [vmem:[#allocation2 + $0x8] sm:$0xff] (!%p1192_p13), %vm315_vm0, %v1729_v0 }
  0x90   : > { %318 = vst.msk [vmem:[#allocation2 + $0x10] sm:$0xff] (!%p1192_p13), %vm315_vm0, %v1729_v0  ;;  %319 = vst.msk [vmem:[#allocation2 + $0x18] sm:$0xff] (!%p1192_p13), %vm315_vm0, %v1729_v0 }
  0x91   : > { %320 = vst.msk [vmem:[#allocation2 + $0x20] sm:$0xff] (!%p1192_p13), %vm315_vm0, %v1729_v0  ;;  %321 = vst.msk [vmem:[#allocation2 + $0x28] sm:$0xff] (!%p1192_p13), %vm315_vm0, %v1729_v0 }
  0x92   : > { %322 = vst.msk [vmem:[#allocation2 + $0x30] sm:$0xff] (!%p1192_p13), %vm315_vm0, %v1729_v0  ;;  %323 = vst.msk [vmem:[#allocation2 + $0x38] sm:$0xff] (!%p1192_p13), %vm315_vm0, %v1729_v0 }
  0x93   : > { %324 = vst.msk [vmem:[#allocation3] sm:$0xff] (!%p1192_p13), %vm315_vm0, %v1730_v1  ;;  %325 = vst.msk [vmem:[#allocation3 + $0x8] sm:$0xff] (!%p1192_p13), %vm315_vm0, %v1730_v1 }
  0x94   : > { %326 = vst.msk [vmem:[#allocation3 + $0x10] sm:$0xff] (!%p1192_p13), %vm315_vm0, %v1730_v1  ;;  %327 = vst.msk [vmem:[#allocation3 + $0x18] sm:$0xff] (!%p1192_p13), %vm315_vm0, %v1730_v1 }
  0x95   : > { %328 = vst.msk [vmem:[#allocation3 + $0x20] sm:$0xff] (!%p1192_p13), %vm315_vm0, %v1730_v1  ;;  %329 = vst.msk [vmem:[#allocation3 + $0x28] sm:$0xff] (!%p1192_p13), %vm315_vm0, %v1730_v1 }
  0x96   : > { %330 = vst.msk [vmem:[#allocation3 + $0x30] sm:$0xff] %vm315_vm0, %v1730_v1  ;;  %331 = vst.msk [vmem:[#allocation3 + $0x38] sm:$0xff] %vm315_vm0, %v1730_v1 }
  0x97 PF: > { %p1193_p5 = scmp.ne.s32.totalorder %s1704_s18, 1 }
  0x98   : > { %vm336_vm1 = vcmask (!%p1193_p5), 523264   ;;  %v1731_v2 = vmov (!%p1193_p5), 0.0  }
  0x99   : > { %335 = sbr.rel (%p1193_p5) target bundleno = 160 (0xa0), region = 52  ;;  %337 = vst.msk [vmem:[%s2050_s23] sm:$0xff] (!%p1193_p5), %vm336_vm1, %v1731_v2  ;;  %338 = vst.msk [vmem:[%s2050_s23 + $0x8] sm:$0xff] (!%p1193_p5), %vm336_vm1, %v1731_v2 }
  0x9a   : > { %339 = vst.msk [vmem:[%s2050_s23 + $0x10] sm:$0xff] (!%p1193_p5), %vm336_vm1, %v1731_v2  ;;  %340 = vst.msk [vmem:[%s2050_s23 + $0x18] sm:$0xff] (!%p1193_p5), %vm336_vm1, %v1731_v2 }
  0x9b   : > { %341 = vst.msk [vmem:[%s2050_s23 + $0x20] sm:$0xff] (!%p1193_p5), %vm336_vm1, %v1731_v2  ;;  %342 = vst.msk [vmem:[%s2050_s23 + $0x28] sm:$0xff] (!%p1193_p5), %vm336_vm1, %v1731_v2 }
  0x9c   : > { %343 = vst.msk [vmem:[%s2050_s23 + $0x30] sm:$0xff] (!%p1193_p5), %vm336_vm1, %v1731_v2  ;;  %344 = vst.msk [vmem:[%s2050_s23 + $0x38] sm:$0xff] (!%p1193_p5), %vm336_vm1, %v1731_v2 }
  0xa0 PF: > { %v2079_v3 = vld [vmem:[%s2037_s4] sm:$0xff]  ;;  %vm361_vm2 = vcmask 293888   ;;  %v347_v4 = vld [vmem:[%s2037_s4 + $0x10] sm:$0xff]  ;;  %v2083_v5 = vld [vmem:[%s2037_s4 + $0x8] sm:$0xff]  ;;  %p1198_p0 = scmp.ge.s32.totalorder %s1704_s18, 1 }
  0xa1   : > { %v353_v6 = vmul.f32 %v2079_v3, %v2079_v3  ;;  %v355_v7 = vmul.f32 %v347_v4, %v347_v4  ;;  %v354_v8 = vmul.f32 %v2083_v5, %v2083_v5  ;;  %v348_v9 = vld [vmem:[%s2037_s4 + $0x18] sm:$0xff]  ;;  %v2091_v11 = vld [vmem:[%s2037_s4 + $0x28] sm:$0xff]  ;;  %v2094_v12 = vld [vmem:[%s2037_s4 + $0x20] sm:$0xff]  ;;  %vm535_vm3 = vcmask (!%p1198_p0), 523264  }
  0xa2   : > { %v356_v10 = vmul.f32 %v348_v9, %v348_v9  ;;  %v358_v17 = vmul.f32 %v2091_v11, %v2091_v11  ;;  %v357_v18 = vmul.f32 %v2094_v12, %v2094_v12  ;;  %v2105_v19 = vld [vmem:[%s2037_s4 + $0x38] sm:$0xff]  ;;  %v2108_v20 = vld [vmem:[%s2037_s4 + $0x30] sm:$0xff]  ;;  %v414_v27 = vld [vmem:[%s2030_s15] sm:$0xff]  ;;  %vm704_vm4 = vcmask (!%p1198_p0), 7168  }
  0xa3   : > { %v362_v13 = vsel %vm361_vm2, %v353_v6, 0.0  ;;  %v368_v14 = vsel %vm361_vm2, %v355_v7, 0.0  ;;  %v365_v15 = vsel %vm361_vm2, %v354_v8, 0.0  ;;  %v360_v23 = vmul.f32 %v2105_v19, %v2105_v19  ;;  %v415_v28 = vld [vmem:[%s2030_s15 + $0x8] sm:$0xff]  ;;  %v418_v29 = vld [vmem:[%s2030_s15 + $0x20] sm:$0xff] }
  0xa4   : > { %363 = vadd.xlane.f32.xlu0 %v362_v13  ;;  %369 = vadd.xlane.f32.xlu1 %v368_v14  ;;  %v371_v16 = vsel %vm361_vm2, %v356_v10, 0.0  ;;  %v377_v21 = vsel %vm361_vm2, %v358_v17, 0.0  ;;  %v374_v22 = vsel %vm361_vm2, %v357_v18, 0.0  ;;  %v359_v24 = vmul.f32 %v2108_v20, %v2108_v20  ;;  %v419_v31 = vld [vmem:[%s2030_s15 + $0x28] sm:$0xff]  ;;  %v417_v10 = vld [vmem:[%s2030_s15 + $0x18] sm:$0xff] }
  0xa5   : > { %v383_v25 = vsel %vm361_vm2, %v360_v23, 0.0  ;;  %v422_v30 = vpack.c.bf16 %v415_v28, %v414_v27  ;;  %v424_v32 = vpack.c.bf16 %v419_v31, %v418_v29 }
  0xa6   : > { %v380_v26 = vsel %vm361_vm2, %v359_v24, 0.0 }
  0xa7   : > { %1240 = vmatprep.mubr.msk.bf16.mxu0 %vm361_vm2, %v422_v30  ;;  %1244 = vmatprep.mubr.msk.bf16.mxu1 %vm361_vm2, %v424_v32 }
  0xa8   : > { %366 = vadd.xlane.f32.xlu0 %v365_v15  ;;  %372 = vadd.xlane.f32.xlu1 %v371_v16 }
  0xac   : > { %378 = vadd.xlane.f32.xlu1 %v377_v21  ;;  %375 = vadd.xlane.f32.xlu0 %v374_v22 }
  0xb0   : > { %384 = vadd.xlane.f32.xlu1 %v383_v25  ;;  %381 = vadd.xlane.f32.xlu0 %v380_v26 }
 0x131   : > { %v364_v33 = vpop.xlane.xlu0 %363  ;;  %v370_v34 = vpop.xlane.xlu1 %369 }
 0x132   : > { %1411 = vrsqrt.f32 %v364_v33 }
 0x133   : > { %1413 = vrsqrt.f32 %v370_v34 }
 0x135   : > { %v367_v35 = vpop.xlane.xlu0 %366  ;;  %v373_v36 = vpop.xlane.xlu1 %372 }
 0x136   : > { %1415 = vrsqrt.f32 %v367_v35 }
 0x137   : > { %1417 = vrsqrt.f32 %v373_v36 }
 0x139   : > { %v379_v37 = vpop.xlane.xlu1 %378  ;;  %v376_v38 = vpop.xlane.xlu0 %375 }
 0x13a   : > { %1419 = vrsqrt.f32 %v379_v37 }
 0x13b   : > { %1421 = vrsqrt.f32 %v376_v38 }
 0x13c   : > { %v1412_v39 = vpop.eup %1411 }
 0x13d   : > { %v1414_v40 = vpop.eup %1413  ;;  %v385_v41 = vpop.xlane.xlu1 %384  ;;  %v394_v44 = vmin.f32 %v1412_v39, 10000.0  ;;  %v1732_v39 = vmov (!%p1198_p0), 0  }
 0x13e   : > { %v382_v42 = vpop.xlane.xlu0 %381  ;;  %v396_v43 = vmin.f32 %v1414_v40, 10000.0  ;;  %1423 = vrsqrt.f32 %v385_v41  ;;  %1427 = vset.pattern.permute.xlu0 (!%p1198_p0), %v1732_v39  ;;  %1428 = vset.pattern.permute.xlu1 (!%p1198_p0), %v1732_v39  ;;  %v2181_v40 = vld [vmem:[#allocation2] sm:$0xff] (!%p1198_p0)  ;;  %v2183_v41 = vld [vmem:[#allocation2 + $0x10] sm:$0xff] (!%p1198_p0) }
 0x13f   : > { %1425 = vrsqrt.f32 %v382_v42  ;;  %v402_v50 = vmul.f32 %v394_v44, %v2079_v3 }
 0x140   : > { %v1416_v45 = vpop.eup %1415  ;;  %v404_v48 = vmul.f32 %v396_v43, %v347_v4 }
 0x141   : > { %v1418_v46 = vpop.eup %1417  ;;  %v395_v47 = vmin.f32 %v1416_v45, 10000.0 }
 0x142   : > { %v397_v49 = vmin.f32 %v1418_v46, 10000.0  ;;  %v2191_v46 = vld [vmem:[#allocation2 + $0x8] sm:$0xff] (!%p1198_p0) }
 0x143   : > { %v403_v51 = vmul.f32 %v395_v47, %v2083_v5  ;;  %v2193_v47 = vld [vmem:[#allocation2 + $0x18] sm:$0xff] (!%p1198_p0) }
 0x144   : > { %v1420_v52 = vpop.eup %1419  ;;  %v405_v53 = vmul.f32 %v397_v49, %v348_v9  ;;  %v416_v9 = vld [vmem:[%s2030_s15 + $0x10] sm:$0xff] }
 0x145   : > { %v1422_v54 = vpop.eup %1421  ;;  %v399_v55 = vmin.f32 %v1420_v52, 10000.0  ;;  %v410_v56 = vpack.c.bf16 %v403_v51, %v402_v50  ;;  %v423_v13 = vpack.c.bf16 %v417_v10, %v416_v9 }
 0x146   : > { %v411_v57 = vpack.c.bf16 %v405_v53, %v404_v48  ;;  %v398_v58 = vmin.f32 %v1422_v54, 10000.0  ;;  %v2210_v54 = vld [vmem:[#allocation2 + $0x20] sm:$0xff] (!%p1198_p0) }
 0x147   : > { %1280 = vmatprep.subr.msk.bf16.mxu0 %vm361_vm2, %v410_v56  ;;  %1281 = vmatprep.subr.msk.bf16.mxu1 %vm361_vm2, %v410_v56  ;;  %v439_v59 = vsel %vm361_vm2, %v410_v56, 0  ;;  %v407_v61 = vmul.f32 %v399_v55, %v2091_v11  ;;  %v420_v11 = vld [vmem:[%s2030_s15 + $0x30] sm:$0xff]  ;;  %v2212_v55 = vld [vmem:[#allocation2 + $0x28] sm:$0xff] (!%p1198_p0) }
 0x148   : > { %1233 = vmatpush3.bf16.xpose.msra.mxu0 %v439_v59  ;;  %1268 = vmatpush3.bf16.xpose.msra.mxu1 %v439_v59  ;;  %v1424_v60 = vpop.eup %1423  ;;  %v406_v62 = vmul.f32 %v398_v58, %v2094_v12  ;;  %v442_v3 = vsel %vm361_vm2, %v411_v57, 0  ;;  %v421_v12 = vld [vmem:[%s2030_s15 + $0x38] sm:$0xff] }
 0x149   : > { %1282 = vmatprep.subr.msk.bf16.mxu0 %vm361_vm2, %v411_v57  ;;  %1283 = vmatprep.subr.msk.bf16.mxu1 %vm361_vm2, %v411_v57  ;;  %v1426_v63 = vpop.eup %1425  ;;  %v401_v1 = vmin.f32 %v1424_v60, 10000.0  ;;  %v425_v14 = vpack.c.bf16 %v421_v12, %v420_v11 }
 0x14a   : > { %v412_v0 = vpack.c.bf16 %v407_v61, %v406_v62  ;;  %v400_v2 = vmin.f32 %v1426_v63, 10000.0  ;;  %v2229_v62 = vld [vmem:[#allocation2 + $0x30] sm:$0xff] (!%p1198_p0)  ;;  %v2231_v63 = vld [vmem:[#allocation2 + $0x38] sm:$0xff] (!%p1198_p0) }
 0x14b   : > { %v409_v4 = vmul.f32 %v401_v1, %v2105_v19 }
 0x14c   : > { %v408_v5 = vmul.f32 %v400_v2, %v2108_v20  ;;  %v445_v7 = vsel %vm361_vm2, %v412_v0, 0 }
 0x14e   : > { %v413_v6 = vpack.c.bf16 %v409_v4, %v408_v5 }
 0x150   : > { %1235 = vmatpush3.bf16.xpose.msra.mxu0 %v442_v3  ;;  %1269 = vmatpush3.bf16.xpose.msra.mxu1 %v442_v3  ;;  %v448_v8 = vsel %vm361_vm2, %v413_v6, 0 }
 0x151   : > { %1284 = vmatprep.subr.msk.bf16.mxu0 %vm361_vm2, %v412_v0  ;;  %1285 = vmatprep.subr.msk.bf16.mxu1 %vm361_vm2, %v412_v0 }
 0x158   : > { %1237 = vmatpush3.bf16.xpose.msra.mxu0 %v445_v7  ;;  %1270 = vmatpush3.bf16.xpose.msra.mxu1 %v445_v7 }
 0x159   : > { %1286 = vmatprep.subr.msk.bf16.mxu0 %vm361_vm2, %v413_v6  ;;  %1287 = vmatprep.subr.msk.bf16.mxu1 %vm361_vm2, %v413_v6 }
 0x160   : > { %1239 = vmatpush3.bf16.xpose.msra.mxu0 %v448_v8  ;;  %1271 = vmatpush3.bf16.xpose.msra.mxu1 %v448_v8 }
 0x167   : > { %1241 = vmatmul.mubr.msk.bf16.vlgmr.msra.gmra.mrb[0].mxu0 %vm361_vm2, %v423_v13  ;;  %1245 = vmatmul.mubr.msk.bf16.vlgmr.msra.gmra.mrb[0].mxu1 %vm361_vm2, %v425_v14 }
 0x238   : > { %526 = sbr.rel (%p1198_p0) target bundleno = 1036 (0x40c), region = 56 }
 0x23a   : > { %v1242_v15 = vpop.f32.mrb[0].mxu0  ;;  %v1246_v16 = vpop.f32.mrb[0].mxu1 }
 0x23b   : > { %v2148_v17 = vmul.f32 10.0, %v1242_v15  ;;  %v2150_v18 = vmul.f32 10.0, %v1246_v16  ;;  %v484_v19 = vpop.f32.mrb[1].mxu0  ;;  %v500_v20 = vpop.f32.mrb[1].mxu1 }
 0x23c   : > { %v2152_v21 = vmul.f32 10.0, %v484_v19  ;;  %v2154_v22 = vmul.f32 10.0, %v500_v20  ;;  %v1243_v23 = vpop.f32.mrb[2].mxu0  ;;  %v1247_v24 = vpop.f32.mrb[2].mxu1 }
 0x23d   : > { %v2156_v25 = vmul.f32 10.0, %v1243_v23  ;;  %v2158_v26 = vmul.f32 10.0, %v1247_v24  ;;  %v487_v27 = vpop.f32.mrb[3].mxu0  ;;  %v503_v28 = vpop.f32.mrb[3].mxu1  ;;  %v542_v32 = vsel (!%p1198_p0), %vm535_vm3, %v2148_v17, -inf  ;;  %v554_v37 = vsel (!%p1198_p0), %vm535_vm3, %v2150_v18, -inf }
 0x23e   : > { %v2160_v29 = vmul.f32 10.0, %v487_v27  ;;  %v2162_v30 = vmul.f32 10.0, %v503_v28  ;;  %v536_v31 = vsel (!%p1198_p0), %vm535_vm3, %v2152_v21, -inf  ;;  %543 = vmax.xlane.f32.xlu1 (!%p1198_p0), %v542_v32  ;;  %v548_v35 = vsel (!%p1198_p0), %vm535_vm3, %v2154_v22, -inf }
 0x23f   : > { %537 = vmax.xlane.f32.xlu0 %v536_v31  ;;  %v545_v34 = vsel %vm535_vm3, %v2156_v25, -inf  ;;  %v557_v38 = vsel %vm535_vm3, %v2158_v26, -inf }
 0x240   : > { %v539_v33 = vsel %vm535_vm3, %v2160_v29, -inf  ;;  %v551_v36 = vsel %vm535_vm3, %v2162_v30, -inf }
 0x242   : > { %546 = vmax.xlane.f32.xlu1 %v545_v34 }
 0x243   : > { %540 = vmax.xlane.f32.xlu0 %v539_v33 }
 0x246   : > { %552 = vmax.xlane.f32.xlu1 %v551_v36 }
 0x247   : > { %549 = vmax.xlane.f32.xlu0 %v548_v35 }
 0x24a   : > { %558 = vmax.xlane.f32.xlu1 %v557_v38 }
 0x24b   : > { %555 = vmax.xlane.f32.xlu0 %v554_v37 }
 0x2cb   : > { %v544_v43 = vpop.xlane.xlu1 %543 }
 0x2cc   : > { %v538_v42 = vpop.xlane.xlu0 %537  ;;  %v2189_v45 = vmax.f32 %v2183_v41, %v544_v43 }
 0x2cd   : > { %v2186_v44 = vmax.f32 %v2181_v40, %v538_v42 }
 0x2ce   : > { %v578_v49 = vsub.f32 %v2183_v41, %v2189_v45  ;;  %715 = vst.msk [vmem:[#allocation2 + $0x10] sm:$0xff] %vm704_vm4, %v2189_v45 }
 0x2cf   : > { %v576_v48 = vsub.f32 %v2181_v40, %v2186_v44  ;;  %713 = vst.msk [vmem:[#allocation2] sm:$0xff] %vm704_vm4, %v2186_v44  ;;  %610 = vperm.xlu0 %1427, %v2186_v44   ;;  %v547_v51 = vpop.xlane.xlu1 %546 }
 0x2d0   : > { %v541_v50 = vpop.xlane.xlu0 %540  ;;  %v2208_v53 = vmax.f32 %v2193_v47, %v547_v51 }
 0x2d1   : > { %v2205_v52 = vmax.f32 %v2191_v46, %v541_v50 }
 0x2d2   : > { %v579_v57 = vsub.f32 %v2193_v47, %v2208_v53  ;;  %716 = vst.msk [vmem:[#allocation2 + $0x18] sm:$0xff] %vm704_vm4, %v2208_v53 }
 0x2d3   : > { %v577_v56 = vsub.f32 %v2191_v46, %v2205_v52  ;;  %714 = vst.msk [vmem:[#allocation2 + $0x8] sm:$0xff] %vm704_vm4, %v2205_v52  ;;  %615 = vperm.xlu1 %1428, %v2205_v52   ;;  %v553_v59 = vpop.xlane.xlu1 %552  ;;  %v569_v52 = vld [vmem:[#allocation3 + $0x8] sm:$0xff] }
 0x2d4   : > { %v550_v58 = vpop.xlane.xlu0 %549  ;;  %v2227_v61 = vmax.f32 %v2212_v55, %v553_v59 }
 0x2d5   : > { %v2224_v60 = vmax.f32 %v2210_v54, %v550_v58 }
 0x2d6   : > { %v581_v1 = vsub.f32 %v2212_v55, %v2227_v61  ;;  %718 = vst.msk [vmem:[#allocation2 + $0x28] sm:$0xff] %vm704_vm4, %v2227_v61 }
 0x2d7   : > { %620 = vperm.xlu1 %1428, %v2189_v45   ;;  %v580_v0 = vsub.f32 %v2210_v54, %v2224_v60  ;;  %717 = vst.msk [vmem:[#allocation2 + $0x20] sm:$0xff] %vm704_vm4, %v2224_v60  ;;  %v559_v3 = vpop.xlane.xlu1 %558 }
 0x2d8   : > { %v556_v2 = vpop.xlane.xlu0 %555  ;;  %v2246_v5 = vmax.f32 %v2231_v63, %v559_v3  ;;  %v594_v41 = vmul.f32 1.442695, %v581_v1 }
 0x2d9   : > { %v2243_v4 = vmax.f32 %v2229_v62, %v556_v2  ;;  %v592_v40 = vmul.f32 1.442695, %v580_v0 }
 0x2da   : > { %v583_v7 = vsub.f32 %v2231_v63, %v2246_v5  ;;  %720 = vst.msk [vmem:[#allocation2 + $0x38] sm:$0xff] %vm704_vm4, %v2246_v5 }
 0x2db   : > { %625 = vperm.xlu1 %1428, %v2208_v53   ;;  %v582_v6 = vsub.f32 %v2229_v62, %v2243_v4  ;;  %719 = vst.msk [vmem:[#allocation2 + $0x30] sm:$0xff] %vm704_vm4, %v2243_v4  ;;  %v570_v53 = vld [vmem:[#allocation3 + $0x10] sm:$0xff] }
 0x2dd   : > { %v596_v54 = vmul.f32 1.442695, %v582_v6 }
 0x2df   : > { %630 = vperm.xlu1 %1428, %v2224_v60  }
 0x2e3   : > { %635 = vperm.xlu1 %1428, %v2227_v61   ;;  %v598_v61 = vmul.f32 1.442695, %v583_v7  ;;  %v574_v7 = vld [vmem:[#allocation3 + $0x30] sm:$0xff] }
 0x2e7   : > { %640 = vperm.xlu1 %1428, %v2243_v4  }
 0x2eb   : > { %645 = vperm.xlu1 %1428, %v2246_v5  }
 0x34e   : > { %v611_v8 = vpop.permute.xlu0 %610 }
 0x34f   : > { %v648_v9 = vsub.f32 %v2152_v21, %v611_v8 }
 0x351   : > { %v656_v10 = vmul.f32 1.442695, %v648_v9 }
 0x352   : > { %v616_v11 = vpop.permute.xlu1 %615 }
 0x353   : > { %1429 = vpow2.f32 %v656_v10  ;;  %v649_v12 = vsub.f32 %v2160_v29, %v616_v11 }
 0x355   : > { %v658_v13 = vmul.f32 1.442695, %v649_v12 }
 0x356   : > { %v621_v14 = vpop.permute.xlu1 %620 }
 0x357   : > { %1431 = vpow2.f32 %v658_v13  ;;  %v650_v15 = vsub.f32 %v2148_v17, %v621_v14 }
 0x359   : > { %v660_v16 = vmul.f32 1.442695, %v650_v15 }
 0x35a   : > { %v626_v19 = vpop.permute.xlu1 %625 }
 0x35b   : > { %1433 = vpow2.f32 %v660_v16  ;;  %v651_v20 = vsub.f32 %v2156_v25, %v626_v19  ;;  %v584_v16 = vmul.f32 1.442695, %v576_v48  ;;  %v586_v19 = vmul.f32 1.442695, %v577_v56 }
 0x35d   : > { %v1430_v23 = vpop.eup %1429  ;;  %v662_v24 = vmul.f32 1.442695, %v651_v20  ;;  %v588_v20 = vmul.f32 1.442695, %v578_v49 }
 0x35e   : > { %v631_v27 = vpop.permute.xlu1 %630  ;;  %v672_v28 = vsel %vm535_vm3, %v1430_v23, 0.0  ;;  %v590_v23 = vmul.f32 1.442695, %v579_v57 }
 0x35f   : > { %1435 = vpow2.f32 %v662_v24  ;;  %v652_v31 = vsub.f32 %v2154_v22, %v631_v27  ;;  %673 = vadd.xlane.f32.xlu1 %v672_v28  ;;  %v568_v27 = vld [vmem:[#allocation3] sm:$0xff] }
 0x361   : > { %v1432_v32 = vpop.eup %1431  ;;  %v664_v33 = vmul.f32 1.442695, %v652_v31  ;;  %v571_v31 = vld [vmem:[#allocation3 + $0x18] sm:$0xff] }
 0x362   : > { %v636_v34 = vpop.permute.xlu1 %635  ;;  %v675_v35 = vsel %vm535_vm3, %v1432_v32, 0.0 }
 0x363   : > { %1437 = vpow2.f32 %v664_v33  ;;  %v653_v36 = vsub.f32 %v2162_v30, %v636_v34  ;;  %676 = vadd.xlane.f32.xlu0 %v675_v35  ;;  %v572_v34 = vld [vmem:[#allocation3 + $0x20] sm:$0xff] }
 0x365   : > { %v1434_v37 = vpop.eup %1433  ;;  %v666_v38 = vmul.f32 1.442695, %v653_v36  ;;  %v573_v36 = vld [vmem:[#allocation3 + $0x28] sm:$0xff] }
 0x366   : > { %v641_v39 = vpop.permute.xlu1 %640  ;;  %v678_v42 = vsel %vm535_vm3, %v1434_v37, 0.0 }
 0x367   : > { %1439 = vpow2.f32 %v666_v38  ;;  %v654_v43 = vsub.f32 %v2150_v18, %v641_v39  ;;  %679 = vadd.xlane.f32.xlu0 %v678_v42 }
 0x369   : > { %v1436_v50 = vpop.eup %1435  ;;  %v668_v51 = vmul.f32 1.442695, %v654_v43 }
 0x36a   : > { %v646_v58 = vpop.permute.xlu1 %645  ;;  %v681_v59 = vsel %vm535_vm3, %v1436_v50, 0.0 }
 0x36b   : > { %1441 = vpow2.f32 %v668_v51  ;;  %v655_v2 = vsub.f32 %v2158_v26, %v646_v58  ;;  %682 = vadd.xlane.f32.xlu1 %v681_v59  ;;  %v575_v51 = vld [vmem:[#allocation3 + $0x38] sm:$0xff] }
 0x36d   : > { %v1438_v3 = vpop.eup %1437  ;;  %v670_v8 = vmul.f32 1.442695, %v655_v2 }
 0x36e   : > { %v684_v9 = vsel %vm535_vm3, %v1438_v3, 0.0 }
 0x36f   : > { %1443 = vpow2.f32 %v670_v8  ;;  %685 = vadd.xlane.f32.xlu0 %v684_v9 }
 0x370   : > { %1445 = vpow2.f32 %v584_v16 }
 0x371   : > { %v1440_v10 = vpop.eup %1439  ;;  %1447 = vpow2.f32 %v586_v19 }
 0x372   : > { %v687_v11 = vsel %vm535_vm3, %v1440_v10, 0.0  ;;  %1449 = vpow2.f32 %v588_v20 }
 0x373   : > { %688 = vadd.xlane.f32.xlu1 %v687_v11  ;;  %1451 = vpow2.f32 %v590_v23 }
 0x374   : > { %1453 = vpow2.f32 %v592_v40 }
 0x375   : > { %v1442_v12 = vpop.eup %1441  ;;  %1455 = vpow2.f32 %v594_v41 }
 0x376   : > { %v690_v13 = vsel %vm535_vm3, %v1442_v12, 0.0  ;;  %1457 = vpow2.f32 %v596_v54 }
 0x377   : > { %691 = vadd.xlane.f32.xlu0 %v690_v13  ;;  %1459 = vpow2.f32 %v598_v61 }
 0x379   : > { %v1444_v14 = vpop.eup %1443 }
 0x37a   : > { %v693_v15 = vsel %vm535_vm3, %v1444_v14, 0.0  ;;  %v1446_v24 = vpop.eup %1445 }
 0x37b   : > { %694 = vadd.xlane.f32.xlu1 %v693_v15  ;;  %v600_v44 = vmul.f32 %v1446_v24, %v568_v27  ;;  %v1448_v46 = vpop.eup %1447 }
 0x37c   : > { %v601_v45 = vmul.f32 %v1448_v46, %v569_v52  ;;  %v1450_v47 = vpop.eup %1449 }
 0x37d   : > { %v602_v60 = vmul.f32 %v1450_v47, %v570_v53  ;;  %v1452_v0 = vpop.eup %1451 }
 0x37e   : > { %v603_v1 = vmul.f32 %v1452_v0, %v571_v31  ;;  %v1454_v32 = vpop.eup %1453 }
 0x37f   : > { %v604_v4 = vmul.f32 %v1454_v32, %v572_v34  ;;  %v1456_v6 = vpop.eup %1455 }
 0x380   : > { %v605_v38 = vmul.f32 %v1456_v6, %v573_v36  ;;  %v1458_v63 = vpop.eup %1457 }
 0x381   : > { %v606_v42 = vmul.f32 %v1458_v63, %v574_v7  ;;  %v1460_v43 = vpop.eup %1459 }
 0x382   : > { %v607_v59 = vmul.f32 %v1460_v43, %v575_v51 }
 0x3ec   : > { %v674_v48 = vpop.xlane.xlu1 %673 }
 0x3ed   : > { %v696_v56 = vadd.f32 %v674_v48, %v600_v44 }
 0x3ef   : > { %705 = vst.msk [vmem:[#allocation3] sm:$0xff] %vm704_vm4, %v696_v56 }
 0x3f0   : > { %v677_v49 = vpop.xlane.xlu0 %676 }
 0x3f1   : > { %v697_v57 = vadd.f32 %v677_v49, %v601_v45 }
 0x3f3   : > { %706 = vst.msk [vmem:[#allocation3 + $0x8] sm:$0xff] %vm704_vm4, %v697_v57 }
 0x3f4   : > { %v680_v28 = vpop.xlane.xlu0 %679 }
 0x3f5   : > { %v698_v55 = vadd.f32 %v680_v28, %v602_v60 }
 0x3f7   : > { %707 = vst.msk [vmem:[#allocation3 + $0x10] sm:$0xff] %vm704_vm4, %v698_v55 }
 0x3f8   : > { %v683_v33 = vpop.xlane.xlu1 %682 }
 0x3f9   : > { %v699_v62 = vadd.f32 %v683_v33, %v603_v1 }
 0x3fb   : > { %708 = vst.msk [vmem:[#allocation3 + $0x18] sm:$0xff] %vm704_vm4, %v699_v62 }
 0x3fc   : > { %v686_v35 = vpop.xlane.xlu0 %685 }
 0x3fd   : > { %v700_v37 = vadd.f32 %v686_v35, %v604_v4 }
 0x3ff   : > { %709 = vst.msk [vmem:[#allocation3 + $0x20] sm:$0xff] %vm704_vm4, %v700_v37 }
 0x400   : > { %v689_v5 = vpop.xlane.xlu1 %688 }
 0x401   : > { %v701_v39 = vadd.f32 %v689_v5, %v605_v38 }
 0x403   : > { %710 = vst.msk [vmem:[#allocation3 + $0x28] sm:$0xff] %vm704_vm4, %v701_v39 }
 0x404   : > { %v692_v50 = vpop.xlane.xlu0 %691 }
 0x405   : > { %v702_v58 = vadd.f32 %v692_v50, %v606_v42 }
 0x407   : > { %711 = vst.msk [vmem:[#allocation3 + $0x30] sm:$0xff] %vm704_vm4, %v702_v58 }
 0x408   : > { %v695_v2 = vpop.xlane.xlu1 %694 }
 0x409   : > { %v703_v3 = vadd.f32 %v695_v2, %v607_v59 }
 0x40b   : > { %712 = vst.msk [vmem:[#allocation3 + $0x38] sm:$0xff] %vm704_vm4, %v703_v3 }
 0x40c PF: > { %p1199_p11 = scmp.lt.s32.totalorder %s1704_s18, 1 }
 0x40d   : > { %v729_v8 = vld [vmem:[#allocation2 + $0x20] sm:$0xff] (!%p1199_p11)  ;;  %v1733_v10 = vmov (!%p1199_p11), 0   ;;  %v798_v11 = vld [vmem:[#allocation3 + $0x8] sm:$0xff] (!%p1199_p11)  ;;  %v728_v16 = vld [vmem:[#allocation2 + $0x18] sm:$0xff] (!%p1199_p11)  ;;  %vm913_vm5 = vcmask (!%p1199_p11), 523264  }
 0x40e   : > { %724 = sbr.rel (%p1199_p11) target bundleno = 1422 (0x58e), region = 60  ;;  %v725_v9 = vld [vmem:[#allocation2] sm:$0xff] (!%p1199_p11)  ;;  %1462 = vset.pattern.permute.xlu1 (!%p1199_p11), %v1733_v10  ;;  %1461 = vset.pattern.permute.xlu0 (!%p1199_p11), %v1733_v10  ;;  %v730_v12 = vld [vmem:[#allocation2 + $0x28] sm:$0xff] (!%p1199_p11)  ;;  %1467 = vrcp.f32 (!%p1199_p11), %v798_v11  ;;  %v727_v19 = vld [vmem:[#allocation2 + $0x10] sm:$0xff] (!%p1199_p11) }
 0x40f   : > { %755 = vperm.xlu1 (!%p1199_p11), %1462, %v729_v8   ;;  %735 = vperm.xlu0 (!%p1199_p11), %1461, %v725_v9   ;;  %v726_v13 = vld [vmem:[#allocation2 + $0x8] sm:$0xff] (!%p1199_p11)  ;;  %v797_v14 = vld [vmem:[#allocation3] sm:$0xff] (!%p1199_p11)  ;;  %v800_v23 = vld [vmem:[#allocation3 + $0x18] sm:$0xff] (!%p1199_p11) }
 0x410   : > { %v802_v15 = vld [vmem:[#allocation3 + $0x28] sm:$0xff] (!%p1199_p11)  ;;  %1469 = vrcp.f32 (!%p1199_p11), %v797_v14  ;;  %v801_v20 = vld [vmem:[#allocation3 + $0x20] sm:$0xff] (!%p1199_p11)  ;;  %v799_v24 = vld [vmem:[#allocation3 + $0x10] sm:$0xff] (!%p1199_p11) }
 0x411   : > { %1471 = vrcp.f32 (!%p1199_p11), %v802_v15  ;;  %v732_v27 = vld [vmem:[#allocation2 + $0x38] sm:$0xff] (!%p1199_p11)  ;;  %v731_v40 = vld [vmem:[#allocation2 + $0x30] sm:$0xff] (!%p1199_p11)  ;;  %v1463_v56 = vld [vmem:[%s2044_s25] sm:$0xff] (!%p1199_p11)  }
 0x412   : > { %1473 = vrcp.f32 (!%p1199_p11), %v801_v20  ;;  %v804_v44 = vld [vmem:[#allocation3 + $0x38] sm:$0xff] (!%p1199_p11)  ;;  %v803_v48 = vld [vmem:[#allocation3 + $0x30] sm:$0xff] (!%p1199_p11)  ;;  %1248 = vmatprep.subr.bf16.mxu0 (!%p1199_p11), %v1463_v56  ;;  %1272 = vmatprep.subr.bf16.mxu1 (!%p1199_p11), %v1463_v56  ;;  %v1464_v47 = vld [vmem:[%s2044_s25 + $0x8] sm:$0xff] (!%p1199_p11)  }
 0x413   : > { %760 = vperm.xlu1 (!%p1199_p11), %1462, %v730_v12   ;;  %740 = vperm.xlu0 (!%p1199_p11), %1461, %v726_v13   ;;  %1475 = vrcp.f32 (!%p1199_p11), %v800_v23  ;;  %v1465_v57 = vld [vmem:[%s2044_s25 + $0x10] sm:$0xff] (!%p1199_p11)   ;;  %v1466_v0 = vld [vmem:[%s2044_s25 + $0x18] sm:$0xff] (!%p1199_p11)  }
 0x414   : > { %1477 = vrcp.f32 (!%p1199_p11), %v799_v24  ;;  %1249 = vmatpush3.bf16.msra.mxu0 (!%p1199_p11), %v1463_v56  ;;  %1276 = vmatpush3.bf16.msra.mxu1 (!%p1199_p11), %v1463_v56 }
 0x415   : > { %1479 = vrcp.f32 %v804_v44  ;;  %1250 = vmatprep.subr.bf16.mxu0 %v1464_v47  ;;  %1273 = vmatprep.subr.bf16.mxu1 %v1464_v47 }
 0x416   : > { %1481 = vrcp.f32 %v803_v48 }
 0x417   : > { %750 = vperm.xlu1 %1462, %v728_v16   ;;  %745 = vperm.xlu0 %1461, %v727_v19  }
 0x418   : > { %v1468_v46 = vpop.eup %1467  ;;  %1251 = vmatpush3.bf16.msra.mxu0 %v1464_v47  ;;  %1277 = vmatpush3.bf16.msra.mxu1 %v1464_v47 }
 0x419   : > { %1252 = vmatprep.subr.bf16.mxu0 %v1465_v57  ;;  %1274 = vmatprep.subr.bf16.mxu1 %v1465_v57 }
 0x41a   : > { %v1470_v52 = vpop.eup %1469 }
 0x41b   : > { %770 = vperm.xlu1 %1462, %v732_v27   ;;  %765 = vperm.xlu0 %1461, %v731_v40   ;;  %v1472_v41 = vpop.eup %1471 }
 0x41c   : > { %v1474_v45 = vpop.eup %1473  ;;  %1253 = vmatpush3.bf16.msra.mxu0 %v1465_v57  ;;  %1278 = vmatpush3.bf16.msra.mxu1 %v1465_v57  ;;  %v871_v57 = vld [vmem:[%s2050_s23 + $0x10] sm:$0xff] }
 0x41d   : > { %v1476_v49 = vpop.eup %1475  ;;  %1254 = vmatprep.subr.bf16.mxu0 %v1466_v0  ;;  %1275 = vmatprep.subr.bf16.mxu1 %v1466_v0 }
 0x41e   : > { %v1478_v53 = vpop.eup %1477 }
 0x41f   : > { %820 = vperm.xlu1 %1462, %v1468_v46   ;;  %815 = vperm.xlu0 %1461, %v1470_v52   ;;  %v1480_v54 = vpop.eup %1479 }
 0x420   : > { %v1482_v60 = vpop.eup %1481  ;;  %1255 = vmatpush3.bf16.msra.mxu0 %v1466_v0  ;;  %1279 = vmatpush3.bf16.msra.mxu1 %v1466_v0  ;;  %v869_v0 = vld [vmem:[%s2050_s23] sm:$0xff] }
 0x423   : > { %840 = vperm.xlu1 %1462, %v1472_v41   ;;  %835 = vperm.xlu0 %1461, %v1474_v45  }
 0x427   : > { %830 = vperm.xlu1 %1462, %v1476_v49   ;;  %825 = vperm.xlu0 %1461, %v1478_v53  }
 0x42b   : > { %850 = vperm.xlu1 %1462, %v1480_v54   ;;  %845 = vperm.xlu0 %1461, %v1482_v60  }
 0x48e   : > { %v756_v28 = vpop.permute.xlu1 %755  ;;  %v736_v31 = vpop.permute.xlu0 %735 }
 0x48f   : > { %v777_v55 = vsub.f32 %v2154_v22, %v756_v28  ;;  %v773_v61 = vsub.f32 %v2152_v21, %v736_v31 }
 0x491   : > { %v781_v1 = vmul.f32 1.442695, %v773_v61  ;;  %v789_v32 = vmul.f32 1.442695, %v777_v55  ;;  %v872_v55 = vld [vmem:[%s2050_s23 + $0x18] sm:$0xff] }
 0x492   : > { %v761_v33 = vpop.permute.xlu1 %760  ;;  %v741_v34 = vpop.permute.xlu0 %740 }
 0x493   : > { %v778_v62 = vsub.f32 %v2162_v30, %v761_v33  ;;  %v774_v4 = vsub.f32 %v2160_v29, %v741_v34  ;;  %1483 = vpow2.f32 %v781_v1  ;;  %v870_v33 = vld [vmem:[%s2050_s23 + $0x8] sm:$0xff] }
 0x494   : > { %1485 = vpow2.f32 %v789_v32 }
 0x495   : > { %v791_v6 = vmul.f32 1.442695, %v778_v62  ;;  %v783_v35 = vmul.f32 1.442695, %v774_v4 }
 0x496   : > { %v751_v36 = vpop.permute.xlu1 %750  ;;  %v746_v37 = vpop.permute.xlu0 %745 }
 0x497   : > { %1487 = vpow2.f32 %v791_v6  ;;  %v776_v38 = vsub.f32 %v2156_v25, %v751_v36  ;;  %v775_v22 = vsub.f32 %v2148_v17, %v746_v37  ;;  %v875_v6 = vld [vmem:[%s2050_s23 + $0x30] sm:$0xff] }
 0x498   : > { %1489 = vpow2.f32 %v783_v35 }
 0x499   : > { %v787_v21 = vmul.f32 1.442695, %v776_v38  ;;  %v785_v63 = vmul.f32 1.442695, %v775_v22  ;;  %v873_v38 = vld [vmem:[%s2050_s23 + $0x20] sm:$0xff] }
 0x49a   : > { %v771_v5 = vpop.permute.xlu1 %770  ;;  %v766_v7 = vpop.permute.xlu0 %765 }
 0x49b   : > { %1491 = vpow2.f32 %v787_v21  ;;  %v780_v30 = vsub.f32 %v2158_v26, %v771_v5  ;;  %v779_v29 = vsub.f32 %v2150_v18, %v766_v7  ;;  %v876_v5 = vld [vmem:[%s2050_s23 + $0x38] sm:$0xff] }
 0x49c   : > { %1493 = vpow2.f32 %v785_v63 }
 0x49d   : > { %v795_v39 = vmul.f32 1.442695, %v780_v30  ;;  %v793_v42 = vmul.f32 1.442695, %v779_v29  ;;  %v1484_v43 = vpop.eup %1483 }
 0x49e   : > { %v821_v50 = vpop.permute.xlu1 %820  ;;  %v816_v51 = vpop.permute.xlu0 %815 }
 0x49f   : > { %1495 = vpow2.f32 %v795_v39  ;;  %v1486_v25 = vpop.eup %1485  ;;  %v853_v17 = vmul.f32 %v1484_v43, %v816_v51  ;;  %v874_v39 = vld [vmem:[%s2050_s23 + $0x28] sm:$0xff] }
 0x4a0   : > { %1497 = vpow2.f32 %v793_v42 }
 0x4a1   : > { %v1488_v58 = vpop.eup %1487  ;;  %v861_v26 = vmax.f32 %v853_v17, 1e-08 }
 0x4a2   : > { %v1490_v59 = vpop.eup %1489  ;;  %v841_v2 = vpop.permute.xlu1 %840 }
 0x4a3   : > { %v836_v3 = vpop.permute.xlu0 %835  ;;  %v854_v8 = vmul.f32 %v1490_v59, %v821_v50  ;;  %v858_v9 = vmul.f32 %v1488_v58, %v841_v2 }
 0x4a4   : > { %v857_v10 = vmul.f32 %v1486_v25, %v836_v3 }
 0x4a5   : > { %v1492_v11 = vpop.eup %1491  ;;  %v862_v18 = vmax.f32 %v854_v8, 1e-08  ;;  %v866_v12 = vmax.f32 %v858_v9, 1e-08 }
 0x4a6   : > { %v865_v13 = vmax.f32 %v857_v10, 1e-08  ;;  %v1494_v14 = vpop.eup %1493  ;;  %v831_v15 = vpop.permute.xlu1 %830 }
 0x4a7   : > { %v826_v16 = vpop.permute.xlu0 %825  ;;  %v856_v19 = vmul.f32 %v1492_v11, %v831_v15  ;;  %v877_v23 = vpack.c.bf16 %v862_v18, %v861_v26 }
 0x4a8   : > { %v855_v20 = vmul.f32 %v1494_v14, %v826_v16  ;;  %v879_v24 = vpack.c.bf16 %v866_v12, %v865_v13 }
 0x4a9   : > { %v1496_v27 = vpop.eup %1495  ;;  %v864_v40 = vmax.f32 %v856_v19, 1e-08  ;;  %1256 = vmatprep.mubr.msk.bf16.mxu0 %vm913_vm5, %v877_v23 }
 0x4aa   : > { %v863_v44 = vmax.f32 %v855_v20, 1e-08  ;;  %1260 = vmatprep.mubr.msk.bf16.mxu1 %vm913_vm5, %v879_v24  ;;  %v1498_v46 = vpop.eup %1497  ;;  %v851_v48 = vpop.permute.xlu1 %850 }
 0x4ab   : > { %v846_v52 = vpop.permute.xlu0 %845  ;;  %v860_v41 = vmul.f32 %v1496_v27, %v851_v48 }
 0x4ac   : > { %v878_v56 = vpack.c.bf16 %v864_v40, %v863_v44  ;;  %v859_v45 = vmul.f32 %v1498_v46, %v846_v52 }
 0x4ad   : > { %v868_v47 = vmax.f32 %v860_v41, 1e-08 }
 0x4ae   : > { %v867_v49 = vmax.f32 %v859_v45, 1e-08  ;;  %1257 = vmatmul.mubr.msk.bf16.vlgmr.msra.gmra.mrb[0].mxu0 %vm913_vm5, %v878_v56 }
 0x4b0   : > { %v880_v53 = vpack.c.bf16 %v868_v47, %v867_v49 }
 0x4b2   : > { %1261 = vmatmul.mubr.msk.bf16.vlgmr.msra.gmra.mrb[0].mxu1 %vm913_vm5, %v880_v53 }
 0x581   : > { %v1258_v54 = vpop.f32.mrb[0].mxu0 }
 0x582   : > { %v993_v60 = vmul.f32 0.25, %v1258_v54  ;;  %v960_v28 = vpop.f32.mrb[1].mxu0 }
 0x583   : > { %v991_v31 = vmul.f32 0.25, %v960_v28  ;;  %v1259_v61 = vpop.f32.mrb[2].mxu0 }
 0x584   : > { %v1001_v1 = vadd.f32 %v993_v60, %v871_v57  ;;  %v994_v32 = vmul.f32 0.25, %v1259_v61  ;;  %v963_v34 = vpop.f32.mrb[3].mxu0 }
 0x585   : > { %v999_v62 = vadd.f32 %v991_v31, %v869_v0  ;;  %v992_v4 = vmul.f32 0.25, %v963_v34  ;;  %v1262_v35 = vpop.f32.mrb[0].mxu1 }
 0x586   : > { %1009 = vst.msk [vmem:[%s2050_s23 + $0x10] sm:$0xff] %vm913_vm5, %v1001_v1  ;;  %v1002_v36 = vadd.f32 %v994_v32, %v872_v55  ;;  %v997_v37 = vmul.f32 0.25, %v1262_v35  ;;  %v976_v22 = vpop.f32.mrb[1].mxu1 }
 0x587   : > { %1007 = vst.msk [vmem:[%s2050_s23] sm:$0xff] %vm913_vm5, %v999_v62  ;;  %v1000_v21 = vadd.f32 %v992_v4, %v870_v33  ;;  %v995_v63 = vmul.f32 0.25, %v976_v22  ;;  %v1263_v7 = vpop.f32.mrb[2].mxu1 }
 0x588   : > { %1010 = vst.msk [vmem:[%s2050_s23 + $0x18] sm:$0xff] %vm913_vm5, %v1002_v36  ;;  %v1005_v30 = vadd.f32 %v997_v37, %v875_v6  ;;  %v998_v29 = vmul.f32 0.25, %v1263_v7  ;;  %v979_v42 = vpop.f32.mrb[3].mxu1 }
 0x589   : > { %1008 = vst.msk [vmem:[%s2050_s23 + $0x8] sm:$0xff] %vm913_vm5, %v1000_v21  ;;  %v1003_v43 = vadd.f32 %v995_v63, %v873_v38  ;;  %v996_v50 = vmul.f32 0.25, %v979_v42 }
 0x58a   : > { %1013 = vst.msk [vmem:[%s2050_s23 + $0x30] sm:$0xff] %vm913_vm5, %v1005_v30  ;;  %v1006_v51 = vadd.f32 %v998_v29, %v876_v5 }
 0x58b   : > { %1011 = vst.msk [vmem:[%s2050_s23 + $0x20] sm:$0xff] %vm913_vm5, %v1003_v43  ;;  %v1004_v25 = vadd.f32 %v996_v50, %v874_v39 }
 0x58c   : > { %1014 = vst.msk [vmem:[%s2050_s23 + $0x38] sm:$0xff] %vm913_vm5, %v1006_v51 }
 0x58d   : > { %1012 = vst.msk [vmem:[%s2050_s23 + $0x28] sm:$0xff] %vm913_vm5, %v1004_v25 }
 0x58e PF: > { %s1215_s18 = sshll.u32 %s1708_s19, 10  ;;  %s1031_s6 = sshll.u32 %s2050_s23, 4  ;;  %s2357_s6 = int_to_ptr.vmem [resolvable:$true] %s1031_s6 }
 0x58f   : > { %s2354_s30 = scalar_lea.hbm %s2423_s3, %s1215_s18  ;;  %s1016_s7 = scalar_lea.sflag [#allocation6], %s2026_s1 }
 0x590   : > { %s1589_s9 = scalar_lea.vmem %s2357_s6, 1024  ;;  %p2465_p8 = scmp.ne.s32.totalorder %s2441_s28, 0 }
 0x591   : > { %p1590_p1 = scmp.ne.s32.totalorder %s2357_s6, %s1589_s9  ;;  %s1734_s5 = smov [#allocation10]  }
 0x592   : > { %s1593_s29 = sshll.u32 %s1734_s5, 4  ;;  %s1594_s29 = int_to_ptr.vmem [resolvable:$false] %s1593_s29 }
 0x593   : > { %p1591_p12 = pnand %p1590_p1, %p2465_p8  ;;  %s1595_s19 = scalar_lea.vmem %s1594_s29, 2048 }
 0x594   : > { %p1596_p6 = scmp.lt.s32.totalorder %s2357_s6, %s1594_s29  ;;  %p1597_p4 = scmp.lt.s32.totalorder %s1595_s19, %s1589_s9 }
 0x595   : > { %p1592_p2 = pneg %p1591_p12 }
 0x596   : > { %p1598_p7 = por %p1597_p4, %p1596_p6 }
 0x598   : > { %p1599_p3 = pnand %p1598_p7, %p1592_p2 }
 0x59a   : > { %1602 = shalt.err (!%p1599_p3)
}
 0x59b   : > { %s1603_s15 = scalar_lea.hbm %s2354_s30, 1024  ;;  %s1607_s4 = scalar_lea.hbm %s2423_s3, 2048 }
 0x59c   : > { %p1604_p10 = scmp.ne.s32.totalorder %s2354_s30, %s1603_s15  ;;  %p1608_p5 = scmp.lt.u32.totalorder %s2354_s30, %s2423_s3 }
 0x59d   : > { %p1609_p0 = scmp.lt.u32.totalorder %s1607_s4, %s1603_s15  ;;  %p1611_p1 = scmp.lt.u32.totalorder %s1603_s15, %s2354_s30 }
 0x59e   : > { %p1605_p9 = pnand %p1604_p10, %p2465_p8 }
 0x59f   : > { %p1610_p11 = por %p1609_p0, %p1608_p5 }
 0x5a0   : > { %p1606_p13 = pneg %p1605_p9 }
 0x5a1   : > { %p1612_p12 = por %p1611_p1, %p1610_p11 }
 0x5a3   : > { %p1613_p2 = pnand %p1612_p12, %p1606_p13 }
 0x5a5   : > { %1616 = shalt.err (!%p1613_p2)
}
 0x5a6   : > { %s1735_s25 = smov 128   ;;  %s1736_s23 = smov 8  }
 0x5a7   : > { %1294 = dma.vmem_to_hbm [thread:$0]  (%p2465_p8), %s2357_s6, 1024, %s2354_s30, %s1016_s7, %s1735_s25, %s1735_s25, %s1736_s23  }
 0x5a8 PF: > { %s2466_s18 = sld [smem:[#allocation15_spill]]  ;;  %s2467_s27 = sld [smem:[#allocation16_spill]] }
 0x5a9   : > { %p1311_p6 = scmp.ge.s32.totalorder %s1720_s22, 2 }
 0x5ae   : > { %s1046_s24 = sand.u32 1, %s2466_s18   ;;  %p2468_p4 = scmp.ne.s32.totalorder %s2467_s27, 0 }
 0x5af   : > { %s1047_s9 = scalar_lea.sflag [#allocation6], %s1046_s24 }
 0x5b0   : > { %p1307_p7 = pnand %p1311_p6, %p2468_p4 }
 0x5b2   : > { %1674 = dma.done.wait (!%p1307_p7), %s1047_s9, 1024  }
 0x5b3   : > { %1676 = vsyncadd (!%p1307_p7), %s1047_s9, 4294966272  ;;  %s22_s22 = sadd.s32 1, %s1720_s22   ;;  %s2469_s28 = sld [smem:[#allocation17_spill]] }
 0x5b4   : > { %p19_p3 = scmp.ge.s32.totalorder %s22_s22, 6   ;;  %s2470_s1 = sld [smem:[#allocation18_spill]] }
 0x5b5   : > { %s2471_s12 = smov %s1684_s13  ;;  %s2472_s13 = smov %s1688_s14 }
 0x5b6   : > { %s2473_s14 = smov %s1979_s10  ;;  %s2474_s15 = smov %s1696_s16 }
 0x5b7   : > { %s2475_s16 = smov %s1700_s17  ;;  %s2476_s17 = smov %s1969_s8 }
 0x5b8   : > { %s2477_s18 = smov %s1712_s20  ;;  %s2478_s19 = smov %s1716_s21 }
 0x5b9   : > { %s2479_s20 = smov %s2469_s28  ;;  %21 = sbr.rel (!%p19_p3) target bundleno = 14 (0xe), region = 117 }
 0x5ba   : > { %s2480_s21 = smov %s2470_s1 }
 0x5c0   :  { %1052 = vsyncpa [#allocation5], 1 }
 0x5c1   :  { %1054 = vsyncpa [#allocation5 + $0x1], 1 }
 0x5c2   :  { %1055 = vsyncpa [#allocation8], 1 }
 0x5c3   :  { %1057 = vsyncpa [#allocation8 + $0x1], 1 }
 0x5c4   :  { %1058 = vsyncpa [#allocation6], 1 }
 0x5c5   :  { %1060 = vsyncpa [#allocation6 + $0x1], 1 }

// kernel: _lambda_.3
= control target key start
LH: loop header
LB: loop body
LE: loop exit
PB: predicated region body
PF: predicated region fallthrough
CT: control target
= control target key end

     0   :  { %s8858_s0 = inlined_call_operand.hbm [shape: f32[2,4,1152], index: 0, kind: input, shape index: {}]   ;;  %s8859_s1 = inlined_call_operand.hbm [shape: bf16[4,9,4,4], index: 1, kind: input, shape index: {}]   ;;  %s8860_s2 = inlined_call_operand.hbm [shape: f32[4,4,1], index: 2, kind: input, shape index: {}]   ;;  %s8861_s3 = inlined_call_operand.hbm [shape: bf16[9,4,4], index: 3, kind: input, shape index: {}]   ;;  %s8862_s4 = inlined_call_operand.hbm [shape: f32[4,1], index: 4, kind: input, shape index: {}]   ;;  %s8863_s5 = inlined_call_operand.hbm [shape: bf16[4,1,4], index: 5, kind: input, shape index: {}]   ;;  %s8864_s6 = inlined_call_operand.hbm [shape: f32[4,1,1], index: 6, kind: input, shape index: {}]   ;;  %s8865_s7 = inlined_call_operand.hbm [shape: f32[2,4,512], index: 7, kind: output, shape index: {}]  }
   0x1   :  { %8874 = sst [smem:[#allocation22_spill]] %s8859_s1 }
   0x2   :  { %12 = vsyncpa [#allocation3], 0 }
   0x3   :  { %14 = vsyncpa [#allocation3 + $0x1], 0 }
   0x4   :  { %15 = vsyncpa [#allocation6], 0 }
   0x5   :  { %16 = vsyncpa [#allocation9], 0 }
   0x6   :  { %17 = vsyncpa [#allocation12], 0 }
   0x7   :  { %18 = vsyncpa [#allocation4], 0 }
   0x8   :  { %20 = vsyncpa [#allocation4 + $0x1], 0  ;;  %s7393_s24 = smov 0   ;;  %s7395_s25 = smov 0  }
   0x9   :  { %s7397_s26 = smov 0   ;;  %s7399_s27 = smov 0  }
   0xa LB: > { %s7321_s28 = smov [#allocation5]   ;;  %s7414_s30 = sadd.s32 4294967295, %s7319_s27   ;;  %s7319_s27 = sphi %s7399_s27, %s8903_s27   ;;  %s7315_s26 = sphi %s7397_s26, %s8902_s26   ;;  %s7311_s25 = sphi %s7395_s25, %s8901_s25   ;;  %s7307_s24 = sphi %s7393_s24, %s8900_s24  }
   0xb   : > { %s221_s29 = sshll.u32 %s7321_s28, 4  ;;  %p6638_p0 = scmp.ge.s32.totalorder %s7319_s27, 1  ;;  %s7419_s29 = int_to_ptr.vmem [resolvable:$true] %s221_s29 }
   0xc   : > { %p8866_p1 = scmp.eq.s32.totalorder %s7414_s30, 0  ;;  %p209_p2 = scmp.lt.s32.totalorder %s7319_s27, 3 }
   0xd   : > { %s7322_s9 = smov [#allocation8]   ;;  %s7323_s12 = smov [#allocation11]  }
   0xe   : > { %p7421_p3 = pnand %p6638_p0, %p209_p2  ;;  %s247_s10 = sshll.u32 %s7322_s9, 4  ;;  %s7434_s10 = int_to_ptr.vmem [resolvable:$true] %s247_s10 }
   0xf   : > { %s271_s13 = sshll.u32 %s7323_s12, 4  ;;  %s8877_s1 = sld [smem:[#allocation22_spill]]  ;;  %s7436_s13 = int_to_ptr.vmem [resolvable:$true] %s271_s13 }
  0x10   : > { %s8875_s8 = scalar_select %p7421_p3, 1, 0 }
  0x11   : > { %p6888_p5 = pneg %p7421_p3 }
  0x13   : > { %p7430_p6 = pnand %p6888_p5, %p8866_p1 }
  0x15   : > { %s7043_s16 = scalar_lea.hbm %s8877_s1, 1152  ;;  %p7446_p8 = pneg %p7430_p6 }
  0x16   : > { %p7044_p7 = scmp.ne.s32.totalorder %s8877_s1, %s7043_s16  ;;  %p7050_p11 = scmp.lt.u32.totalorder %s7043_s16, %s8877_s1 }
  0x18   : > { %p7046_p9 = pnand %p7446_p8, %p7044_p7 }
  0x1a   : > { %p7047_p10 = pneg %p7046_p9 }
  0x1c   : > { %p7052_p12 = pnand %p7050_p11, %p7047_p10 }
  0x1e   : > { %7055 = shalt.err (!%p7052_p12)
}
  0x1f   : > { %s7056_s22 = scalar_lea.vmem %s7419_s29, 1152  ;;  %p7064_p5 = scmp.lt.s32.totalorder %s7419_s29, %s7419_s29 }
  0x20   : > { %p7057_p13 = scmp.ne.s32.totalorder %s7419_s29, %s7056_s22  ;;  %p7065_p4 = scmp.lt.s32.totalorder %s7056_s22, %s7056_s22 }
  0x22   : > { %p7059_p0 = pnand %p7057_p13, %p7446_p8  ;;  %p7066_p7 = por %p7065_p4, %p7064_p5 }
  0x24   : > { %p7060_p2 = pneg %p7059_p0 }
  0x26   : > { %p7067_p9 = pnand %p7066_p7, %p7060_p2 }
  0x28   : > { %7070 = shalt.err (!%p7067_p9)
}
  0x29   : > { %s7324_s23 = smov 32   ;;  %s7325_s28 = smov 2  }
  0x2a   : > { %6891 = dma.hbm_to_vmem [thread:$0]  (!%p7430_p6), %s8877_s1, 1152, %s7419_s29, [#allocation6], %s7324_s23, %s7324_s23, %s7325_s28  }
  0x2b   : > { %s7071_s16 = scalar_lea.hbm %s8861_s3, 288 }
  0x2c   : > { %p7072_p4 = scmp.ne.s32.totalorder %s8861_s3, %s7071_s16  ;;  %p7078_p12 = scmp.lt.u32.totalorder %s7071_s16, %s8861_s3 }
  0x2e   : > { %p7074_p10 = pnand %p7072_p4, %p7446_p8 }
  0x30   : > { %p7075_p11 = pneg %p7074_p10 }
  0x32   : > { %p7080_p13 = pnand %p7078_p12, %p7075_p11 }
  0x34   : > { %7083 = shalt.err (!%p7080_p13)
}
  0x35   : > { %s7084_s29 = scalar_lea.vmem %s7434_s10, 288  ;;  %p7092_p7 = scmp.lt.s32.totalorder %s7434_s10, %s7434_s10 }
  0x36   : > { %p7085_p0 = scmp.ne.s32.totalorder %s7434_s10, %s7084_s29  ;;  %p7093_p9 = scmp.lt.s32.totalorder %s7084_s29, %s7084_s29 }
  0x38   : > { %p7087_p2 = pnand %p7085_p0, %p7446_p8  ;;  %p7094_p4 = por %p7093_p9, %p7092_p7 }
  0x3a   : > { %p7088_p5 = pneg %p7087_p2 }
  0x3c   : > { %p7095_p10 = pnand %p7094_p4, %p7088_p5 }
  0x3e   : > { %7098 = shalt.err (!%p7095_p10)
}
  0x3f   : > { %6897 = dma.hbm_to_vmem [thread:$0]  (!%p7430_p6), %s8861_s3, 288, %s7434_s10, [#allocation9], %s7324_s23, %s7324_s23, %s7325_s28  }
  0x40   : > { %s7099_s15 = scalar_lea.hbm %s8863_s5, 64 }
  0x41   : > { %p7100_p11 = scmp.ne.s32.totalorder %s8863_s5, %s7099_s15  ;;  %p7106_p0 = scmp.lt.u32.totalorder %s7099_s15, %s8863_s5 }
  0x43   : > { %p7102_p12 = pnand %p7100_p11, %p7446_p8 }
  0x45   : > { %p7103_p13 = pneg %p7102_p12 }
  0x47   : > { %p7108_p2 = pnand %p7106_p0, %p7103_p13 }
  0x49   : > { %7111 = shalt.err (!%p7108_p2)
}
  0x4a   : > { %s7112_s10 = scalar_lea.vmem %s7436_s13, 64  ;;  %p7120_p4 = scmp.lt.s32.totalorder %s7436_s13, %s7436_s13 }
  0x4b   : > { %p7113_p5 = scmp.ne.s32.totalorder %s7436_s13, %s7112_s10  ;;  %p7121_p10 = scmp.lt.s32.totalorder %s7112_s10, %s7112_s10 }
  0x4d   : > { %p7115_p7 = pnand %p7113_p5, %p7446_p8  ;;  %p7122_p11 = por %p7121_p10, %p7120_p4 }
  0x4f   : > { %p7116_p9 = pneg %p7115_p7 }
  0x51   : > { %p7123_p12 = pnand %p7122_p11, %p7116_p9 }
  0x53   : > { %7126 = shalt.err (!%p7123_p12)
}
  0x54   : > { %s8868_s23 = smov 16   ;;  %s7327_s28 = smov 1  }
  0x55   : > { %6903 = dma.hbm_to_vmem [thread:$0]  (!%p7430_p6), %s8863_s5, 64, %s7436_s13, [#allocation12], %s8868_s23, %s8868_s23, %s7327_s28  }
  0x56   : > { %s7328_s22 = smov [#allocation7]   ;;  %s7127_s15 = scalar_lea.hbm %s8860_s2, 256 }
  0x57   : > { %s234_s9 = sshll.u32 %s7328_s22, 4  ;;  %p7128_p13 = scmp.ne.s32.totalorder %s8860_s2, %s7127_s15  ;;  %s235_s9 = int_to_ptr.vmem [resolvable:$true] %s234_s9 }
  0x58   : > { %p7134_p5 = scmp.lt.u32.totalorder %s7127_s15, %s8860_s2 }
  0x59   : > { %p7130_p0 = pnand %p7128_p13, %p7446_p8 }
  0x5b   : > { %p7131_p2 = pneg %p7130_p0 }
  0x5d   : > { %p7136_p7 = pnand %p7134_p5, %p7131_p2 }
  0x5f   : > { %7139 = shalt.err (!%p7136_p7)
}
  0x60   : > { %s7140_s13 = scalar_lea.vmem %s235_s9, 256  ;;  %p7148_p11 = scmp.lt.s32.totalorder %s235_s9, %s235_s9 }
  0x61   : > { %p7141_p9 = scmp.ne.s32.totalorder %s235_s9, %s7140_s13  ;;  %p7149_p12 = scmp.lt.s32.totalorder %s7140_s13, %s7140_s13 }
  0x63   : > { %p7143_p4 = pnand %p7141_p9, %p7446_p8  ;;  %p7150_p1 = por %p7149_p12, %p7148_p11 }
  0x65   : > { %p7144_p10 = pneg %p7143_p4 }
  0x67   : > { %p7151_p3 = pnand %p7150_p1, %p7144_p10 }
  0x69   : > { %7154 = shalt.err (!%p7151_p3)
}
  0x6a   : > { %s7329_s10 = smov 64   ;;  %s7330_s21 = smov 4  }
  0x6b   : > { %6894 = dma.hbm_to_vmem [thread:$0]  (!%p7430_p6), %s8860_s2, 256, %s235_s9, [#allocation6], %s7329_s10, %s7329_s10, %s7330_s21  }
  0x6c   : > { %s7331_s12 = smov [#allocation10]   ;;  %s7332_s15 = smov [#allocation13]  }
  0x6d   : > { %s261_s14 = sshll.u32 %s7331_s12, 4  ;;  %s284_s16 = sshll.u32 %s7332_s15, 4  ;;  %s262_s14 = int_to_ptr.vmem [resolvable:$true] %s261_s14  ;;  %s7534_s16 = int_to_ptr.vmem [resolvable:$true] %s284_s16 }
  0x6e   : > { %s7155_s20 = scalar_lea.hbm %s8862_s4, 64 }
  0x6f   : > { %p7156_p1 = scmp.ne.s32.totalorder %s8862_s4, %s7155_s20  ;;  %p7162_p0 = scmp.lt.u32.totalorder %s7155_s20, %s8862_s4 }
  0x71   : > { %p7158_p3 = pnand %p7156_p1, %p7446_p8 }
  0x73   : > { %p7159_p13 = pneg %p7158_p3 }
  0x75   : > { %p7164_p2 = pnand %p7162_p0, %p7159_p13 }
  0x77   : > { %7167 = shalt.err (!%p7164_p2)
}
  0x78   : > { %s7168_s10 = scalar_lea.vmem %s262_s14, 64  ;;  %p7176_p4 = scmp.lt.s32.totalorder %s262_s14, %s262_s14 }
  0x79   : > { %p7169_p5 = scmp.ne.s32.totalorder %s262_s14, %s7168_s10  ;;  %p7177_p10 = scmp.lt.s32.totalorder %s7168_s10, %s7168_s10 }
  0x7b   : > { %p7171_p7 = pnand %p7169_p5, %p7446_p8  ;;  %p7178_p11 = por %p7177_p10, %p7176_p4 }
  0x7d   : > { %p7172_p9 = pneg %p7171_p7 }
  0x7f   : > { %p7179_p12 = pnand %p7178_p11, %p7172_p9 }
  0x81   : > { %7182 = shalt.err (!%p7179_p12)
}
  0x82   : > { %6900 = dma.hbm_to_vmem [thread:$0]  (!%p7430_p6), %s8862_s4, 64, %s262_s14, [#allocation9]  }
  0x83   : > { %s7183_s15 = scalar_lea.hbm %s8864_s6, 64 }
  0x84   : > { %p7184_p1 = scmp.ne.s32.totalorder %s8864_s6, %s7183_s15  ;;  %p7190_p0 = scmp.lt.u32.totalorder %s7183_s15, %s8864_s6 }
  0x86   : > { %p7186_p3 = pnand %p7184_p1, %p7446_p8 }
  0x88   : > { %p7187_p13 = pneg %p7186_p3 }
  0x8a   : > { %p7192_p2 = pnand %p7190_p0, %p7187_p13 }
  0x8c   : > { %7195 = shalt.err (!%p7192_p2)
}
  0x8d   : > { %s7196_s14 = scalar_lea.vmem %s7534_s16, 64  ;;  %p7204_p4 = scmp.lt.s32.totalorder %s7534_s16, %s7534_s16 }
  0x8e   : > { %p7197_p5 = scmp.ne.s32.totalorder %s7534_s16, %s7196_s14  ;;  %p7205_p10 = scmp.lt.s32.totalorder %s7196_s14, %s7196_s14 }
  0x90   : > { %p7199_p7 = pnand %p7197_p5, %p7446_p8  ;;  %p7206_p11 = por %p7205_p10, %p7204_p4 }
  0x92   : > { %p7200_p9 = pneg %p7199_p7 }
  0x94   : > { %p7207_p12 = pnand %p7206_p11, %p7200_p9 }
  0x96   : > { %7210 = shalt.err (!%p7207_p12)
}
  0x97   : > { %s8879_s29 = smov 16   ;;  %s6637_s11 = sadd.s32 4294967294, %s7319_s27  }
  0x98   : > { %6906 = dma.hbm_to_vmem [thread:$0]  (!%p7430_p6), %s8864_s6, 64, %s7534_s16, [#allocation12], %s8879_s29, %s8879_s29, %s7327_s28  }
  0x99   : > { %s7582_s19 = sadd.s32 1, %s7319_s27   ;;  %s33_s21 = sadd.s32 1, %s7315_s26 }
  0x9a   : > { %s30_s23 = ssub.s32 %s7319_s27, %s7582_s19  ;;  %p40_p1 = scmp.ne.s32.totalorder %s7315_s26, %s7311_s25 }
  0x9b   : > { %p31_p8 = scmp.eq.s32.totalorder %s30_s23, 0  ;;  %p41_p3 = scmp.eq.s32.totalorder %s7319_s27, 0 }
  0x9c   : > { %p46_p13 = scmp.ne.s32.totalorder %s7311_s25, %s7307_s24  ;;  %p8880_p2 = scmp.eq.s32.totalorder %s7414_s30, 0 }
  0x9d   : > { %s7593_s22 = scalar_select %p31_p8, %s7315_s26, %s33_s21  }
  0x9e   : > { %p42_p0 = por %p41_p3, %p40_p1  ;;  %p7597_p5 = por %p8880_p2, %p46_p13 }
  0x9f   : > { %p196_p6 = scmp.eq.s32.totalorder %s7414_s30, 1  ;;  %p202_p7 = scmp.eq.s32.totalorder %s6637_s11, 1 }
  0xa0   : > { %p6921_p9 = scmp.lt.s32.totalorder %s7319_s27, 2  ;;  %s298_s28 = sand.u32 1, %s7315_s26  }
  0xa1   : > { %p7604_p4 = por %p196_p6, %p40_p1  ;;  %p7608_p10 = por %p202_p7, %p46_p13 }
  0xa2   : > { %s6857_s17 = smul.u32 36, %s298_s28  ;;  %p7613_p11 = pnand %p6921_p9, %p42_p0 }
  0xa3   : > { %s8882_s16 = scalar_select %p7604_p4, 1, 0 }
  0xa4   : > { %s8883_s15 = scalar_select %p7608_p10, 1, 0 }
  0xa5   : > { %s6858_s18 = smul.u32 576, %s7319_s27  ;;  %s302_s9 = scalar_lea.vmem [#allocation2], %s6857_s17 }
  0xa6   : > { %s310_s10 = sshll.u32 %s302_s9, 4  ;;  %s299_s11 = scalar_lea.sflag [#allocation3], %s298_s28  ;;  %s7622_s10 = int_to_ptr.vmem [resolvable:$true] %s310_s10 }
  0xa7   : > { %s7620_s29 = scalar_lea.hbm %s8858_s0, %s6858_s18  ;;  %p7213_p8 = pneg %p7613_p11 }
  0xa8   : > { %s7211_s23 = scalar_lea.hbm %s7620_s29, 576  ;;  %s7216_s13 = scalar_lea.hbm %s8858_s0, 1152 }
  0xa9   : > { %p7212_p12 = scmp.ne.s32.totalorder %s7620_s29, %s7211_s23  ;;  %p7217_p13 = scmp.lt.u32.totalorder %s7620_s29, %s8858_s0 }
  0xaa   : > { %p7218_p0 = scmp.lt.u32.totalorder %s7216_s13, %s7211_s23  ;;  %p7220_p6 = scmp.lt.u32.totalorder %s7211_s23, %s7620_s29 }
  0xab   : > { %p7214_p1 = pnand %p7213_p8, %p7212_p12 }
  0xac   : > { %p7219_p2 = por %p7218_p0, %p7217_p13 }
  0xad   : > { %p7215_p3 = pneg %p7214_p1 }
  0xae   : > { %p7221_p7 = por %p7220_p6, %p7219_p2 }
  0xb0   : > { %p7222_p9 = pnand %p7221_p7, %p7215_p3 }
  0xb2   : > { %7225 = shalt.err (!%p7222_p9)
}
  0xb3   : > { %s7226_s28 = scalar_lea.vmem %s7622_s10, 576  ;;  %s7333_s17 = smov [#allocation2]  }
  0xb4   : > { %p7227_p12 = scmp.ne.s32.totalorder %s7622_s10, %s7226_s28  ;;  %s7231_s9 = sshll.u32 %s7333_s17, 4  ;;  %s7232_s9 = int_to_ptr.vmem [resolvable:$false] %s7231_s9 }
  0xb5   : > { %s7233_s1 = scalar_lea.vmem %s7232_s9, 1152  ;;  %p7234_p4 = scmp.lt.s32.totalorder %s7622_s10, %s7232_s9 }
  0xb6   : > { %p7229_p1 = pnand %p7227_p12, %p7213_p8  ;;  %p7235_p13 = scmp.lt.s32.totalorder %s7233_s1, %s7226_s28 }
  0xb8   : > { %p7230_p10 = pneg %p7229_p1  ;;  %p7236_p0 = por %p7235_p13, %p7234_p4 }
  0xba   : > { %p7237_p2 = pnand %p7236_p0, %p7230_p10 }
  0xbc   : > { %7240 = shalt.err (!%p7237_p2)
}
  0xbd   : > { %6910 = dma.hbm_to_vmem [thread:$0]  (!%p7613_p11), %s7620_s29, 576, %s7622_s10, %s299_s11  }
  0xbe   : > { %p8885_p3 = scmp.ne.s32.totalorder %s8875_s8, 0 }
  0xc0   : > { %319 = sbr.rel (%p8885_p3) target bundleno = 1267 (0x4f3), region = 48 }
  0xc7   : > { %s7652_s23 = sand.u32 1, %s7311_s25  }
  0xc8   : > { %s6859_s21 = smul.u32 36, %s7652_s23  ;;  %s322_s18 = scalar_lea.sflag [#allocation3], %s7652_s23 }
  0xca   : > { %s7656_s13 = scalar_lea.vmem [#allocation2], %s6859_s21 }
  0xcb   : > { %7286 = dma.done.wait (%p7597_p5), %s322_s18, 576  }
  0xcc   : > { %7288 = vsyncadd (%p7597_p5), %s322_s18, 4294966720  ;;  %p8886_p4 = scmp.eq.s32.totalorder %s7414_s30, 0 }
  0xce   : > { %7290 = dma.done.wait (%p8886_p4), [#allocation6], 1408   ;;  %p8887_p10 = pmov %p8886_p4 }
  0xcf   : > { %p8888_p11 = pmov %p8886_p4 }
  0xd0   : > { %7292 = vsyncadd (%p8887_p10), [#allocation6], 4294965888 }
  0xd1   : > { %7294 = dma.done.wait (%p8888_p11), [#allocation9], 352   ;;  %p8889_p8 = pmov %p8886_p4 }
  0xd2   : > { %p8890_p6 = pmov %p8886_p4 }
  0xd3   : > { %7296 = vsyncadd (%p8889_p8), [#allocation9], 4294966944 }
  0xd4   : > { %7298 = dma.done.wait (%p8890_p6), [#allocation12], 128   ;;  %p8891_p7 = pmov %p8886_p4 }
  0xd5   : > { %v383_v0 = vld [vmem:[%s7656_s13 + $0xc] sm:$0xff]  ;;  %v382_v1 = vld [vmem:[%s7656_s13 + $0x4] sm:$0xff]  ;;  %v384_v2 = vld [vmem:[%s7656_s13 + $0x14] sm:$0xf]  ;;  %s7334_s8 = smov 24   ;;  %s7335_s12 = smov 25  }
  0xd6   : > { %7300 = vsyncadd (%p8891_p7), [#allocation12], 4294967168  ;;  %v7677_v3 = vpack.c.bf16 %v383_v0, %v383_v0  ;;  %v7679_v4 = vpack.c.bf16 %v382_v1, %v382_v1  ;;  %v387_v5 = vcombine.high %v382_v1, %v382_v1  ;;  %v395_v6 = vpack.c.bf16 %v384_v2, %v384_v2  ;;  %s7337_s20 = smov 23   ;;  %v768_v11 = vld [vmem:[%s7656_s13 + $0x8] sm:$0xff]  ;;  %v633_v12 = vld [vmem:[%s7656_s13 + $0x14] sm:$0xf] }
  0xd7   : > { %v388_v7 = vcombine.high %v383_v0, %v383_v0  ;;  %v8870_v9 = vmov 0   ;;  %v7703_v13 = vpack.c.bf16 %v768_v11, %v768_v11  ;;  %v644_v14 = vpack.c.bf16 %v633_v12, %v633_v12  ;;  %v769_v16 = vld [vmem:[%s7656_s13 + $0x10] sm:$0xff]  ;;  %s7338_s29 = smov 121   ;;  %v770_v20 = vld [vmem:[%s7656_s13 + $0x18] sm:$0xf]  ;;  %s7339_s10 = smov 120  }
  0xd8   : > { %407 = vrot.lane.b32.xlu1 %v7677_v3, %s7334_s8  ;;  %403 = vrot.lane.b32.xlu0 %v7679_v4, %s7334_s8  ;;  %v7684_v8 = vpack.c.bf16 %v387_v5, %v387_v5  ;;  %v773_v15 = vcombine.high %v768_v11, %v768_v11  ;;  %v7707_v17 = vpack.c.bf16 %v769_v16, %v769_v16  ;;  %v907_v23 = vld [vmem:[%s7656_s13 + $0x18] sm:$0xf]  ;;  %s7340_s11 = smov 119   ;;  %s7341_s14 = smov 89   ;;  %v1606_v33 = vld [vmem:[%s7656_s13 + $0x14] sm:$0xf] }
  0xd9   : > { %467 = vmatprep.mubr.bf16.mxu0 %v8870_v9  ;;  %508 = vmatprep.mubr.bf16.mxu1 %v8870_v9  ;;  %v7692_v10 = vpack.c.bf16 %v388_v7, %v388_v7  ;;  %v774_v19 = vcombine.high %v769_v16, %v769_v16  ;;  %v781_v21 = vpack.c.bf16 %v770_v20, %v770_v20  ;;  %v1044_v25 = vld [vmem:[%s7656_s13 + $0x18] sm:$0xf]  ;;  %s7342_s28 = smov 88   ;;  %s7343_s17 = smov 87   ;;  %v1853_v35 = vld [vmem:[%s7656_s13 + $0x14] sm:$0xf] }
  0xda   : > { %6991 = vset.pattern.permute.xlu0 %v8870_v9  ;;  %6992 = vset.pattern.permute.xlu1 %v8870_v9  ;;  %v7709_v18 = vpack.c.bf16 %v773_v15, %v773_v15  ;;  %v918_v24 = vpack.c.bf16 %v907_v23, %v907_v23  ;;  %v1055_v26 = vpack.c.bf16 %v1044_v25, %v1044_v25  ;;  %v1181_v27 = vld [vmem:[%s7656_s13 + $0x18] sm:$0xf]  ;;  %s7344_s9 = smov 56   ;;  %s7345_s1 = smov 58   ;;  %vm413_vm0 = vcmask 195584  }
  0xdb   : > { %v7714_v22 = vpack.c.bf16 %v774_v19, %v774_v19  ;;  %v1192_v28 = vpack.c.bf16 %v1181_v27, %v1181_v27  ;;  %v1318_v29 = vld [vmem:[%s7656_s13 + $0x18] sm:$0xf]  ;;  %v1617_v34 = vpack.c.bf16 %v1606_v33, %v1606_v33  ;;  %s7346_s21 = smov 54   ;;  %v1864_v36 = vpack.c.bf16 %v1853_v35, %v1853_v35  ;;  %s7347_s18 = smov 122   ;;  %v397_v53 = vld [vmem:[#allocation5 + $0x2] sm:$0x3] }
  0xdc   : > { %517 = vrot.lane.b32.xlu1 %v7679_v4, %s7335_s12  ;;  %411 = vrot.lane.b32.xlu0 %v395_v6, %s7334_s8  ;;  %v1329_v30 = vpack.c.bf16 %v1318_v29, %v1318_v29  ;;  %v1455_v31 = vld [vmem:[%s7656_s13 + $0x18] sm:$0xf]  ;;  %vm422_vm1 = vcmask 1041408   ;;  %vm527_vm2 = vcmask 203776   ;;  %vm418_vm3 = vcmask 31744   ;;  %p8897_p9 = scmp.ne.s32.totalorder %s8882_s16, 0 }
  0xdd   : > { %v1466_v32 = vpack.c.bf16 %v1455_v31, %v1455_v31  ;;  %v1990_v43 = vld [vmem:[%s7656_s13 + $0x18] sm:$0xf]  ;;  %vm660_vm4 = vcmask 187392   ;;  %v381_v2 = vld [vmem:[#allocation5] sm:$0x3]  ;;  %vm797_vm5 = vcmask 990208  }
  0xde   : > { %v2001_v47 = vpack.c.bf16 %v1990_v43, %v1990_v43  ;;  %v2218_v57 = vld [vmem:[%s7656_s13 + $0x18] sm:$0xf]  ;;  %v767_v35 = vld [vmem:[#allocation5 + $0x6] sm:$0x3]  ;;  %vm934_vm6 = vcmask 982016   ;;  %vm1071_vm7 = vcmask 973824  }
  0xdf   : > { %v2229_v63 = vpack.c.bf16 %v2218_v57, %v2218_v57  ;;  %v2355_v19 = vld [vmem:[%s7656_s13 + $0x18] sm:$0xf]  ;;  %vm1208_vm8 = vcmask 728064   ;;  %vm1345_vm9 = vcmask 719872   ;;  %vm1482_vm10 = vcmask 711680  }
  0xe0   : > { %521 = vrot.lane.b32.xlu1 %v7677_v3, %s7335_s12  ;;  %405 = vrot.lane.b32.xlu0 %v7684_v8, %s7334_s8  ;;  %vm1635_vm11 = vcmask 457728   ;;  %vm1747_vm12 = vcmask 474112   ;;  %vm1880_vm13 = vcmask 441344   ;;  %vm2017_vm14 = vcmask 998400  }
  0xe1   : > { %vm2245_vm15 = vcmask 965632  }
  0xe4   : > { %409 = vrot.lane.b32.xlu1 %v7692_v10, %s7334_s8  ;;  %519 = vrot.lane.b32.xlu0 %v7684_v8, %s7335_s12  ;;  %s7348_s8 = smov 118  }
  0xe8   : > { %525 = vrot.lane.b32.xlu1 %v395_v6, %s7335_s12  ;;  %523 = vrot.lane.b32.xlu0 %v7692_v10, %s7335_s12  ;;  %s7349_s12 = smov 124  }
  0xec   : > { %652 = vrot.lane.b32.xlu1 %v7684_v8, %s7337_s20  ;;  %650 = vrot.lane.b32.xlu0 %v7679_v4, %s7337_s20 }
  0xf0   : > { %656 = vrot.lane.b32.xlu1 %v7692_v10, %s7337_s20  ;;  %654 = vrot.lane.b32.xlu0 %v7677_v3, %s7337_s20 }
  0xf4   : > { %787 = vrot.lane.b32.xlu1 %v7703_v13, %s7338_s29  ;;  %658 = vrot.lane.b32.xlu0 %v644_v14, %s7337_s20  ;;  %s7350_s20 = smov 116  }
  0xf8   : > { %791 = vrot.lane.b32.xlu1 %v7707_v17, %s7338_s29  ;;  %789 = vrot.lane.b32.xlu0 %v7709_v18, %s7338_s29 }
  0xfc   : > { %795 = vrot.lane.b32.xlu1 %v781_v21, %s7338_s29  ;;  %793 = vrot.lane.b32.xlu0 %v7714_v22, %s7338_s29  ;;  %v630_v21 = vld [vmem:[#allocation5 + $0x4] sm:$0x3]  ;;  %s7351_s29 = smov 112  }
 0x100   : > { %926 = vrot.lane.b32.xlu1 %v7709_v18, %s7339_s10  ;;  %924 = vrot.lane.b32.xlu0 %v7703_v13, %s7339_s10 }
 0x104   : > { %930 = vrot.lane.b32.xlu1 %v7714_v22, %s7339_s10  ;;  %928 = vrot.lane.b32.xlu0 %v7707_v17, %s7339_s10 }
 0x108   : > { %1061 = vrot.lane.b32.xlu1 %v7703_v13, %s7340_s11  ;;  %932 = vrot.lane.b32.xlu0 %v918_v24, %s7339_s10  ;;  %v2366_v24 = vpack.c.bf16 %v2355_v19, %v2355_v19 }
 0x10c   : > { %1065 = vrot.lane.b32.xlu1 %v7707_v17, %s7340_s11  ;;  %1063 = vrot.lane.b32.xlu0 %v7709_v18, %s7340_s11 }
 0x110   : > { %1069 = vrot.lane.b32.xlu1 %v1055_v26, %s7340_s11  ;;  %1067 = vrot.lane.b32.xlu0 %v7714_v22, %s7340_s11  ;;  %s6856_s11 = sshll.u32 %s7414_s30, 8  ;;  %s7352_s30 = smov [#allocation14]  }
 0x114   : > { %1200 = vrot.lane.b32.xlu1 %v7709_v18, %s7341_s14  ;;  %1198 = vrot.lane.b32.xlu0 %v7703_v13, %s7341_s14 }
 0x118   : > { %1204 = vrot.lane.b32.xlu1 %v7714_v22, %s7341_s14  ;;  %1202 = vrot.lane.b32.xlu0 %v7707_v17, %s7341_s14 }
 0x11c   : > { %1335 = vrot.lane.b32.xlu1 %v7703_v13, %s7342_s28  ;;  %1206 = vrot.lane.b32.xlu0 %v1192_v28, %s7341_s14 }
 0x120   : > { %1339 = vrot.lane.b32.xlu1 %v7707_v17, %s7342_s28  ;;  %1337 = vrot.lane.b32.xlu0 %v7709_v18, %s7342_s28 }
 0x124   : > { %1343 = vrot.lane.b32.xlu1 %v1329_v30, %s7342_s28  ;;  %1341 = vrot.lane.b32.xlu0 %v7714_v22, %s7342_s28  ;;  %v2491_v30 = vld [vmem:[%s7656_s13 + $0x18] sm:$0xf] }
 0x128   : > { %1474 = vrot.lane.b32.xlu1 %v7709_v18, %s7343_s17  ;;  %1472 = vrot.lane.b32.xlu0 %v7703_v13, %s7343_s17 }
 0x12c   : > { %1478 = vrot.lane.b32.xlu1 %v7714_v22, %s7343_s17  ;;  %1476 = vrot.lane.b32.xlu0 %v7707_v17, %s7343_s17 }
 0x130   : > { %1625 = vrot.lane.b32.xlu1 %v7679_v4, %s7344_s9  ;;  %1480 = vrot.lane.b32.xlu0 %v1466_v32, %s7343_s17 }
 0x134   : > { %1629 = vrot.lane.b32.xlu1 %v7677_v3, %s7344_s9  ;;  %1627 = vrot.lane.b32.xlu0 %v7684_v8, %s7344_s9 }
 0x138   : > { %1633 = vrot.lane.b32.xlu1 %v1617_v34, %s7344_s9  ;;  %1631 = vrot.lane.b32.xlu0 %v7692_v10, %s7344_s9 }
 0x13c   : > { %1739 = vrot.lane.b32.xlu1 %v7684_v8, %s7345_s1  ;;  %1737 = vrot.lane.b32.xlu0 %v7679_v4, %s7345_s1 }
 0x140   : > { %1743 = vrot.lane.b32.xlu1 %v7692_v10, %s7345_s1  ;;  %1741 = vrot.lane.b32.xlu0 %v7677_v3, %s7345_s1 }
 0x144   : > { %1870 = vrot.lane.b32.xlu1 %v7679_v4, %s7346_s21  ;;  %1745 = vrot.lane.b32.xlu0 %v1617_v34, %s7345_s1 }
 0x148   : > { %1874 = vrot.lane.b32.xlu1 %v7677_v3, %s7346_s21  ;;  %1872 = vrot.lane.b32.xlu0 %v7684_v8, %s7346_s21 }
 0x14a   : > { %v408_v37 = vpop.permute.xlu1 %407  ;;  %v404_v38 = vpop.permute.xlu0 %403 }
 0x14c   : > { %1878 = vrot.lane.b32.xlu1 %v1864_v36, %s7346_s21  ;;  %1876 = vrot.lane.b32.xlu0 %v7692_v10, %s7346_s21 }
 0x14e   : > { %v518_v39 = vpop.permute.xlu1 %517  ;;  %v412_v40 = vpop.permute.xlu0 %411 }
 0x150   : > { %2009 = vrot.lane.b32.xlu1 %v7709_v18, %s7347_s18  ;;  %2007 = vrot.lane.b32.xlu0 %v7703_v13, %s7347_s18 }
 0x152   : > { %v522_v41 = vpop.permute.xlu1 %521  ;;  %v406_v42 = vpop.permute.xlu0 %405 }
 0x153   : > { %v7780_v44 = vsel %vm413_vm0, %v406_v42, %v408_v37  ;;  %v414_v45 = vsel %vm413_vm0, %v404_v38, %v406_v42 }
 0x154   : > { %2013 = vrot.lane.b32.xlu1 %v7714_v22, %s7347_s18  ;;  %2011 = vrot.lane.b32.xlu0 %v7707_v17, %s7347_s18  ;;  %v7786_v46 = vsel %vm422_vm1, %v414_v45, 0 }
 0x155   : > { %6655 = vmatprep.subr.msk.bf16.mxu0 %vm422_vm1, %v7780_v44 }
 0x156   : > { %436 = vmatpush1.bf16.msra.mxu0 %v7786_v46  ;;  %v410_v48 = vpop.permute.xlu1 %409  ;;  %v520_v49 = vpop.permute.xlu0 %519 }
 0x157   : > { %v528_v50 = vsel %vm527_vm2, %v518_v39, %v520_v49  ;;  %v7793_v51 = vsel %vm413_vm0, %v410_v48, %v412_v40  ;;  %v7796_v52 = vsel %vm527_vm2, %v520_v49, %v522_v41  ;;  %v416_v54 = vsel %vm413_vm0, %v408_v37, %v410_v48 }
 0x158   : > { %2235 = vrot.lane.b32.xlu1 %v7703_v13, %s7348_s8  ;;  %6657 = vmatprep.subr.msk.bf16.mxu1 %vm422_vm1, %v7793_v51  ;;  %v7803_v55 = vsel %vm422_vm1, %v416_v54, 0  ;;  %v7806_v56 = vsel %vm422_vm1, %v528_v50, 0  ;;  %v2502_v37 = vpack.c.bf16 %v2491_v30, %v2491_v30  ;;  %vm2918_vm0 = vcmask 1014784  }
 0x159   : > { %2015 = vrot.lane.b32.xlu0 %v2001_v47, %s7347_s18  ;;  %6659 = vmatprep.subr.msk.bf16.mxu0 %vm422_vm1, %v7796_v52  ;;  %v904_v47 = vld [vmem:[#allocation5 + $0x8] sm:$0x3]  ;;  %s7245_s18 = sshll.u32 %s7352_s30, 4  ;;  %s7246_s18 = int_to_ptr.vmem [resolvable:$false] %s7245_s18 }
 0x15a   : > { %6656 = vmatmul.mubr.msk.bf16.vlgmr.msra.gmra.mrb[0].mxu0 %vm418_vm3, %v397_v53  ;;  %477 = vmatpush1.bf16.msra.mxu1 %v7803_v55  ;;  %v526_v58 = vpop.permute.xlu1 %525  ;;  %v524_v59 = vpop.permute.xlu0 %523 }
 0x15b   : > { %548 = vmatpush1.bf16.msra.mxu0 %v7806_v56  ;;  %v530_v60 = vsel %vm527_vm2, %v522_v41, %v524_v59  ;;  %v7816_v61 = vsel %vm527_vm2, %v524_v59, %v526_v58  ;;  %579 = vmatprep.mubr.bf16.mxu0 %v8870_v9  ;;  %vm3051_vm2 = vcmask 949248  }
 0x15c   : > { %2239 = vrot.lane.b32.xlu1 %v7707_v17, %s7348_s8  ;;  %6661 = vmatprep.subr.msk.bf16.mxu1 %vm422_vm1, %v7816_v61  ;;  %v7823_v62 = vsel %vm422_vm1, %v530_v60, 0 }
 0x15d   : > { %2237 = vrot.lane.b32.xlu0 %v7709_v18, %s7348_s8  ;;  %6658 = vmatmul.mubr.msk.bf16.vlgmr.msra.gmra.mrb[0].mxu1 %vm418_vm3, %v397_v53  ;;  %v2627_v53 = vld [vmem:[%s7656_s13 + $0x18] sm:$0xf] }
 0x15e   : > { %589 = vmatpush1.bf16.msra.mxu1 %v7823_v62  ;;  %v653_v0 = vpop.permute.xlu1 %652  ;;  %v651_v1 = vpop.permute.xlu0 %650  ;;  %620 = vmatprep.mubr.bf16.mxu1 %v8870_v9  ;;  %v2638_v58 = vpack.c.bf16 %v2627_v53, %v2627_v53 }
 0x15f   : > { %v661_v5 = vsel %vm660_vm4, %v651_v1, %v653_v0 }
 0x160   : > { %2243 = vrot.lane.b32.xlu1 %v2229_v63, %s7348_s8  ;;  %v7837_v12 = vsel %vm422_vm1, %v661_v5, 0 }
 0x161   : > { %2241 = vrot.lane.b32.xlu0 %v7714_v22, %s7348_s8  ;;  %s7247_s8 = scalar_lea.vmem %s7246_s18, 512 }
 0x162   : > { %v657_v6 = vpop.permute.xlu1 %656  ;;  %v655_v7 = vpop.permute.xlu0 %654  ;;  %6660 = vmatmul.mubr.msk.bf16.vlgmr.msra.gmra.mrb[4].mxu0 %vm418_vm3, %v381_v2 }
 0x163   : > { %v7833_v11 = vsel %vm660_vm4, %v653_v0, %v655_v7  ;;  %712 = vmatprep.mubr.bf16.mxu0 %v8870_v9  ;;  %v663_v14 = vsel %vm660_vm4, %v655_v7, %v657_v6  ;;  %v1041_v7 = vld [vmem:[#allocation5 + $0xa] sm:$0x3] }
 0x164   : > { %2374 = vrot.lane.b32.xlu1 %v7709_v18, %s7345_s1  ;;  %6663 = vmatprep.subr.msk.bf16.mxu0 %vm422_vm1, %v7833_v11  ;;  %v7858_v23 = vsel %vm422_vm1, %v663_v14, 0 }
 0x165   : > { %2372 = vrot.lane.b32.xlu0 %v7703_v13, %s7345_s1  ;;  %681 = vmatpush1.bf16.msra.mxu0 %v7837_v12 }
 0x166   : > { %v788_v15 = vpop.permute.xlu1 %787  ;;  %v659_v16 = vpop.permute.xlu0 %658  ;;  %6662 = vmatmul.mubr.msk.bf16.vlgmr.msra.gmra.mrb[4].mxu1 %vm418_vm3, %v381_v2  ;;  %v2778_v2 = vld [vmem:[%s7656_s13 + $0x14] sm:$0xf] }
 0x167   : > { %v7850_v20 = vsel %vm660_vm4, %v657_v6, %v659_v16  ;;  %753 = vmatprep.mubr.bf16.mxu1 %v8870_v9  ;;  %v2789_v19 = vpack.c.bf16 %v2778_v2, %v2778_v2  ;;  %vm4205_vm4 = vcmask 916480  }
 0x168   : > { %2378 = vrot.lane.b32.xlu1 %v7714_v22, %s7345_s1  ;;  %6665 = vmatprep.subr.msk.bf16.mxu1 %vm422_vm1, %v7850_v20 }
 0x169   : > { %2376 = vrot.lane.b32.xlu0 %v7707_v17, %s7345_s1  ;;  %722 = vmatpush1.bf16.msra.mxu1 %v7858_v23 }
 0x16a   : > { %v792_v25 = vpop.permute.xlu1 %791  ;;  %v790_v26 = vpop.permute.xlu0 %789  ;;  %6664 = vmatmul.mubr.msk.bf16.vlgmr.msra.gmra.mrb[8].mxu0 %vm418_vm3, %v630_v21 }
 0x16b   : > { %v798_v27 = vsel %vm797_vm5, %v788_v15, %v790_v26  ;;  %v7866_v28 = vsel %vm797_vm5, %v790_v26, %v792_v25  ;;  %849 = vmatprep.mubr.bf16.mxu0 %v8870_v9 }
 0x16c   : > { %2508 = vrot.lane.b32.xlu1 %v7703_v13, %s7344_s9  ;;  %6667 = vmatprep.subr.msk.bf16.mxu0 %vm422_vm1, %v7866_v28  ;;  %v7874_v29 = vsel %vm422_vm1, %v798_v27, 0 }
 0x16d   : > { %2380 = vrot.lane.b32.xlu0 %v2366_v24, %s7345_s1  ;;  %818 = vmatpush1.bf16.msra.mxu0 %v7874_v29  ;;  %s6496_s1 = scalar_lea.sflag [#allocation4], %s7652_s23 }
 0x16e   : > { %v796_v31 = vpop.permute.xlu1 %795  ;;  %v794_v32 = vpop.permute.xlu0 %793  ;;  %6666 = vmatmul.mubr.msk.bf16.vlgmr.msra.gmra.mrb[8].mxu1 %vm418_vm3, %v630_v21 }
 0x16f   : > { %v800_v33 = vsel %vm797_vm5, %v792_v25, %v794_v32  ;;  %v7882_v34 = vsel %vm797_vm5, %v794_v32, %v796_v31  ;;  %890 = vmatprep.mubr.bf16.mxu1 %v8870_v9  ;;  %v1178_v32 = vld [vmem:[#allocation5 + $0xc] sm:$0x3] }
 0x170   : > { %2512 = vrot.lane.b32.xlu1 %v7707_v17, %s7344_s9  ;;  %6669 = vmatprep.subr.msk.bf16.mxu1 %vm422_vm1, %v7882_v34  ;;  %v7890_v36 = vsel %vm422_vm1, %v800_v33, 0 }
 0x171   : > { %2510 = vrot.lane.b32.xlu0 %v7709_v18, %s7344_s9  ;;  %859 = vmatpush1.bf16.msra.mxu1 %v7890_v36 }
 0x172   : > { %v927_v38 = vpop.permute.xlu1 %926  ;;  %v925_v39 = vpop.permute.xlu0 %924  ;;  %6668 = vmatmul.mubr.msk.bf16.vlgmr.msra.gmra.mrb[12].mxu0 %vm418_vm3, %v767_v35 }
 0x173   : > { %986 = vmatprep.mubr.bf16.mxu0 %v8870_v9  ;;  %v935_v40 = vsel %vm934_vm6, %v925_v39, %v927_v38 }
 0x174   : > { %2516 = vrot.lane.b32.xlu1 %v2502_v37, %s7344_s9  ;;  %v7907_v45 = vsel %vm422_vm1, %v935_v40, 0 }
 0x175   : > { %2514 = vrot.lane.b32.xlu0 %v7714_v22, %s7344_s9  ;;  %s8814_s9 = scalar_lea.hbm %s8865_s7, %s6856_s11 }
 0x176   : > { %v931_v41 = vpop.permute.xlu1 %930  ;;  %v929_v42 = vpop.permute.xlu0 %928  ;;  %6670 = vmatmul.mubr.msk.bf16.vlgmr.msra.gmra.mrb[12].mxu1 %vm418_vm3, %v767_v35 }
 0x177   : > { %v7903_v43 = vsel %vm934_vm6, %v927_v38, %v929_v42  ;;  %1027 = vmatprep.mubr.bf16.mxu1 %v8870_v9  ;;  %v937_v48 = vsel %vm934_vm6, %v929_v42, %v931_v41 }
 0x178   : > { %2646 = vrot.lane.b32.xlu1 %v7709_v18, %s7346_s21  ;;  %6671 = vmatprep.subr.msk.bf16.mxu0 %vm422_vm1, %v7903_v43  ;;  %v7925_v57 = vsel %vm422_vm1, %v937_v48, 0 }
 0x179   : > { %2644 = vrot.lane.b32.xlu0 %v7703_v13, %s7346_s21  ;;  %955 = vmatpush1.bf16.msra.mxu0 %v7907_v45 }
 0x17a   : > { %v1062_v49 = vpop.permute.xlu1 %1061  ;;  %v933_v50 = vpop.permute.xlu0 %932 }
 0x17b   : > { %v7919_v54 = vsel %vm934_vm6, %v931_v41, %v933_v50 }
 0x17c   : > { %2650 = vrot.lane.b32.xlu1 %v7714_v22, %s7346_s21  ;;  %6672 = vmatmul.mubr.msk.bf16.vlgmr.msra.gmra.mrb[16].mxu0 %vm418_vm3, %v904_v47 }
 0x17d   : > { %2648 = vrot.lane.b32.xlu0 %v7707_v17, %s7346_s21  ;;  %6673 = vmatprep.subr.msk.bf16.mxu1 %vm422_vm1, %v7919_v54 }
 0x17e   : > { %996 = vmatpush1.bf16.msra.mxu1 %v7925_v57  ;;  %v1066_v59 = vpop.permute.xlu1 %1065  ;;  %v1064_v60 = vpop.permute.xlu0 %1063  ;;  %1123 = vmatprep.mubr.bf16.mxu0 %v8870_v9 }
 0x17f   : > { %v1072_v63 = vsel %vm1071_vm7, %v1062_v49, %v1064_v60  ;;  %v7935_v0 = vsel %vm1071_vm7, %v1064_v60, %v1066_v59  ;;  %v3024_v49 = vld [vmem:[%s7656_s13 + $0x14] sm:$0xf] }
 0x180   : > { %2797 = vrot.lane.b32.xlu1 %v7679_v4, %s7339_s10  ;;  %6675 = vmatprep.subr.msk.bf16.mxu0 %vm422_vm1, %v7935_v0  ;;  %v7942_v1 = vsel %vm422_vm1, %v1072_v63, 0  ;;  %v3035_v63 = vpack.c.bf16 %v3024_v49, %v3024_v49  ;;  %v3522_v49 = vld [vmem:[%s7656_s13 + $0xc] sm:$0xff] }
 0x181   : > { %2652 = vrot.lane.b32.xlu0 %v2638_v58, %s7346_s21  ;;  %6674 = vmatmul.mubr.msk.bf16.vlgmr.msra.gmra.mrb[16].mxu1 %vm418_vm3, %v904_v47  ;;  %v1315_v58 = vld [vmem:[#allocation5 + $0xe] sm:$0x3] }
 0x182   : > { %1092 = vmatpush1.bf16.msra.mxu0 %v7942_v1  ;;  %v1070_v5 = vpop.permute.xlu1 %1069  ;;  %v1068_v6 = vpop.permute.xlu0 %1067  ;;  %1164 = vmatprep.mubr.bf16.mxu1 %v8870_v9 }
 0x183   : > { %v1074_v14 = vsel %vm1071_vm7, %v1066_v59, %v1068_v6  ;;  %v7951_v15 = vsel %vm1071_vm7, %v1068_v6, %v1070_v5 }
 0x184   : > { %2801 = vrot.lane.b32.xlu1 %v7677_v3, %s7339_s10  ;;  %6677 = vmatprep.subr.msk.bf16.mxu1 %vm422_vm1, %v7951_v15  ;;  %v7958_v16 = vsel %vm422_vm1, %v1074_v14, 0 }
 0x185   : > { %2799 = vrot.lane.b32.xlu0 %v7684_v8, %s7339_s10  ;;  %6676 = vmatmul.mubr.msk.bf16.vlgmr.msra.gmra.mrb[20].mxu0 %vm418_vm3, %v1041_v7 }
 0x186   : > { %1133 = vmatpush1.bf16.msra.mxu1 %v7958_v16  ;;  %v1201_v21 = vpop.permute.xlu1 %1200  ;;  %v1199_v24 = vpop.permute.xlu0 %1198  ;;  %1260 = vmatprep.mubr.bf16.mxu0 %v8870_v9 }
 0x187   : > { %v1209_v25 = vsel %vm1208_vm8, %v1199_v24, %v1201_v21 }
 0x188   : > { %2805 = vrot.lane.b32.xlu1 %v2789_v19, %s7339_s10  ;;  %v7975_v31 = vsel %vm422_vm1, %v1209_v25, 0  ;;  %v3161_v25 = vld [vmem:[%s7656_s13 + $0x18] sm:$0xf] }
 0x189   : > { %2803 = vrot.lane.b32.xlu0 %v7692_v10, %s7339_s10  ;;  %6678 = vmatmul.mubr.msk.bf16.vlgmr.msra.gmra.mrb[20].mxu1 %vm418_vm3, %v1041_v7 }
 0x18a   : > { %v1205_v26 = vpop.permute.xlu1 %1204  ;;  %v1203_v27 = vpop.permute.xlu0 %1202  ;;  %1301 = vmatprep.mubr.bf16.mxu1 %v8870_v9 }
 0x18b   : > { %v7972_v30 = vsel %vm1208_vm8, %v1201_v21, %v1203_v27  ;;  %v1211_v33 = vsel %vm1208_vm8, %v1203_v27, %v1205_v26 }
 0x18c   : > { %2910 = vrot.lane.b32.xlu1 %v7684_v8, %s7349_s12  ;;  %6679 = vmatprep.subr.msk.bf16.mxu0 %vm422_vm1, %v7972_v30  ;;  %v7996_v39 = vsel %vm422_vm1, %v1211_v33, 0 }
 0x18d   : > { %2908 = vrot.lane.b32.xlu0 %v7679_v4, %s7349_s12  ;;  %1229 = vmatpush1.bf16.msra.mxu0 %v7975_v31 }
 0x18e   : > { %v1336_v35 = vpop.permute.xlu1 %1335  ;;  %v1207_v37 = vpop.permute.xlu0 %1206 }
 0x18f   : > { %v7986_v38 = vsel %vm1208_vm8, %v1205_v26, %v1207_v37 }
 0x190   : > { %2914 = vrot.lane.b32.xlu1 %v7692_v10, %s7349_s12  ;;  %6680 = vmatmul.mubr.msk.bf16.vlgmr.msra.gmra.mrb[24].mxu0 %vm418_vm3, %v1178_v32 }
 0x191   : > { %2912 = vrot.lane.b32.xlu0 %v7677_v3, %s7349_s12  ;;  %6681 = vmatprep.subr.msk.bf16.mxu1 %vm422_vm1, %v7986_v38 }
 0x192   : > { %1270 = vmatpush1.bf16.msra.mxu1 %v7996_v39  ;;  %v1340_v40 = vpop.permute.xlu1 %1339  ;;  %v1338_v41 = vpop.permute.xlu0 %1337  ;;  %1397 = vmatprep.mubr.bf16.mxu0 %v8870_v9 }
 0x193   : > { %v1346_v42 = vsel %vm1345_vm9, %v1336_v35, %v1338_v41  ;;  %v8002_v47 = vsel %vm1345_vm9, %v1338_v41, %v1340_v40 }
 0x194   : > { %3041 = vrot.lane.b32.xlu1 %v7679_v4, %s7350_s20  ;;  %6683 = vmatprep.subr.msk.bf16.mxu0 %vm422_vm1, %v8002_v47  ;;  %v8009_v48 = vsel %vm422_vm1, %v1346_v42, 0  ;;  %v3388_v42 = vld [vmem:[%s7656_s13 + $0x18] sm:$0xf] }
 0x195   : > { %2916 = vrot.lane.b32.xlu0 %v2789_v19, %s7349_s12  ;;  %6682 = vmatmul.mubr.msk.bf16.vlgmr.msra.gmra.mrb[24].mxu1 %vm418_vm3, %v1178_v32  ;;  %v3172_v32 = vpack.c.bf16 %v3161_v25, %v3161_v25 }
 0x196   : > { %1366 = vmatpush1.bf16.msra.mxu0 %v8009_v48  ;;  %v1344_v50 = vpop.permute.xlu1 %1343  ;;  %v1342_v53 = vpop.permute.xlu0 %1341  ;;  %1438 = vmatprep.mubr.bf16.mxu1 %v8870_v9 }
 0x197   : > { %v1348_v4 = vsel %vm1345_vm9, %v1340_v40, %v1342_v53  ;;  %v8018_v59 = vsel %vm1345_vm9, %v1342_v53, %v1344_v50 }
 0x198   : > { %3045 = vrot.lane.b32.xlu1 %v7677_v3, %s7350_s20  ;;  %6685 = vmatprep.subr.msk.bf16.mxu1 %vm422_vm1, %v8018_v59  ;;  %v8025_v60 = vsel %vm422_vm1, %v1348_v4, 0  ;;  %v1619_v4 = vld [vmem:[#allocation5 + $0x14] sm:$0x3] }
 0x199   : > { %3043 = vrot.lane.b32.xlu0 %v7684_v8, %s7350_s20  ;;  %6684 = vmatmul.mubr.msk.bf16.vlgmr.msra.gmra.mrb[28].mxu0 %vm418_vm3, %v1315_v58 }
 0x19a   : > { %1407 = vmatpush1.bf16.msra.mxu1 %v8025_v60  ;;  %v1475_v2 = vpop.permute.xlu1 %1474  ;;  %v1473_v5 = vpop.permute.xlu0 %1472  ;;  %1534 = vmatprep.mubr.bf16.mxu0 %v8870_v9 }
 0x19b   : > { %v1483_v3 = vsel %vm1482_vm10, %v1473_v5, %v1475_v2  ;;  %v3527_v5 = vcombine.high %v3522_v49, %v3522_v49 }
 0x19c   : > { %3049 = vrot.lane.b32.xlu1 %v3035_v63, %s7350_s20  ;;  %v8042_v14 = vsel %vm422_vm1, %v1483_v3, 0  ;;  %v3523_v3 = vld [vmem:[%s7656_s13 + $0x14] sm:$0xff] }
 0x19d   : > { %3047 = vrot.lane.b32.xlu0 %v7692_v10, %s7350_s20  ;;  %6686 = vmatmul.mubr.msk.bf16.vlgmr.msra.gmra.mrb[28].mxu1 %vm418_vm3, %v1315_v58  ;;  %8892 = vst [vmem:[#allocation20_spill] sm:$0xff] %v8042_v14  ;;  %v1452_v10 = vld [vmem:[#allocation5 + $0x10] sm:$0x3] }
 0x19e   : > { %v1479_v8 = vpop.permute.xlu1 %1478  ;;  %v1477_v6 = vpop.permute.xlu0 %1476  ;;  %1575 = vmatprep.mubr.bf16.mxu1 %v8870_v9 }
 0x19f   : > { %v8039_v7 = vsel %vm1482_vm10, %v1475_v2, %v1477_v6  ;;  %v1485_v19 = vsel %vm1482_vm10, %v1477_v6, %v1479_v8  ;;  %v3399_v2 = vpack.c.bf16 %v3388_v42, %v3388_v42  ;;  %v3524_v42 = vld [vmem:[%s7656_s13 + $0x1c] sm:$0xf] }
 0x1a0   : > { %3180 = vrot.lane.b32.xlu1 %v7709_v18, %s7349_s12  ;;  %6687 = vmatprep.subr.msk.bf16.mxu0 %vm422_vm1, %v8039_v7  ;;  %v8064_v27 = vsel %vm422_vm1, %v1485_v19, 0 }
 0x1a1   : > { %3178 = vrot.lane.b32.xlu0 %v7703_v13, %s7349_s12  ;;  %1503 = vmatpush1.bf16.msra.mxu0 %v8042_v14  ;;  %8893 = vst [vmem:[#allocation21_spill] sm:$0xff] %v8064_v27 }
 0x1a2   : > { %v1626_v21 = vpop.permute.xlu1 %1625  ;;  %v1481_v24 = vpop.permute.xlu0 %1480 }
 0x1a3   : > { %v8054_v26 = vsel %vm1482_vm10, %v1479_v8, %v1481_v24 }
 0x1a4   : > { %3184 = vrot.lane.b32.xlu1 %v7714_v22, %s7349_s12  ;;  %6688 = vmatmul.mubr.msk.bf16.vlgmr.msra.gmra.mrb[32].mxu0 %vm418_vm3, %v1452_v10 }
 0x1a5   : > { %3182 = vrot.lane.b32.xlu0 %v7707_v17, %s7349_s12  ;;  %6689 = vmatprep.subr.msk.bf16.mxu1 %vm422_vm1, %v8054_v26 }
 0x1a6   : > { %1544 = vmatpush1.bf16.msra.mxu1 %v8064_v27  ;;  %v1630_v33 = vpop.permute.xlu1 %1629  ;;  %v1628_v35 = vpop.permute.xlu0 %1627  ;;  %1687 = vmatprep.mubr.bf16.mxu0 %v8870_v9 }
 0x1a7   : > { %v1636_v37 = vsel %vm1635_vm11, %v1626_v21, %v1628_v35  ;;  %v1637_v40 = vsel %vm1635_vm11, %v1628_v35, %v1630_v33 }
 0x1a8   : > { %3405 = vrot.lane.b32.xlu1 %v7703_v13, %s7350_s20  ;;  %6691 = vmatprep.subr.msk.bf16.mxu0 %vm422_vm1, %v1637_v40  ;;  %v1644_v41 = vsel %vm422_vm1, %v1636_v37, 0 }
 0x1a9   : > { %3186 = vrot.lane.b32.xlu0 %v3172_v32, %s7349_s12  ;;  %6690 = vmatmul.mubr.msk.bf16.vlgmr.msra.gmra.mrb[32].mxu1 %vm418_vm3, %v1452_v10  ;;  %v3528_v10 = vcombine.high %v3523_v3, %v3523_v3 }
 0x1aa   : > { %1656 = vmatpush1.bf16.msra.mxu0 %v1644_v41  ;;  %v1634_v50 = vpop.permute.xlu1 %1633  ;;  %v1632_v53 = vpop.permute.xlu0 %1631  ;;  %1728 = vmatprep.mubr.bf16.mxu1 %v8870_v9  ;;  %v1603_v41 = vld [vmem:[#allocation5 + $0x12] sm:$0x3] }
 0x1ab   : > { %v1638_v58 = vsel %vm1635_vm11, %v1630_v33, %v1632_v53  ;;  %v1639_v13 = vsel %vm1635_vm11, %v1632_v53, %v1634_v50  ;;  %v8105_v33 = vpack.c.bf16 %v3528_v10, %v3528_v10  ;;  %v3535_v53 = vpack.c.bf16 %v3524_v42, %v3524_v42 }
 0x1ac   : > { %3409 = vrot.lane.b32.xlu1 %v7707_v17, %s7350_s20  ;;  %6693 = vmatprep.subr.msk.bf16.mxu1 %vm422_vm1, %v1639_v13  ;;  %v1650_v63 = vsel %vm422_vm1, %v1638_v58, 0  ;;  %v8091_v17 = vpack.c.bf16 %v3527_v5, %v3527_v5  ;;  %v3660_v5 = vld [vmem:[%s7656_s13 + $0x1c] sm:$0xf] }
 0x1ad   : > { %3407 = vrot.lane.b32.xlu0 %v7709_v18, %s7350_s20  ;;  %1697 = vmatpush1.bf16.msra.mxu1 %v1650_v63  ;;  %v8096_v18 = vpack.c.bf16 %v3522_v49, %v3522_v49 }
 0x1ae   : > { %v1740_v8 = vpop.permute.xlu1 %1739  ;;  %v1738_v6 = vpop.permute.xlu0 %1737  ;;  %6692 = vmatmul.mubr.msk.bf16.vlgmr.msra.gmra.mrb[36].mxu0 %vm418_vm3, %v1619_v4 }
 0x1af   : > { %1799 = vmatprep.mubr.bf16.mxu0 %v8870_v9  ;;  %v1748_v19 = vsel %vm1747_vm12, %v1738_v6, %v1740_v8  ;;  %v1850_v6 = vld [vmem:[#allocation5 + $0x16] sm:$0x3] }
 0x1b0   : > { %3413 = vrot.lane.b32.xlu1 %v3399_v2, %s7350_s20  ;;  %v1756_v32 = vsel %vm422_vm1, %v1748_v19, 0 }
 0x1b1   : > { %3411 = vrot.lane.b32.xlu0 %v7714_v22, %s7350_s20  ;;  %6694 = vmatmul.mubr.msk.bf16.vlgmr.msra.gmra.mrb[36].mxu1 %vm418_vm3, %v1619_v4  ;;  %v8109_v22 = vpack.c.bf16 %v3523_v3, %v3523_v3 }
 0x1b2   : > { %v1744_v21 = vpop.permute.xlu1 %1743  ;;  %v1742_v24 = vpop.permute.xlu0 %1741  ;;  %1840 = vmatprep.mubr.bf16.mxu1 %v8870_v9 }
 0x1b3   : > { %v1749_v25 = vsel %vm1747_vm12, %v1740_v8, %v1742_v24  ;;  %v1750_v35 = vsel %vm1747_vm12, %v1742_v24, %v1744_v21  ;;  %v3671_v24 = vpack.c.bf16 %v3660_v5, %v3660_v5  ;;  %v3946_v5 = vld [vmem:[%s7656_s13 + $0x8] sm:$0xff] }
 0x1b4   : > { %3543 = vrot.lane.b32.xlu1 %v8091_v17, %s7349_s12  ;;  %6695 = vmatprep.subr.msk.bf16.mxu0 %vm422_vm1, %v1749_v25  ;;  %v1762_v50 = vsel %vm422_vm1, %v1750_v35, 0 }
 0x1b5   : > { %3541 = vrot.lane.b32.xlu0 %v8096_v18, %s7349_s12  ;;  %1768 = vmatpush1.bf16.msra.mxu0 %v1756_v32 }
 0x1b6   : > { %v1871_v37 = vpop.permute.xlu1 %1870  ;;  %v1746_v40 = vpop.permute.xlu0 %1745 }
 0x1b7   : > { %v1751_v49 = vsel %vm1747_vm12, %v1744_v21, %v1746_v40 }
 0x1b8   : > { %3547 = vrot.lane.b32.xlu1 %v8105_v33, %s7349_s12  ;;  %6697 = vmatprep.subr.msk.bf16.mxu1 %vm422_vm1, %v1751_v49  ;;  %v1987_v49 = vld [vmem:[#allocation5 + $0x18] sm:$0x3] }
 0x1b9   : > { %3545 = vrot.lane.b32.xlu0 %v8109_v22, %s7349_s12  ;;  %6696 = vmatmul.mubr.msk.bf16.vlgmr.msra.gmra.mrb[40].mxu0 %vm418_vm3, %v1603_v41 }
 0x1ba   : > { %1809 = vmatpush1.bf16.msra.mxu1 %v1762_v50  ;;  %v1875_v58 = vpop.permute.xlu1 %1874  ;;  %v1873_v13 = vpop.permute.xlu0 %1872  ;;  %1932 = vmatprep.mubr.bf16.mxu0 %v8870_v9  ;;  %v3945_v50 = vld [vmem:[%s7656_s13] sm:$0xff] }
 0x1bb   : > { %v1881_v4 = vsel %vm1880_vm13, %v1871_v37, %v1873_v13  ;;  %v1882_v63 = vsel %vm1880_vm13, %v1873_v13, %v1875_v58  ;;  %v3796_v13 = vld [vmem:[%s7656_s13 + $0x1c] sm:$0xf] }
 0x1bc   : > { %3677 = vrot.lane.b32.xlu1 %v8096_v18, %s7339_s10  ;;  %6699 = vmatprep.subr.msk.bf16.mxu0 %vm422_vm1, %v1882_v63  ;;  %v1889_v2 = vsel %vm422_vm1, %v1881_v4, 0 }
 0x1bd   : > { %3549 = vrot.lane.b32.xlu0 %v3535_v53, %s7349_s12  ;;  %6698 = vmatmul.mubr.msk.bf16.vlgmr.msra.gmra.mrb[40].mxu1 %vm418_vm3, %v1603_v41 }
 0x1be   : > { %1901 = vmatpush1.bf16.msra.mxu0 %v1889_v2  ;;  %v1879_v3 = vpop.permute.xlu1 %1878  ;;  %v1877_v8 = vpop.permute.xlu0 %1876  ;;  %1973 = vmatprep.mubr.bf16.mxu1 %v8870_v9  ;;  %v3807_v2 = vpack.c.bf16 %v3796_v13, %v3796_v13  ;;  %v2215_v13 = vld [vmem:[#allocation5 + $0x1c] sm:$0x3] }
 0x1bf   : > { %v1883_v10 = vsel %vm1880_vm13, %v1875_v58, %v1877_v8  ;;  %v1884_v19 = vsel %vm1880_vm13, %v1877_v8, %v1879_v3  ;;  %v3949_v3 = vcombine.high %v3945_v50, %v3945_v50 }
 0x1c0   : > { %3681 = vrot.lane.b32.xlu1 %v8109_v22, %s7339_s10  ;;  %6701 = vmatprep.subr.msk.bf16.mxu1 %vm422_vm1, %v1884_v19  ;;  %v1895_v21 = vsel %vm422_vm1, %v1883_v10, 0 }
 0x1c1   : > { %3679 = vrot.lane.b32.xlu0 %v8091_v17, %s7339_s10  ;;  %6700 = vmatmul.mubr.msk.bf16.vlgmr.msra.gmra.mrb[44].mxu0 %vm418_vm3, %v1850_v6  ;;  %v8183_v19 = vpack.c.bf16 %v3949_v3, %v3949_v3 }
 0x1c2   : > { %1942 = vmatpush1.bf16.msra.mxu1 %v1895_v21  ;;  %v2010_v25 = vpop.permute.xlu1 %2009  ;;  %v2008_v32 = vpop.permute.xlu0 %2007  ;;  %2069 = vmatprep.mubr.bf16.mxu0 %v8870_v9  ;;  %v2124_v21 = vld [vmem:[#allocation5 + $0x1a] sm:$0x3] }
 0x1c3   : > { %v2018_v35 = vsel %vm2017_vm14, %v2008_v32, %v2010_v25 }
 0x1c4   : > { %3685 = vrot.lane.b32.xlu1 %v3671_v24, %s7339_s10  ;;  %v2026_v42 = vsel %vm422_vm1, %v2018_v35, 0  ;;  %v3959_v24 = vld [vmem:[%s7656_s13 + $0x10] sm:$0xf] }
 0x1c5   : > { %3683 = vrot.lane.b32.xlu0 %v8105_v33, %s7339_s10  ;;  %6702 = vmatmul.mubr.msk.bf16.vlgmr.msra.gmra.mrb[44].mxu1 %vm418_vm3, %v1850_v6 }
 0x1c6   : > { %v2014_v37 = vpop.permute.xlu1 %2013  ;;  %v2012_v40 = vpop.permute.xlu0 %2011  ;;  %2110 = vmatprep.mubr.bf16.mxu1 %v8870_v9 }
 0x1c7   : > { %v2019_v41 = vsel %vm2017_vm14, %v2010_v25, %v2012_v40  ;;  %v2020_v53 = vsel %vm2017_vm14, %v2012_v40, %v2014_v37  ;;  %v3950_v25 = vcombine.high %v3946_v5, %v3946_v5 }
 0x1c8   : > { %3815 = vrot.lane.b32.xlu1 %v8091_v17, %s7350_s20  ;;  %6703 = vmatprep.subr.msk.bf16.mxu0 %vm422_vm1, %v2019_v41  ;;  %v8164_v17 = vpack.c.bf16 %v3945_v50, %v3945_v50  ;;  %v3960_v41 = vpack.c.bf16 %v3959_v24, %v3959_v24  ;;  %v2352_v24 = vld [vmem:[#allocation5 + $0x1e] sm:$0x3] }
 0x1c9   : > { %3813 = vrot.lane.b32.xlu0 %v8096_v18, %s7350_s20  ;;  %2038 = vmatpush1.bf16.msra.mxu0 %v2026_v42  ;;  %v2032_v18 = vsel %vm422_vm1, %v2020_v53, 0  ;;  %v8196_v42 = vpack.c.bf16 %v3950_v25, %v3950_v25 }
 0x1ca   : > { %v2236_v58 = vpop.permute.xlu1 %2235  ;;  %6707 = vmatprep.subr.msk.bf16.mxu0 %vm422_vm1, %v7903_v43 }
 0x1cb   : > { %v2016_v4 = vpop.permute.xlu0 %2015 }
 0x1cc   : > { %v2021_v63 = vsel %vm2017_vm14, %v2014_v37, %v2016_v4  ;;  %3819 = vrot.lane.b32.xlu1 %v8105_v33, %s7350_s20  ;;  %6704 = vmatmul.mubr.msk.bf16.vlgmr.msra.gmra.mrb[48].mxu0 %vm418_vm3, %v1987_v49 }
 0x1cd   : > { %3817 = vrot.lane.b32.xlu0 %v8109_v22, %s7350_s20  ;;  %6705 = vmatprep.subr.msk.bf16.mxu1 %vm422_vm1, %v2021_v63  ;;  %v8178_v22 = vpack.c.bf16 %v3946_v5, %v3946_v5 }
 0x1ce   : > { %2079 = vmatpush1.bf16.msra.mxu1 %v2032_v18  ;;  %2129 = vmatpush1.bf16.msra.mxu0 %v7907_v45  ;;  %v2240_v33 = vpop.permute.xlu1 %2239 }
 0x1cf   : > { %v2238_v8 = vpop.permute.xlu0 %2237  ;;  %6709 = vmatprep.subr.msk.bf16.mxu1 %vm422_vm1, %v7919_v54  ;;  %2160 = vmatprep.mubr.bf16.mxu0 %v8870_v9 }
 0x1d0   : > { %v2247_v6 = vsel %vm2245_vm15, %v2238_v8, %v2240_v33  ;;  %3966 = vrot.lane.b32.xlu1 %v8164_v17, %s7339_s10  ;;  %v2246_v10 = vsel %vm2245_vm15, %v2236_v58, %v2238_v8 }
 0x1d1   : > { %3821 = vrot.lane.b32.xlu0 %v3807_v2, %s7350_s20  ;;  %6706 = vmatmul.mubr.msk.bf16.vlgmr.msra.gmra.mrb[48].mxu1 %vm418_vm3, %v1987_v49  ;;  %v2254_v37 = vsel %vm422_vm1, %v2246_v10, 0 }
 0x1d2   : > { %6711 = vmatprep.subr.msk.bf16.mxu0 %vm422_vm1, %v2247_v6  ;;  %2170 = vmatpush1.bf16.msra.mxu1 %v7925_v57  ;;  %v2244_v32 = vpop.permute.xlu1 %2243 }
 0x1d3   : > { %v2242_v35 = vpop.permute.xlu0 %2241  ;;  %2201 = vmatprep.mubr.bf16.mxu1 %v8870_v9 }
 0x1d4   : > { %v2249_v40 = vsel %vm2245_vm15, %v2242_v35, %v2244_v32  ;;  %3970 = vrot.lane.b32.xlu1 %v8178_v22, %s7339_s10  ;;  %6708 = vmatmul.mubr.msk.bf16.vlgmr.msra.gmra.mrb[52].mxu0 %vm418_vm3, %v2124_v21  ;;  %v2248_v49 = vsel %vm2245_vm15, %v2240_v33, %v2242_v35  ;;  %v4178_v33 = vld [vmem:[%s7656_s13 + $0x10] sm:$0xf] }
 0x1d5   : > { %3968 = vrot.lane.b32.xlu0 %v8183_v19, %s7339_s10  ;;  %2266 = vmatpush1.bf16.msra.mxu0 %v2254_v37  ;;  %v2260_v58 = vsel %vm422_vm1, %v2248_v49, 0  ;;  %v4520_v35 = vld [vmem:[%s7656_s13 + $0x10] sm:$0xff] }
 0x1d6   : > { %6713 = vmatprep.subr.msk.bf16.mxu1 %vm422_vm1, %v2249_v40  ;;  %v2375_v50 = vpop.permute.xlu1 %2374  ;;  %2297 = vmatprep.mubr.bf16.mxu0 %v8870_v9 }
 0x1d7   : > { %v2373_v53 = vpop.permute.xlu0 %2372 }
 0x1d8   : > { %3974 = vrot.lane.b32.xlu1 %v3960_v41, %s7339_s10  ;;  %v2382_v4 = vsel %vm1747_vm12, %v2373_v53, %v2375_v50  ;;  %v4521_v53 = vld [vmem:[%s7656_s13 + $0x18] sm:$0xf] }
 0x1d9   : > { %3972 = vrot.lane.b32.xlu0 %v8196_v42, %s7339_s10  ;;  %6710 = vmatmul.mubr.msk.bf16.vlgmr.msra.gmra.mrb[52].mxu1 %vm418_vm3, %v2124_v21  ;;  %v2390_v5 = vsel %vm422_vm1, %v2382_v4, 0  ;;  %v4189_v21 = vpack.c.bf16 %v4178_v33, %v4178_v33  ;;  %v2488_v33 = vld [vmem:[#allocation5 + $0x20] sm:$0x3] }
 0x1da   : > { %2307 = vmatpush1.bf16.msra.mxu1 %v2260_v58  ;;  %v2379_v63 = vpop.permute.xlu1 %2378  ;;  %2338 = vmatprep.mubr.bf16.mxu1 %v8870_v9 }
 0x1db   : > { %v2377_v18 = vpop.permute.xlu0 %2376 }
 0x1dc   : > { %v2383_v2 = vsel %vm1747_vm12, %v2375_v50, %v2377_v18  ;;  %6712 = vmatmul.mubr.msk.bf16.vlgmr.msra.gmra.mrb[56].mxu0 %vm418_vm3, %v2215_v13  ;;  %4197 = vrot.lane.b32.xlu1 %v8183_v19, %s7351_s29  ;;  %v2384_v8 = vsel %vm1747_vm12, %v2377_v18, %v2379_v63  ;;  %v4525_v50 = vcombine.high %v4520_v35, %v4520_v35 }
 0x1dd   : > { %4195 = vrot.lane.b32.xlu0 %v8164_v17, %s7351_s29  ;;  %6715 = vmatprep.subr.msk.bf16.mxu0 %vm422_vm1, %v2383_v2  ;;  %v2396_v25 = vsel %vm422_vm1, %v2384_v8, 0  ;;  %v4532_v2 = vpack.c.bf16 %v4521_v53, %v4521_v53 }
 0x1de   : > { %2402 = vmatpush1.bf16.msra.mxu0 %v2390_v5  ;;  %v2509_v3 = vpop.permute.xlu1 %2508  ;;  %2433 = vmatprep.mubr.bf16.mxu0 %v8870_v9 }
 0x1df   : > { %v2381_v6 = vpop.permute.xlu0 %2380 }
 0x1e0   : > { %v2385_v10 = vsel %vm1747_vm12, %v2379_v63, %v2381_v6  ;;  %4201 = vrot.lane.b32.xlu1 %v8196_v42, %s7351_s29 }
 0x1e1   : > { %4199 = vrot.lane.b32.xlu0 %v8178_v22, %s7351_s29  ;;  %6714 = vmatmul.mubr.msk.bf16.vlgmr.msra.gmra.mrb[56].mxu1 %vm418_vm3, %v2215_v13  ;;  %v8239_v13 = vpack.c.bf16 %v4520_v35, %v4520_v35 }
 0x1e2   : > { %6717 = vmatprep.subr.msk.bf16.mxu1 %vm422_vm1, %v2385_v10  ;;  %v2513_v32 = vpop.permute.xlu1 %2512  ;;  %2474 = vmatprep.mubr.bf16.mxu1 %v8870_v9  ;;  %v4771_v10 = vld [vmem:[%s7656_s13 + $0x18] sm:$0xff] }
 0x1e3   : > { %2443 = vmatpush1.bf16.msra.mxu1 %v2396_v25  ;;  %v2511_v37 = vpop.permute.xlu0 %2510 }
 0x1e4   : > { %v2518_v40 = vsel %vm1635_vm11, %v2509_v3, %v2511_v37  ;;  %v2519_v41 = vsel %vm1635_vm11, %v2511_v37, %v2513_v32  ;;  %6716 = vmatmul.mubr.msk.bf16.vlgmr.msra.gmra.mrb[60].mxu0 %vm418_vm3, %v2352_v24  ;;  %4538 = vrot.lane.b32.xlu1 %v8178_v22, %s7351_s29  ;;  %v8249_v3 = vpack.c.bf16 %v4525_v50, %v4525_v50  ;;  %v4772_v50 = vld [vmem:[%s7656_s13 + $0x20] sm:$0xf] }
 0x1e5   : > { %v2526_v49 = vsel %vm422_vm1, %v2518_v40, 0  ;;  %4203 = vrot.lane.b32.xlu0 %v4189_v21, %s7351_s29  ;;  %6719 = vmatprep.subr.msk.bf16.mxu0 %vm422_vm1, %v2519_v41  ;;  %v8266_v37 = vpack.c.bf16 %v4771_v10, %v4771_v10 }
 0x1e6   : > { %2538 = vmatpush1.bf16.msra.mxu0 %v2526_v49  ;;  %v2517_v58 = vpop.permute.xlu1 %2516  ;;  %2569 = vmatprep.mubr.bf16.mxu0 %v8870_v9 }
 0x1e7   : > { %v2515_v4 = vpop.permute.xlu0 %2514 }
 0x1e8   : > { %v2520_v63 = vsel %vm1635_vm11, %v2513_v32, %v2515_v4  ;;  %v2521_v18 = vsel %vm1635_vm11, %v2515_v4, %v2517_v58  ;;  %4542 = vrot.lane.b32.xlu1 %v8239_v13, %s7351_s29  ;;  %v2624_v4 = vld [vmem:[#allocation5 + $0x22] sm:$0x3] }
 0x1e9   : > { %v2532_v5 = vsel %vm422_vm1, %v2520_v63, 0  ;;  %4540 = vrot.lane.b32.xlu0 %v8196_v42, %s7351_s29  ;;  %6718 = vmatmul.mubr.msk.bf16.vlgmr.msra.gmra.mrb[60].mxu1 %vm418_vm3, %v2352_v24  ;;  %v4912_v24 = vcombine.high %v4771_v10, %v4771_v10 }
 0x1ea   : > { %6721 = vmatprep.subr.msk.bf16.mxu1 %vm422_vm1, %v2521_v18  ;;  %v2647_v8 = vpop.permute.xlu1 %2646  ;;  %2610 = vmatprep.mubr.bf16.mxu1 %v8870_v9 }
 0x1eb   : > { %2579 = vmatpush1.bf16.msra.mxu1 %v2532_v5  ;;  %v2645_v6 = vpop.permute.xlu0 %2644  ;;  %v8273_v53 = vpack.c.bf16 %v4912_v24, %v4912_v24 }
 0x1ec   : > { %6720 = vmatmul.mubr.msk.bf16.vlgmr.msra.gmra.mrb[64].mxu0 %vm418_vm3, %v2488_v33  ;;  %4546 = vrot.lane.b32.xlu1 %v4532_v2, %s7351_s29  ;;  %v2654_v25 = vsel %vm1880_vm13, %v2645_v6, %v2647_v8  ;;  %v4783_v2 = vpack.c.bf16 %v4772_v50, %v4772_v50 }
 0x1ed   : > { %4544 = vrot.lane.b32.xlu0 %v8249_v3, %s7351_s29  ;;  %2705 = vmatprep.mubr.bf16.mxu0 %v8870_v9  ;;  %v2662_v40 = vsel %vm422_vm1, %v2654_v25, 0 }
 0x1ee   : > { %v2651_v21 = vpop.permute.xlu1 %2650 }
 0x1ef   : > { %v2649_v32 = vpop.permute.xlu0 %2648 }
 0x1f0   : > { %v2655_v35 = vsel %vm1880_vm13, %v2647_v8, %v2649_v32  ;;  %4791 = vrot.lane.b32.xlu1 %v8249_v3, %s7339_s10  ;;  %v2656_v41 = vsel %vm1880_vm13, %v2649_v32, %v2651_v21  ;;  %v2791_v32 = vld [vmem:[#allocation5 + $0x26] sm:$0x3] }
 0x1f1   : > { %4789 = vrot.lane.b32.xlu0 %v8239_v13, %s7339_s10  ;;  %6722 = vmatmul.mubr.msk.bf16.vlgmr.msra.gmra.mrb[64].mxu1 %vm418_vm3, %v2488_v33  ;;  %v2668_v18 = vsel %vm422_vm1, %v2656_v41, 0 }
 0x1f2   : > { %6723 = vmatprep.subr.msk.bf16.mxu0 %vm422_vm1, %v2655_v35  ;;  %v2798_v49 = vpop.permute.xlu1 %2797  ;;  %2746 = vmatprep.mubr.bf16.mxu1 %v8870_v9 }
 0x1f3   : > { %2674 = vmatpush1.bf16.msra.mxu0 %v2662_v40  ;;  %v2653_v58 = vpop.permute.xlu0 %2652 }
 0x1f4   : > { %v2657_v63 = vsel %vm1880_vm13, %v2651_v21, %v2653_v58  ;;  %4795 = vrot.lane.b32.xlu1 %v8273_v53, %s7339_s10  ;;  %v4908_v21 = vld [vmem:[%s7656_s13 + $0x20] sm:$0xf]  ;;  %s6654_s13 = sshll.u32 %s7652_s23, 4 }
 0x1f5   : > { %4793 = vrot.lane.b32.xlu0 %v8266_v37, %s7339_s10  ;;  %6725 = vmatprep.subr.msk.bf16.mxu1 %vm422_vm1, %v2657_v63  ;;  %v4919_v41 = vpack.c.bf16 %v4908_v21, %v4908_v21  ;;  %v6100_v21 = vld [vmem:[#allocation13 + $0x2] sm:$0x1] }
 0x1f6   : > { %6724 = vmatmul.mubr.msk.bf16.vlgmr.msra.gmra.mrb[68].mxu0 %vm418_vm3, %v2624_v4  ;;  %2715 = vmatpush1.bf16.msra.mxu1 %v2668_v18  ;;  %v2802_v5 = vpop.permute.xlu1 %2801 }
 0x1f7   : > { %v2800_v33 = vpop.permute.xlu0 %2799  ;;  %2858 = vmatprep.mubr.bf16.mxu0 %v8870_v9 }
 0x1f8   : > { %v2807_v8 = vsel %vm934_vm6, %v2798_v49, %v2800_v33  ;;  %v2808_v6 = vsel %vm934_vm6, %v2800_v33, %v2802_v5  ;;  %4925 = vrot.lane.b32.xlu1 %v8239_v13, %s7351_s29 }
 0x1f9   : > { %v2815_v10 = vsel %vm422_vm1, %v2807_v8, 0  ;;  %4797 = vrot.lane.b32.xlu0 %v4783_v2, %s7339_s10  ;;  %6726 = vmatmul.mubr.msk.bf16.vlgmr.msra.gmra.mrb[68].mxu1 %vm418_vm3, %v2624_v4  ;;  %v5884_v4 = vld [vmem:[#allocation13] sm:$0x1]  ;;  %v5865_v2 = vld [vmem:[#allocation10] sm:$0xf]  ;;  %s379_s10 = scalar_lea.vmem [#allocation14], %s6654_s13 }
 0x1fa   : > { %6727 = vmatprep.subr.msk.bf16.mxu0 %vm422_vm1, %v2808_v6  ;;  %v2806_v24 = vpop.permute.xlu1 %2805  ;;  %2899 = vmatprep.mubr.bf16.mxu1 %v8870_v9  ;;  %v5998_v6 = vld [vmem:[#allocation13 + $0x1] sm:$0x1]  ;;  %s6510_s14 = sshll.u32 %s379_s10, 4  ;;  %s8816_s14 = int_to_ptr.vmem [resolvable:$true] %s6510_s14 }
 0x1fb   : > { %2827 = vmatpush1.bf16.msra.mxu0 %v2815_v10  ;;  %v2804_v25 = vpop.permute.xlu0 %2803  ;;  %s7241_s21 = scalar_lea.vmem %s8816_s14, 256  ;;  %p7248_p13 = scmp.lt.s32.totalorder %s8816_s14, %s7246_s18 }
 0x1fc   : > { %v2809_v35 = vsel %vm934_vm6, %v2802_v5, %v2804_v25  ;;  %v2810_v40 = vsel %vm934_vm6, %v2804_v25, %v2806_v24  ;;  %4929 = vrot.lane.b32.xlu1 %v8266_v37, %s7351_s29  ;;  %v2775_v24 = vld [vmem:[#allocation5 + $0x24] sm:$0x3]  ;;  %p7242_p5 = scmp.ne.s32.totalorder %s8816_s14, %s7241_s21  ;;  %p7249_p0 = scmp.lt.s32.totalorder %s7247_s8, %s7241_s21 }
 0x1fd   : > { %v2821_v49 = vsel %vm422_vm1, %v2809_v35, 0  ;;  %4927 = vrot.lane.b32.xlu0 %v8249_v3, %s7351_s29  ;;  %6729 = vmatprep.subr.msk.bf16.mxu1 %vm422_vm1, %v2810_v40  ;;  %v6202_v40 = vld [vmem:[#allocation13 + $0x3] sm:$0x1] }
 0x1fe   : > { %2868 = vmatpush1.bf16.msra.mxu1 %v2821_v49  ;;  %v2911_v50 = vpop.permute.xlu1 %2910  ;;  %6728 = vmatmul.mubr.msk.bf16.vlgmr.msra.gmra.mrb[72].mxu0 %vm418_vm3, %v2791_v32  ;;  %p7243_p12 = pnand %p7242_p5, %p8897_p9  ;;  %p7250_p2 = por %p7249_p0, %p7248_p13 }
 0x1ff   : > { %v2909_v58 = vpop.permute.xlu0 %2908  ;;  %2970 = vmatprep.mubr.bf16.mxu0 %v8870_v9 }
 0x200   : > { %4933 = vrot.lane.b32.xlu1 %v4919_v41, %s7351_s29  ;;  %v2919_v63 = vsel %vm2918_vm0, %v2909_v58, %v2911_v50  ;;  %p7244_p1 = pneg %p7243_p12 }
 0x201   : > { %4931 = vrot.lane.b32.xlu0 %v8273_v53, %s7351_s29  ;;  %6730 = vmatmul.mubr.msk.bf16.vlgmr.msra.gmra.mrb[72].mxu1 %vm418_vm3, %v2791_v32  ;;  %v2927_v8 = vsel %vm422_vm1, %v2919_v63, 0 }
 0x202   : > { %v2915_v18 = vpop.permute.xlu1 %2914  ;;  %3011 = vmatprep.mubr.bf16.mxu1 %v8870_v9  ;;  %p7251_p3 = pnand %p7250_p2, %p7244_p1 }
 0x203   : > { %v2913_v5 = vpop.permute.xlu0 %2912 }
 0x204   : > { %v2920_v33 = vsel %vm2918_vm0, %v2911_v50, %v2913_v5  ;;  %5887 = vperm.xlu1 %6992, %v5884_v4   ;;  %v2921_v25 = vsel %vm2918_vm0, %v2913_v5, %v2915_v18  ;;  %v1588_v50 = vld [vmem:[#allocation7] sm:$0xf] }
 0x205   : > { %5868 = vperm.xlu0 %6991, %v5865_v2   ;;  %6731 = vmatprep.subr.msk.bf16.mxu0 %vm422_vm1, %v2920_v33  ;;  %v2933_v41 = vsel %vm422_vm1, %v2921_v25, 0  ;;  %v2760_v2 = vld [vmem:[#allocation7 + $0x4] sm:$0xf]  ;;  %v3021_v33 = vld [vmem:[#allocation5 + $0x28] sm:$0x3] }
 0x206   : > { %2939 = vmatpush1.bf16.msra.mxu0 %v2927_v8  ;;  %v3042_v10 = vpop.permute.xlu1 %3041 }
 0x207   : > { %v2917_v32 = vpop.permute.xlu0 %2916 }
 0x208   : > { %v2922_v35 = vsel %vm2918_vm0, %v2915_v18, %v2917_v32  ;;  %6001 = vperm.xlu1 %6992, %v5998_v6  }
 0x209   : > { %6103 = vperm.xlu0 %6991, %v6100_v21   ;;  %6732 = vmatmul.mubr.msk.bf16.vlgmr.msra.gmra.mrb[76].mxu0 %vm418_vm3, %v2775_v24 }
 0x20a   : > { %6733 = vmatprep.subr.msk.bf16.mxu1 %vm422_vm1, %v2922_v35  ;;  %v3046_v49 = vpop.permute.xlu1 %3045  ;;  %3103 = vmatprep.mubr.bf16.mxu0 %v8870_v9 }
 0x20b   : > { %2980 = vmatpush1.bf16.msra.mxu1 %v2933_v41  ;;  %v3044_v58 = vpop.permute.xlu0 %3043 }
 0x20c   : > { %v3052_v4 = vsel %vm3051_vm2, %v3042_v10, %v3044_v58  ;;  %v3053_v63 = vsel %vm3051_vm2, %v3044_v58, %v3046_v49  ;;  %6205 = vperm.xlu1 %6992, %v6202_v40  }
 0x20d   : > { %v3060_v18 = vsel %vm422_vm1, %v3052_v4, 0  ;;  %1591 = vperm.xlu0 %6991, %v1588_v50   ;;  %6735 = vmatprep.subr.msk.bf16.mxu0 %vm422_vm1, %v3053_v63  ;;  %v3158_v4 = vld [vmem:[#allocation5 + $0x2a] sm:$0x3] }
 0x20e   : > { %6734 = vmatmul.mubr.msk.bf16.vlgmr.msra.gmra.mrb[76].mxu1 %vm418_vm3, %v2775_v24  ;;  %3072 = vmatpush1.bf16.msra.mxu0 %v3060_v18  ;;  %v3050_v5 = vpop.permute.xlu1 %3049  ;;  %v3929_v18 = vld [vmem:[#allocation7 + $0x8] sm:$0xf] }
 0x20f   : > { %v3048_v8 = vpop.permute.xlu0 %3047  ;;  %3144 = vmatprep.mubr.bf16.mxu1 %v8870_v9 }
 0x210   : > { %v3054_v6 = vsel %vm3051_vm2, %v3046_v49, %v3048_v8  ;;  %v3055_v10 = vsel %vm3051_vm2, %v3048_v8, %v3050_v5  ;;  %2763 = vperm.xlu1 %6992, %v2760_v2  }
 0x211   : > { %v3066_v21 = vsel %vm422_vm1, %v3054_v6, 0  ;;  %6736 = vmatmul.mubr.msk.bf16.vlgmr.msra.gmra.mrb[80].mxu0 %vm418_vm3, %v3021_v33  ;;  %6737 = vmatprep.subr.msk.bf16.mxu1 %vm422_vm1, %v3055_v10 }
 0x212   : > { %3113 = vmatpush1.bf16.msra.mxu1 %v3066_v21  ;;  %v3181_v25 = vpop.permute.xlu1 %3180  ;;  %3239 = vmatprep.mubr.bf16.mxu0 %v8870_v9 }
 0x213   : > { %v3179_v24 = vpop.permute.xlu0 %3178  ;;  %3932 = vperm.xlu0 %6991, %v3929_v18  }
 0x214   : > { %v3188_v32 = vsel %vm2918_vm0, %v3179_v24, %v3181_v25 }
 0x215   : > { %v3196_v49 = vsel %vm422_vm1, %v3188_v32, 0 }
 0x216   : > { %6738 = vmatmul.mubr.msk.bf16.vlgmr.msra.gmra.mrb[80].mxu1 %vm418_vm3, %v3021_v33  ;;  %v3185_v35 = vpop.permute.xlu1 %3184 }
 0x217   : > { %v3183_v40 = vpop.permute.xlu0 %3182  ;;  %3280 = vmatprep.mubr.bf16.mxu1 %v8870_v9 }
 0x218   : > { %v3189_v41 = vsel %vm2918_vm0, %v3181_v25, %v3183_v40  ;;  %v3190_v50 = vsel %vm2918_vm0, %v3183_v40, %v3185_v35  ;;  %v3294_v25 = vld [vmem:[#allocation5 + $0x2c] sm:$0x3] }
 0x219   : > { %6739 = vmatprep.subr.msk.bf16.mxu0 %vm422_vm1, %v3189_v41  ;;  %v3202_v5 = vsel %vm422_vm1, %v3190_v50, 0 }
 0x21a   : > { %3208 = vmatpush1.bf16.msra.mxu0 %v3196_v49  ;;  %v3406_v58 = vpop.permute.xlu1 %3405 }
 0x21b   : > { %v3187_v63 = vpop.permute.xlu0 %3186  ;;  %6743 = vmatprep.subr.msk.bf16.mxu0 %vm422_vm1, %v7903_v43 }
 0x21c   : > { %v3191_v2 = vsel %vm2918_vm0, %v3185_v35, %v3187_v63  ;;  %v3385_v63 = vld [vmem:[#allocation5 + $0x2e] sm:$0x3] }
 0x21d   : > { %6740 = vmatmul.mubr.msk.bf16.vlgmr.msra.gmra.mrb[84].mxu0 %vm418_vm3, %v3158_v4  ;;  %6741 = vmatprep.subr.msk.bf16.mxu1 %vm422_vm1, %v3191_v2 }
 0x21e   : > { %3249 = vmatpush1.bf16.msra.mxu1 %v3202_v5  ;;  %3299 = vmatpush1.bf16.msra.mxu0 %v7907_v45  ;;  %v3410_v33 = vpop.permute.xlu1 %3409 }
 0x21f   : > { %v3408_v8 = vpop.permute.xlu0 %3407  ;;  %6745 = vmatprep.subr.msk.bf16.mxu1 %vm422_vm1, %v7919_v54  ;;  %3330 = vmatprep.mubr.bf16.mxu0 %v8870_v9 }
 0x220   : > { %v3416_v6 = vsel %vm3051_vm2, %v3408_v8, %v3410_v33  ;;  %v3415_v10 = vsel %vm3051_vm2, %v3406_v58, %v3408_v8 }
 0x221   : > { %6742 = vmatmul.mubr.msk.bf16.vlgmr.msra.gmra.mrb[84].mxu1 %vm418_vm3, %v3158_v4  ;;  %6747 = vmatprep.subr.msk.bf16.mxu0 %vm422_vm1, %v3416_v6  ;;  %v3423_v35 = vsel %vm422_vm1, %v3415_v10, 0 }
 0x222   : > { %3340 = vmatpush1.bf16.msra.mxu1 %v7925_v57  ;;  %v3414_v21 = vpop.permute.xlu1 %3413  ;;  %3371 = vmatprep.mubr.bf16.mxu1 %v8870_v9 }
 0x223   : > { %v3412_v24 = vpop.permute.xlu0 %3411 }
 0x224   : > { %v3418_v32 = vsel %vm3051_vm2, %v3412_v24, %v3414_v21  ;;  %v3417_v40 = vsel %vm3051_vm2, %v3410_v33, %v3412_v24 }
 0x225   : > { %6744 = vmatmul.mubr.msk.bf16.vlgmr.msra.gmra.mrb[88].mxu0 %vm418_vm3, %v3294_v25  ;;  %6749 = vmatprep.subr.msk.bf16.mxu1 %vm422_vm1, %v3418_v32  ;;  %v3429_v50 = vsel %vm422_vm1, %v3417_v40, 0 }
 0x226   : > { %3435 = vmatpush1.bf16.msra.mxu0 %v3423_v35  ;;  %v3544_v41 = vpop.permute.xlu1 %3543  ;;  %3466 = vmatprep.mubr.bf16.mxu0 %v8870_v9 }
 0x227   : > { %v3542_v49 = vpop.permute.xlu0 %3541 }
 0x228   : > { %v3551_v58 = vsel %vm2918_vm0, %v3542_v49, %v3544_v41 }
 0x229   : > { %6746 = vmatmul.mubr.msk.bf16.vlgmr.msra.gmra.mrb[88].mxu1 %vm418_vm3, %v3294_v25  ;;  %v3559_v5 = vsel %vm422_vm1, %v3551_v58, 0 }
 0x22a   : > { %3476 = vmatpush1.bf16.msra.mxu1 %v3429_v50  ;;  %v3548_v4 = vpop.permute.xlu1 %3547  ;;  %3507 = vmatprep.mubr.bf16.mxu1 %v8870_v9  ;;  %v3521_v50 = vld [vmem:[#allocation5 + $0x30] sm:$0x3] }
 0x22b   : > { %v3546_v18 = vpop.permute.xlu0 %3545 }
 0x22c   : > { %v3552_v2 = vsel %vm2918_vm0, %v3544_v41, %v3546_v18  ;;  %v3553_v8 = vsel %vm2918_vm0, %v3546_v18, %v3548_v4 }
 0x22d   : > { %6748 = vmatmul.mubr.msk.bf16.vlgmr.msra.gmra.mrb[92].mxu0 %vm418_vm3, %v3385_v63  ;;  %6751 = vmatprep.subr.msk.bf16.mxu0 %vm422_vm1, %v3552_v2  ;;  %v469_v33 = vpop.f32.mrb[0].mxu0  ;;  %v3565_v40 = vsel %vm422_vm1, %v3553_v8, 0 }
 0x22e   : > { %3571 = vmatpush1.bf16.msra.mxu0 %v3559_v5  ;;  %v3678_v6 = vpop.permute.xlu1 %3677  ;;  %3602 = vmatprep.mubr.bf16.mxu0 %v8870_v9  ;;  %v471_v10 = vpop.f32.mrb[1].mxu0 }
 0x22f   : > { %v3550_v21 = vpop.permute.xlu0 %3549  ;;  %v473_v25 = vpop.f32.mrb[2].mxu0 }
 0x230   : > { %v3554_v24 = vsel %vm2918_vm0, %v3548_v4, %v3550_v21  ;;  %v510_v32 = vpop.f32.mrb[0].mxu1  ;;  %v474_v35 = vpop.f32.mrb[3].mxu0 }
 0x231   : > { %6750 = vmatmul.mubr.msk.bf16.vlgmr.msra.gmra.mrb[92].mxu1 %vm418_vm3, %v3385_v63  ;;  %6753 = vmatprep.subr.msk.bf16.mxu1 %vm422_vm1, %v3554_v24  ;;  %v512_v41 = vpop.f32.mrb[1].mxu1 }
 0x232   : > { %3612 = vmatpush1.bf16.msra.mxu1 %v3565_v40  ;;  %v3682_v49 = vpop.permute.xlu1 %3681  ;;  %3643 = vmatprep.mubr.bf16.mxu1 %v8870_v9  ;;  %v514_v58 = vpop.f32.mrb[2].mxu1 }
 0x233   : > { %v3680_v18 = vpop.permute.xlu0 %3679  ;;  %v515_v2 = vpop.f32.mrb[3].mxu1 }
 0x234   : > { %v3687_v5 = vsel %vm934_vm6, %v3678_v6, %v3680_v18  ;;  %v3688_v4 = vsel %vm934_vm6, %v3680_v18, %v3682_v49 }
 0x235   : > { %v3695_v21 = vsel %vm422_vm1, %v3687_v5, 0  ;;  %6752 = vmatmul.mubr.msk.bf16.vlgmr.msra.gmra.mrb[96].mxu0 %vm418_vm3, %v3521_v50  ;;  %6755 = vmatprep.subr.msk.bf16.mxu0 %vm422_vm1, %v3688_v4  ;;  %v581_v63 = vpop.f32.mrb[4].mxu0 }
 0x236   : > { %3707 = vmatpush1.bf16.msra.mxu0 %v3695_v21  ;;  %v3686_v8 = vpop.permute.xlu1 %3685  ;;  %3738 = vmatprep.mubr.bf16.mxu0 %v8870_v9  ;;  %v582_v25 = vadd.f32 %v581_v63, %v469_v33  ;;  %v583_v24 = vpop.f32.mrb[5].mxu0  ;;  %v3657_v9 = vld [vmem:[#allocation5 + $0x32] sm:$0x3]  ;;  %v8894_v33 = vmov 0  }
 0x237   : > { %v3684_v35 = vpop.permute.xlu0 %3683  ;;  %v584_v40 = vadd.f32 %v583_v24, %v471_v10  ;;  %v585_v58 = vpop.f32.mrb[6].mxu0 }
 0x238   : > { %v3689_v6 = vsel %vm934_vm6, %v3682_v49, %v3684_v35  ;;  %v3690_v18 = vsel %vm934_vm6, %v3684_v35, %v3686_v8  ;;  %v586_v2 = vpop.f32.mrb[7].mxu0 }
 0x239   : > { %v3701_v5 = vsel %vm422_vm1, %v3689_v6, 0  ;;  %6754 = vmatmul.mubr.msk.bf16.vlgmr.msra.gmra.mrb[96].mxu1 %vm418_vm3, %v3521_v50  ;;  %6757 = vmatprep.subr.msk.bf16.mxu1 %vm422_vm1, %v3690_v18  ;;  %v622_v4 = vpop.f32.mrb[4].mxu1 }
 0x23a   : > { %3748 = vmatpush1.bf16.msra.mxu1 %v3701_v5  ;;  %v3816_v21 = vpop.permute.xlu1 %3815  ;;  %3779 = vmatprep.mubr.bf16.mxu1 %v8894_v33  ;;  %v623_v63 = vadd.f32 %v622_v4, %v510_v32  ;;  %v624_v10 = vpop.f32.mrb[5].mxu1 }
 0x23b   : > { %v3814_v24 = vpop.permute.xlu0 %3813  ;;  %v625_v58 = vadd.f32 %v624_v10, %v512_v41  ;;  %v626_v49 = vpop.f32.mrb[6].mxu1 }
 0x23c   : > { %v627_v27 = vpop.f32.mrb[7].mxu1  ;;  %v3823_v35 = vsel %vm3051_vm2, %v3814_v24, %v3816_v21  ;;  %v3793_v49 = vld [vmem:[#allocation5 + $0x34] sm:$0x3] }
 0x23d   : > { %6756 = vmatmul.mubr.msk.bf16.vlgmr.msra.gmra.mrb[100].mxu0 %vm418_vm3, %v3657_v9  ;;  %v714_v8 = vpop.f32.mrb[8].mxu0  ;;  %v3831_v41 = vsel %vm422_vm1, %v3823_v35, 0 }
 0x23e   : > { %v3820_v50 = vpop.permute.xlu1 %3819  ;;  %3874 = vmatprep.mubr.bf16.mxu0 %v8894_v33  ;;  %v762_v6 = vadd.f32 %v714_v8, %v582_v25  ;;  %v716_v18 = vpop.f32.mrb[9].mxu0 }
 0x23f   : > { %v3818_v2 = vpop.permute.xlu0 %3817  ;;  %v763_v5 = vadd.f32 %v716_v18, %v584_v40  ;;  %v718_v14 = vpop.f32.mrb[10].mxu0 }
 0x240   : > { %v3824_v32 = vsel %vm3051_vm2, %v3816_v21, %v3818_v2  ;;  %v719_v4 = vpop.f32.mrb[11].mxu0  ;;  %v3825_v10 = vsel %vm3051_vm2, %v3818_v2, %v3820_v50 }
 0x241   : > { %6758 = vmatmul.mubr.msk.bf16.vlgmr.msra.gmra.mrb[100].mxu1 %vm418_vm3, %v3657_v9  ;;  %6759 = vmatprep.subr.msk.bf16.mxu0 %vm422_vm1, %v3824_v32  ;;  %v755_v27 = vpop.f32.mrb[8].mxu1  ;;  %v3837_v9 = vsel %vm422_vm1, %v3825_v10, 0 }
 0x242   : > { %3843 = vmatpush1.bf16.msra.mxu0 %v3831_v41  ;;  %v3967_v24 = vpop.permute.xlu1 %3966  ;;  %3915 = vmatprep.mubr.bf16.mxu1 %v8894_v33  ;;  %v764_v25 = vadd.f32 %v755_v27, %v623_v63  ;;  %v757_v40 = vpop.f32.mrb[9].mxu1 }
 0x243   : > { %v3822_v14 = vpop.permute.xlu0 %3821  ;;  %v765_v8 = vadd.f32 %v757_v40, %v625_v58  ;;  %v759_v21 = vpop.f32.mrb[10].mxu1 }
 0x244   : > { %v3826_v18 = vsel %vm3051_vm2, %v3820_v50, %v3822_v14  ;;  %v760_v35 = vpop.f32.mrb[11].mxu1 }
 0x245   : > { %6760 = vmatmul.mubr.msk.bf16.vlgmr.msra.gmra.mrb[104].mxu0 %vm418_vm3, %v3793_v49  ;;  %6761 = vmatprep.subr.msk.bf16.mxu1 %vm422_vm1, %v3826_v18  ;;  %v851_v2 = vpop.f32.mrb[12].mxu0  ;;  %v3958_v35 = vld [vmem:[#allocation5 + $0x38] sm:$0x3] }
 0x246   : > { %3884 = vmatpush1.bf16.msra.mxu1 %v3837_v9  ;;  %v3971_v32 = vpop.permute.xlu1 %3970  ;;  %4027 = vmatprep.mubr.bf16.mxu0 %v8894_v33  ;;  %v899_v4 = vadd.f32 %v851_v2, %v762_v6  ;;  %v853_v63 = vpop.f32.mrb[13].mxu0 }
 0x247   : > { %v3969_v41 = vpop.permute.xlu0 %3968  ;;  %v900_v27 = vadd.f32 %v853_v63, %v763_v5  ;;  %v855_v58 = vpop.f32.mrb[14].mxu0  ;;  %v4081_v63 = vsel %vm422_vm1, %v8164_v17, 0  ;;  %v4087_v17 = vsel %vm422_vm1, %v8178_v22, 0 }
 0x248   : > { %v3976_v40 = vsel %vm934_vm6, %v3967_v24, %v3969_v41  ;;  %v3977_v50 = vsel %vm934_vm6, %v3969_v41, %v3971_v32  ;;  %v856_v14 = vpop.f32.mrb[15].mxu0 }
 0x249   : > { %v3984_v10 = vsel %vm422_vm1, %v3976_v40, 0  ;;  %6762 = vmatmul.mubr.msk.bf16.vlgmr.msra.gmra.mrb[104].mxu1 %vm418_vm3, %v3793_v49  ;;  %6763 = vmatprep.subr.msk.bf16.mxu0 %vm422_vm1, %v3977_v50  ;;  %v892_v21 = vpop.f32.mrb[12].mxu1 }
 0x24a   : > { %3996 = vmatpush1.bf16.msra.mxu0 %v3984_v10  ;;  %v3975_v18 = vpop.permute.xlu1 %3974  ;;  %v901_v6 = vadd.f32 %v892_v21, %v764_v25  ;;  %v894_v9 = vpop.f32.mrb[13].mxu1  ;;  %4068 = vmatprep.mubr.bf16.mxu1 %v8894_v33 }
 0x24b   : > { %v3973_v5 = vpop.permute.xlu0 %3972  ;;  %v902_v2 = vadd.f32 %v894_v9, %v765_v8  ;;  %6767 = vmatprep.subr.msk.bf16.mxu0 %vm422_vm1, %v8183_v19  ;;  %v896_v24 = vpop.f32.mrb[14].mxu1 }
 0x24c   : > { %v3978_v49 = vsel %vm934_vm6, %v3971_v32, %v3973_v5  ;;  %v3979_v41 = vsel %vm934_vm6, %v3973_v5, %v3975_v18  ;;  %v897_v58 = vpop.f32.mrb[15].mxu1  ;;  %v3944_v18 = vld [vmem:[#allocation5 + $0x36] sm:$0x3] }
 0x24d   : > { %v3990_v40 = vsel %vm422_vm1, %v3978_v49, 0  ;;  %6764 = vmatmul.mubr.msk.bf16.vlgmr.msra.gmra.mrb[108].mxu0 %vm418_vm3, %v3958_v35  ;;  %6765 = vmatprep.subr.msk.bf16.mxu1 %vm422_vm1, %v3979_v41 }
 0x24e   : > { %4037 = vmatpush1.bf16.msra.mxu1 %v3990_v40  ;;  %4093 = vmatpush1.bf16.msra.mxu0 %v4081_v63  ;;  %v4198_v25 = vpop.permute.xlu1 %4197 }
 0x24f   : > { %v4196_v19 = vpop.permute.xlu0 %4195  ;;  %v988_v8 = vpop.f32.mrb[16].mxu0  ;;  %4124 = vmatprep.mubr.bf16.mxu0 %v8894_v33  ;;  %6769 = vmatprep.subr.msk.bf16.mxu1 %vm422_vm1, %v8196_v42 }
 0x250   : > { %v1036_v32 = vadd.f32 %v988_v8, %v899_v4  ;;  %v990_v50 = vpop.f32.mrb[17].mxu0  ;;  %v4206_v14 = vsel %vm4205_vm4, %v4196_v19, %v4198_v25 }
 0x251   : > { %6766 = vmatmul.mubr.msk.bf16.vlgmr.msra.gmra.mrb[108].mxu1 %vm418_vm3, %v3958_v35  ;;  %v1037_v10 = vadd.f32 %v990_v50, %v900_v27  ;;  %v992_v21 = vpop.f32.mrb[18].mxu0  ;;  %v4214_v24 = vsel %vm422_vm1, %v4206_v14, 0 }
 0x252   : > { %4134 = vmatpush1.bf16.msra.mxu1 %v4087_v17  ;;  %v4202_v9 = vpop.permute.xlu1 %4201  ;;  %v993_v5 = vpop.f32.mrb[19].mxu0  ;;  %4165 = vmatprep.mubr.bf16.mxu1 %v8894_v33 }
 0x253   : > { %v4200_v63 = vpop.permute.xlu0 %4199  ;;  %v4175_v5 = vld [vmem:[#allocation5 + $0x3a] sm:$0x3] }
 0x254   : > { %v4207_v49 = vsel %vm4205_vm4, %v4198_v25, %v4200_v63  ;;  %v1029_v22 = vpop.f32.mrb[16].mxu1  ;;  %v4208_v4 = vsel %vm4205_vm4, %v4200_v63, %v4202_v9 }
 0x255   : > { %v1038_v41 = vadd.f32 %v1029_v22, %v901_v6  ;;  %v1031_v58 = vpop.f32.mrb[17].mxu1  ;;  %6768 = vmatmul.mubr.msk.bf16.vlgmr.msra.gmra.mrb[112].mxu0 %vm418_vm3, %v3944_v18  ;;  %6771 = vmatprep.subr.msk.bf16.mxu0 %vm422_vm1, %v4207_v49  ;;  %v4220_v19 = vsel %vm422_vm1, %v4208_v4, 0  ;;  %v8445_v4 = vsel %vm422_vm1, %v8239_v13, 0 }
 0x256   : > { %v1039_v27 = vadd.f32 %v1031_v58, %v902_v2  ;;  %4226 = vmatpush1.bf16.msra.mxu0 %v4214_v24  ;;  %v1033_v35 = vpop.f32.mrb[18].mxu1  ;;  %4257 = vmatprep.mubr.bf16.mxu0 %v8894_v33  ;;  %v4539_v40 = vpop.permute.xlu1 %4538 }
 0x257   : > { %v4204_v8 = vpop.permute.xlu0 %4203  ;;  %v1034_v50 = vpop.f32.mrb[19].mxu1  ;;  %6775 = vmatprep.subr.msk.bf16.mxu0 %vm422_vm1, %v8196_v42 }
 0x258   : > { %v4209_v6 = vsel %vm4205_vm4, %v4202_v9, %v4204_v8  ;;  %v1125_v25 = vpop.f32.mrb[20].mxu0 }
 0x259   : > { %v1173_v14 = vadd.f32 %v1125_v25, %v1036_v32  ;;  %v1127_v21 = vpop.f32.mrb[21].mxu0  ;;  %6770 = vmatmul.mubr.msk.bf16.vlgmr.msra.gmra.mrb[112].mxu1 %vm418_vm3, %v3944_v18  ;;  %6773 = vmatprep.subr.msk.bf16.mxu1 %vm422_vm1, %v4209_v6 }
 0x25a   : > { %v1174_v2 = vadd.f32 %v1127_v21, %v1037_v10  ;;  %4267 = vmatpush1.bf16.msra.mxu1 %v4220_v19  ;;  %4298 = vmatprep.mubr.bf16.mxu1 %v8894_v33  ;;  %v1129_v24 = vpop.f32.mrb[22].mxu0  ;;  %v4543_v63 = vpop.permute.xlu1 %4542  ;;  %v4312_v19 = vld [vmem:[#allocation5 + $0x3c] sm:$0x3] }
 0x25b   : > { %6777 = vmatprep.subr.msk.bf16.mxu1 %vm422_vm1, %v8249_v3  ;;  %v1130_v42 = vpop.f32.mrb[23].mxu0  ;;  %v4541_v49 = vpop.permute.xlu0 %4540 }
 0x25c   : > { %v1166_v9 = vpop.f32.mrb[20].mxu1  ;;  %v4549_v13 = vsel %vm4205_vm4, %v4541_v49, %v4543_v63  ;;  %v4548_v42 = vsel %vm4205_vm4, %v4539_v40, %v4541_v49 }
 0x25d   : > { %v1175_v22 = vadd.f32 %v1166_v9, %v1038_v41  ;;  %v1168_v32 = vpop.f32.mrb[21].mxu1  ;;  %6772 = vmatmul.mubr.msk.bf16.vlgmr.msra.gmra.mrb[116].mxu0 %vm418_vm3, %v4175_v5 }
 0x25e   : > { %v1176_v18 = vadd.f32 %v1168_v32, %v1039_v27  ;;  %4341 = vmatpush1.bf16.msra.mxu0 %v4087_v17  ;;  %4372 = vmatprep.mubr.bf16.mxu0 %v8894_v33  ;;  %v1170_v10 = vpop.f32.mrb[22].mxu1  ;;  %v4547_v41 = vpop.permute.xlu1 %4546  ;;  %v5041_v27 = vld [vmem:[#allocation7 + $0xc] sm:$0xf] }
 0x25f   : > { %6779 = vmatprep.subr.msk.bf16.mxu0 %vm422_vm1, %v7903_v43  ;;  %v1171_v58 = vpop.f32.mrb[23].mxu1  ;;  %v4545_v35 = vpop.permute.xlu0 %4544  ;;  %5044 = vperm.xlu1 %6992, %v5041_v27   ;;  %v4556_v27 = vsel %vm422_vm1, %v4548_v42, 0 }
 0x260   : > { %v4551_v9 = vsel %vm4205_vm4, %v4545_v35, %v4547_v41  ;;  %v4427_v58 = vld [vmem:[#allocation5 + $0x3e] sm:$0x3]  ;;  %v4550_v49 = vsel %vm4205_vm4, %v4543_v63, %v4545_v35 }
 0x261   : > { %6774 = vmatmul.mubr.msk.bf16.vlgmr.msra.gmra.mrb[116].mxu1 %vm418_vm3, %v4175_v5 }
 0x262   : > { %4382 = vmatpush1.bf16.msra.mxu1 %v8445_v4  ;;  %4413 = vmatprep.mubr.bf16.mxu1 %v8894_v33  ;;  %v4792_v21 = vpop.permute.xlu1 %4791 }
 0x263   : > { %6781 = vmatprep.subr.msk.bf16.mxu1 %vm422_vm1, %v7919_v54  ;;  %v1262_v17 = vpop.f32.mrb[24].mxu0  ;;  %v4790_v24 = vpop.permute.xlu0 %4789 }
 0x264   : > { %v1310_v8 = vadd.f32 %v1262_v17, %v1173_v14  ;;  %v1264_v50 = vpop.f32.mrb[25].mxu0 }
 0x265   : > { %v1311_v6 = vadd.f32 %v1264_v50, %v1174_v2  ;;  %6776 = vmatmul.mubr.msk.bf16.vlgmr.msra.gmra.mrb[120].mxu0 %vm418_vm3, %v4312_v19  ;;  %v1266_v25 = vpop.f32.mrb[26].mxu0 }
 0x266   : > { %4432 = vmatpush1.bf16.msra.mxu0 %v7907_v45  ;;  %v1267_v5 = vpop.f32.mrb[27].mxu0  ;;  %4463 = vmatprep.mubr.bf16.mxu0 %v8894_v33  ;;  %v4796_v40 = vpop.permute.xlu1 %4795 }
 0x267   : > { %6783 = vmatprep.subr.msk.bf16.mxu0 %vm422_vm1, %v4549_v13  ;;  %v4562_v5 = vsel %vm422_vm1, %v4550_v49, 0 }
 0x268   : > { %v1303_v14 = vpop.f32.mrb[24].mxu1 }
 0x269   : > { %v1312_v32 = vadd.f32 %v1303_v14, %v1175_v22  ;;  %v1305_v10 = vpop.f32.mrb[25].mxu1  ;;  %6778 = vmatmul.mubr.msk.bf16.vlgmr.msra.gmra.mrb[120].mxu1 %vm418_vm3, %v4312_v19 }
 0x26a   : > { %v1313_v2 = vadd.f32 %v1305_v10, %v1176_v18  ;;  %4473 = vmatpush1.bf16.msra.mxu1 %v7925_v57  ;;  %v1307_v17 = vpop.f32.mrb[26].mxu1  ;;  %4504 = vmatprep.mubr.bf16.mxu1 %v8894_v33  ;;  %v4794_v18 = vpop.permute.xlu0 %4793  ;;  %v4518_v10 = vld [vmem:[#allocation5 + $0x40] sm:$0x3] }
 0x26b   : > { %v1308_v50 = vpop.f32.mrb[27].mxu1  ;;  %6785 = vmatprep.subr.msk.bf16.mxu1 %vm422_vm1, %v4551_v9  ;;  %v4926_v35 = vpop.permute.xlu1 %4925 }
 0x26c   : > { %v1399_v41 = vpop.f32.mrb[28].mxu0  ;;  %v4800_v50 = vsel %vm934_vm6, %v4792_v21, %v4794_v18 }
 0x26d   : > { %v1447_v22 = vadd.f32 %v1399_v41, %v1310_v8  ;;  %v1401_v13 = vpop.f32.mrb[29].mxu0  ;;  %6780 = vmatmul.mubr.msk.bf16.vlgmr.msra.gmra.mrb[124].mxu0 %vm418_vm3, %v4427_v58 }
 0x26e   : > { %v1448_v19 = vadd.f32 %v1401_v13, %v1311_v6  ;;  %4568 = vmatpush1.bf16.msra.mxu0 %v4556_v27  ;;  %4599 = vmatprep.mubr.bf16.mxu0 %v8894_v33  ;;  %v1403_v25 = vpop.f32.mrb[30].mxu0  ;;  %v4798_v17 = vpop.permute.xlu0 %4797 }
 0x26f   : > { %v1404_v42 = vpop.f32.mrb[31].mxu0  ;;  %6787 = vmatprep.subr.msk.bf16.mxu0 %vm422_vm1, %v8249_v3  ;;  %v4802_v41 = vsel %vm934_vm6, %v4796_v40, %v4798_v17 }
 0x270   : > { %v1440_v14 = vpop.f32.mrb[28].mxu1 }
 0x271   : > { %v1449_v9 = vadd.f32 %v1440_v14, %v1312_v32  ;;  %v1442_v63 = vpop.f32.mrb[29].mxu1  ;;  %6782 = vmatmul.mubr.msk.bf16.vlgmr.msra.gmra.mrb[124].mxu1 %vm418_vm3, %v4427_v58  ;;  %v4677_v32 = vsel %vm422_vm1, %v8266_v37, 0  ;;  %v4799_v58 = vsel %vm934_vm6, %v4790_v24, %v4792_v21  ;;  %v4801_v21 = vsel %vm934_vm6, %v4794_v18, %v4796_v40 }
 0x272   : > { %v1450_v8 = vadd.f32 %v1442_v63, %v1313_v2  ;;  %4609 = vmatpush1.bf16.msra.mxu1 %v4562_v5  ;;  %4640 = vmatprep.mubr.bf16.mxu1 %v8894_v33  ;;  %v1444_v6 = vpop.f32.mrb[30].mxu1  ;;  %v4930_v2 = vpop.permute.xlu1 %4929  ;;  %v4654_v5 = vld [vmem:[#allocation5 + $0x42] sm:$0x3]  ;;  %v4807_v37 = vsel %vm422_vm1, %v4799_v58, 0  ;;  %v4813_v17 = vsel %vm422_vm1, %v4801_v21, 0 }
 0x273   : > { %v1445_v27 = vpop.f32.mrb[31].mxu1  ;;  %6789 = vmatprep.subr.msk.bf16.mxu1 %vm422_vm1, %v8273_v53 }
 0x275   : > { %6784 = vmatmul.mubr.msk.bf16.vlgmr.msra.gmra.mrb[128].mxu0 %vm418_vm3, %v4518_v10 }
 0x276   : > { %4683 = vmatpush1.bf16.msra.mxu0 %v8445_v4  ;;  %4714 = vmatprep.mubr.bf16.mxu0 %v8894_v33  ;;  %v4928_v4 = vpop.permute.xlu0 %4927  ;;  %v4934_v63 = vpop.permute.xlu1 %4933 }
 0x277   : > { %v1536_v3 = vpop.f32.mrb[32].mxu0  ;;  %6791 = vmatprep.subr.msk.bf16.mxu0 %vm422_vm1, %v4800_v50  ;;  %v4935_v18 = vsel %vm4205_vm4, %v4926_v35, %v4928_v4 }
 0x278   : > { %v8482_v49 = vadd.f32 %v1536_v3, %v1447_v22  ;;  %v1538_v53 = vpop.f32.mrb[33].mxu0  ;;  %v4936_v22 = vsel %vm4205_vm4, %v4928_v4, %v4930_v2 }
 0x279   : > { %v8485_v13 = vadd.f32 %v1538_v53, %v1448_v19  ;;  %6786 = vmatmul.mubr.msk.bf16.vlgmr.msra.gmra.mrb[128].mxu1 %vm418_vm3, %v4518_v10  ;;  %v1540_v25 = vpop.f32.mrb[34].mxu0 }
 0x27a   : > { %4724 = vmatpush1.bf16.msra.mxu1 %v4677_v32  ;;  %4755 = vmatprep.mubr.bf16.mxu1 %v8894_v33  ;;  %v1541_v42 = vpop.f32.mrb[35].mxu0  ;;  %v4932_v27 = vpop.permute.xlu0 %4931  ;;  %v4943_v32 = vsel %vm422_vm1, %v4935_v18, 0 }
 0x27b   : > { %6793 = vmatprep.subr.msk.bf16.mxu1 %vm422_vm1, %v4802_v41  ;;  %v4937_v53 = vsel %vm4205_vm4, %v4930_v2, %v4932_v27 }
 0x27c   : > { %v1577_v24 = vpop.f32.mrb[32].mxu1 }
 0x27d   : > { %v8493_v19 = vadd.f32 %v1577_v24, %v1449_v9  ;;  %v1579_v14 = vpop.f32.mrb[33].mxu1  ;;  %6788 = vmatmul.mubr.msk.bf16.vlgmr.msra.gmra.mrb[132].mxu0 %vm418_vm3, %v4654_v5  ;;  %v4938_v9 = vsel %vm4205_vm4, %v4932_v27, %v4934_v63  ;;  %v5057_v27 = vld [vmem:[#allocation8 + $0x2] sm:$0x3] }
 0x27e   : > { %v8496_v10 = vadd.f32 %v1579_v14, %v1450_v8  ;;  %4819 = vmatpush1.bf16.msra.mxu0 %v4807_v37  ;;  %4850 = vmatprep.mubr.bf16.mxu0 %v8894_v33  ;;  %v1581_v6 = vpop.f32.mrb[34].mxu1  ;;  %v4769_v8 = vld [vmem:[#allocation5 + $0x44] sm:$0x3]  ;;  %v4905_v37 = vld [vmem:[#allocation5 + $0x46] sm:$0x3] }
 0x27f   : > { %6795 = vmatprep.subr.msk.bf16.mxu0 %vm422_vm1, %v4936_v22  ;;  %v1582_v40 = vpop.f32.mrb[35].mxu1 }
 0x281   : > { %6790 = vmatmul.mubr.msk.bf16.vlgmr.msra.gmra.mrb[132].mxu1 %vm418_vm3, %v4654_v5  ;;  %v1689_v50 = vpop.f32.mrb[36].mxu0  ;;  %v4949_v5 = vsel %vm422_vm1, %v4937_v53, 0  ;;  %v5055_v53 = vld [vmem:[#allocation8] sm:$0x3] }
 0x282   : > { %4860 = vmatpush1.bf16.msra.mxu1 %v4813_v17  ;;  %4891 = vmatprep.mubr.bf16.mxu1 %v8894_v33  ;;  %v1691_v3 = vpop.f32.mrb[37].mxu0 }
 0x283   : > { %6797 = vmatprep.subr.msk.bf16.mxu1 %vm422_vm1, %v4938_v9  ;;  %v1693_v58 = vpop.f32.mrb[38].mxu0 }
 0x284   : > { %v1730_v41 = vpop.f32.mrb[36].mxu1  ;;  %v1694_v35 = vpop.f32.mrb[39].mxu0 }
 0x285   : > { %6792 = vmatmul.mubr.msk.bf16.vlgmr.msra.gmra.mrb[136].mxu0 %vm418_vm3, %v4769_v8  ;;  %v1732_v4 = vpop.f32.mrb[37].mxu1 }
 0x286   : > { %4955 = vmatpush1.bf16.msra.mxu0 %v4943_v32  ;;  %4986 = vmatprep.mubr.bf16.mxu0 %v8894_v33  ;;  %v1734_v25 = vpop.f32.mrb[38].mxu1 }
 0x287   : > { %6799 = vmatprep.subr.msk.bf16.mxu0 %vm422_vm1, %v7780_v44  ;;  %v1735_v42 = vpop.f32.mrb[39].mxu1 }
 0x289   : > { %6794 = vmatmul.mubr.msk.bf16.vlgmr.msra.gmra.mrb[136].mxu1 %vm418_vm3, %v4769_v8 }
 0x28a   : > { %4996 = vmatpush1.bf16.msra.mxu1 %v4949_v5  ;;  %5027 = vmatprep.mubr.bf16.mxu1 %v8894_v33 }
 0x28b   : > { %6801 = vmatprep.subr.msk.bf16.mxu1 %vm422_vm1, %v7793_v51 }
 0x28c   : > { %v1801_v2 = vpop.f32.mrb[40].mxu0 }
 0x28d   : > { %6796 = vmatmul.mubr.msk.bf16.vlgmr.msra.gmra.mrb[140].mxu0 %vm418_vm3, %v4905_v37  ;;  %v1803_v21 = vpop.f32.mrb[41].mxu0  ;;  %v1802_v24 = vadd.f32 %v1801_v2, %v1689_v50 }
 0x28e   : > { %5062 = vmatpush1.bf16.msra.mxu0 %v7786_v46  ;;  %v1804_v22 = vadd.f32 %v1803_v21, %v1691_v3  ;;  %v1805_v14 = vpop.f32.mrb[42].mxu0  ;;  %5093 = vmatprep.mubr.bf16.mxu0 %v8894_v33 }
 0x28f   : > { %6803 = vmatprep.subr.msk.bf16.mxu0 %vm422_vm1, %v7796_v52  ;;  %v1806_v44 = vpop.f32.mrb[43].mxu0 }
 0x290   : > { %v1842_v63 = vpop.f32.mrb[40].mxu1  ;;  %v5320_v44 = vld [vmem:[#allocation8 + $0x6] sm:$0x3] }
 0x291   : > { %6798 = vmatmul.mubr.msk.bf16.vlgmr.msra.gmra.mrb[140].mxu1 %vm418_vm3, %v4905_v37  ;;  %v1843_v6 = vadd.f32 %v1842_v63, %v1730_v41  ;;  %v1844_v51 = vpop.f32.mrb[41].mxu1 }
 0x292   : > { %5103 = vmatpush1.bf16.msra.mxu1 %v7803_v55  ;;  %v1845_v17 = vadd.f32 %v1844_v51, %v1732_v4  ;;  %v1846_v40 = vpop.f32.mrb[42].mxu1  ;;  %5134 = vmatprep.mubr.bf16.mxu1 %v8894_v33 }
 0x293   : > { %6805 = vmatprep.subr.msk.bf16.mxu1 %vm422_vm1, %v7816_v61  ;;  %v1847_v46 = vpop.f32.mrb[43].mxu1 }
 0x294   : > { %v1934_v18 = vpop.f32.mrb[44].mxu0 }
 0x295   : > { %v1982_v9 = vadd.f32 %v1934_v18, %v1802_v24  ;;  %6800 = vmatmul.mubr.msk.bf16.vlgmr.msra.gmra.mrb[144].mxu0 %vm418_vm3, %v5057_v27  ;;  %v1936_v52 = vpop.f32.mrb[45].mxu0 }
 0x296   : > { %5147 = vmatpush1.bf16.msra.mxu0 %v7806_v56  ;;  %v1983_v50 = vadd.f32 %v1936_v52, %v1804_v22  ;;  %5178 = vmatprep.mubr.bf16.mxu0 %v8894_v33  ;;  %v1938_v55 = vpop.f32.mrb[46].mxu0 }
 0x297   : > { %6807 = vmatprep.subr.msk.bf16.mxu0 %vm422_vm1, %v7833_v11  ;;  %v1939_v8 = vpop.f32.mrb[47].mxu0 }
 0x298   : > { %v1975_v3 = vpop.f32.mrb[44].mxu1 }
 0x299   : > { %v1984_v32 = vadd.f32 %v1975_v3, %v1843_v6  ;;  %v1977_v58 = vpop.f32.mrb[45].mxu1  ;;  %6802 = vmatmul.mubr.msk.bf16.vlgmr.msra.gmra.mrb[144].mxu1 %vm418_vm3, %v5057_v27 }
 0x29a   : > { %v1985_v61 = vadd.f32 %v1977_v58, %v1845_v17  ;;  %5188 = vmatpush1.bf16.msra.mxu1 %v7823_v62  ;;  %5219 = vmatprep.mubr.bf16.mxu1 %v8894_v33  ;;  %v1979_v56 = vpop.f32.mrb[46].mxu1 }
 0x29b   : > { %6809 = vmatprep.subr.msk.bf16.mxu1 %vm422_vm1, %v7850_v20  ;;  %v1980_v41 = vpop.f32.mrb[47].mxu1  ;;  %v5229_v20 = vld [vmem:[#allocation8 + $0x4] sm:$0x3] }
 0x29d   : > { %6804 = vmatmul.mubr.msk.bf16.vlgmr.msra.gmra.mrb[148].mxu0 %vm418_vm3, %v5055_v53 }
 0x29e   : > { %5234 = vmatpush1.bf16.msra.mxu0 %v7837_v12  ;;  %5265 = vmatprep.mubr.bf16.mxu0 %v8894_v33 }
 0x29f   : > { %6811 = vmatprep.subr.msk.bf16.mxu0 %vm422_vm1, %v7866_v28  ;;  %v2071_v11 = vpop.f32.mrb[48].mxu0 }
 0x2a0   : > { %v2119_v35 = vadd.f32 %v2071_v11, %v1982_v9  ;;  %v2073_v62 = vpop.f32.mrb[49].mxu0  ;;  %v5411_v9 = vld [vmem:[#allocation8 + $0x8] sm:$0x3] }
 0x2a1   : > { %v2120_v4 = vadd.f32 %v2073_v62, %v1983_v50  ;;  %6806 = vmatmul.mubr.msk.bf16.vlgmr.msra.gmra.mrb[148].mxu1 %vm418_vm3, %v5055_v53  ;;  %v2075_v25 = vpop.f32.mrb[50].mxu0  ;;  %v5502_v53 = vld [vmem:[#allocation8 + $0xa] sm:$0x3] }
 0x2a2   : > { %5275 = vmatpush1.bf16.msra.mxu1 %v7858_v23  ;;  %v2076_v5 = vpop.f32.mrb[51].mxu0  ;;  %5306 = vmatprep.mubr.bf16.mxu1 %v8894_v33 }
 0x2a3   : > { %6813 = vmatprep.subr.msk.bf16.mxu1 %vm422_vm1, %v7882_v34  ;;  %v5593_v5 = vld [vmem:[#allocation8 + $0xc] sm:$0x3] }
 0x2a4   : > { %v2112_v12 = vpop.f32.mrb[48].mxu1 }
 0x2a5   : > { %v2121_v42 = vadd.f32 %v2112_v12, %v1984_v32  ;;  %v2114_v37 = vpop.f32.mrb[49].mxu1  ;;  %6808 = vmatmul.mubr.msk.bf16.vlgmr.msra.gmra.mrb[152].mxu0 %vm418_vm3, %v5229_v20 }
 0x2a6   : > { %v2122_v28 = vadd.f32 %v2114_v37, %v1985_v61  ;;  %5325 = vmatpush1.bf16.msra.mxu0 %v7874_v29  ;;  %v2116_v2 = vpop.f32.mrb[50].mxu1  ;;  %5356 = vmatprep.mubr.bf16.mxu0 %v8894_v33 }
 0x2a7   : > { %6815 = vmatprep.subr.msk.bf16.mxu0 %vm422_vm1, %v7903_v43  ;;  %v2162_v23 = vpop.f32.mrb[52].mxu0  ;;  %v2117_v21 = vpop.f32.mrb[51].mxu1 }
 0x2a8   : > { %v2210_v24 = vadd.f32 %v2162_v23, %v2119_v35  ;;  %v2164_v22 = vpop.f32.mrb[53].mxu0  ;;  %v5684_v21 = vld [vmem:[#allocation8 + $0xe] sm:$0x3] }
 0x2a9   : > { %v2211_v14 = vadd.f32 %v2164_v22, %v2120_v4  ;;  %6810 = vmatmul.mubr.msk.bf16.vlgmr.msra.gmra.mrb[152].mxu1 %vm418_vm3, %v5229_v20  ;;  %v2166_v34 = vpop.f32.mrb[54].mxu0 }
 0x2aa   : > { %5366 = vmatpush1.bf16.msra.mxu1 %v7890_v36  ;;  %v2167_v63 = vpop.f32.mrb[55].mxu0  ;;  %5397 = vmatprep.mubr.bf16.mxu1 %v8894_v33 }
 0x2ab   : > { %6817 = vmatprep.subr.msk.bf16.mxu1 %vm422_vm1, %v7919_v54  ;;  %v8895_v63 = vld [vmem:[#allocation20_spill] sm:$0xff] }
 0x2ac   : > { %v2203_v29 = vpop.f32.mrb[52].mxu1 }
 0x2ad   : > { %v2212_v6 = vadd.f32 %v2203_v29, %v2121_v42  ;;  %v2205_v43 = vpop.f32.mrb[53].mxu1  ;;  %6812 = vmatmul.mubr.msk.bf16.vlgmr.msra.gmra.mrb[156].mxu0 %vm418_vm3, %v5320_v44 }
 0x2ae   : > { %v2213_v51 = vadd.f32 %v2205_v43, %v2122_v28  ;;  %5416 = vmatpush1.bf16.msra.mxu0 %v7907_v45  ;;  %v2207_v17 = vpop.f32.mrb[54].mxu1  ;;  %5447 = vmatprep.mubr.bf16.mxu0 %v8894_v33  ;;  %v5775_v43 = vld [vmem:[#allocation8 + $0x10] sm:$0x3] }
 0x2af   : > { %6819 = vmatprep.subr.msk.bf16.mxu0 %vm422_vm1, %v7935_v0  ;;  %v2299_v36 = vpop.f32.mrb[56].mxu0  ;;  %v2208_v27 = vpop.f32.mrb[55].mxu1 }
 0x2b0   : > { %v2347_v40 = vadd.f32 %v2299_v36, %v2210_v24  ;;  %v2301_v46 = vpop.f32.mrb[57].mxu0 }
 0x2b1   : > { %v2348_v18 = vadd.f32 %v2301_v46, %v2211_v14  ;;  %6814 = vmatmul.mubr.msk.bf16.vlgmr.msra.gmra.mrb[156].mxu1 %vm418_vm3, %v5320_v44  ;;  %v2303_v54 = vpop.f32.mrb[58].mxu0 }
 0x2b2   : > { %5457 = vmatpush1.bf16.msra.mxu1 %v7925_v57  ;;  %v2304_v52 = vpop.f32.mrb[59].mxu0  ;;  %5488 = vmatprep.mubr.bf16.mxu1 %v8894_v33 }
 0x2b3   : > { %6821 = vmatprep.subr.msk.bf16.mxu1 %vm422_vm1, %v7951_v15 }
 0x2b4   : > { %v2340_v45 = vpop.f32.mrb[56].mxu1 }
 0x2b5   : > { %v2349_v50 = vadd.f32 %v2340_v45, %v2212_v6  ;;  %v2342_v0 = vpop.f32.mrb[57].mxu1  ;;  %6816 = vmatmul.mubr.msk.bf16.vlgmr.msra.gmra.mrb[160].mxu0 %vm418_vm3, %v5411_v9 }
 0x2b6   : > { %v2350_v55 = vadd.f32 %v2342_v0, %v2213_v51  ;;  %5507 = vmatpush1.bf16.msra.mxu0 %v7942_v1  ;;  %v2344_v8 = vpop.f32.mrb[58].mxu1  ;;  %5538 = vmatprep.mubr.bf16.mxu0 %v8894_v33 }
 0x2b7   : > { %6823 = vmatprep.subr.msk.bf16.mxu0 %vm422_vm1, %v7972_v30  ;;  %v2435_v57 = vpop.f32.mrb[60].mxu0  ;;  %v2345_v3 = vpop.f32.mrb[59].mxu1 }
 0x2b8   : > { %v2483_v32 = vadd.f32 %v2435_v57, %v2347_v40  ;;  %v2437_v58 = vpop.f32.mrb[61].mxu0 }
 0x2b9   : > { %v2484_v61 = vadd.f32 %v2437_v58, %v2348_v18  ;;  %6818 = vmatmul.mubr.msk.bf16.vlgmr.msra.gmra.mrb[160].mxu1 %vm418_vm3, %v5411_v9  ;;  %v2439_v15 = vpop.f32.mrb[62].mxu0 }
 0x2ba   : > { %5548 = vmatpush1.bf16.msra.mxu1 %v7958_v16  ;;  %v2440_v56 = vpop.f32.mrb[63].mxu0  ;;  %5579 = vmatprep.mubr.bf16.mxu1 %v8894_v33 }
 0x2bb   : > { %6825 = vmatprep.subr.msk.bf16.mxu1 %vm422_vm1, %v7986_v38 }
 0x2bc   : > { %v2476_v1 = vpop.f32.mrb[60].mxu1 }
 0x2bd   : > { %v2485_v41 = vadd.f32 %v2476_v1, %v2349_v50  ;;  %v2478_v30 = vpop.f32.mrb[61].mxu1  ;;  %6820 = vmatmul.mubr.msk.bf16.vlgmr.msra.gmra.mrb[164].mxu0 %vm418_vm3, %v5502_v53 }
 0x2be   : > { %v2486_v11 = vadd.f32 %v2478_v30, %v2350_v55  ;;  %5598 = vmatpush1.bf16.msra.mxu0 %v7975_v31  ;;  %v2480_v35 = vpop.f32.mrb[62].mxu1  ;;  %5629 = vmatprep.mubr.bf16.mxu0 %v8894_v33 }
 0x2bf   : > { %6827 = vmatprep.subr.msk.bf16.mxu0 %vm422_vm1, %v8002_v47  ;;  %v2571_v16 = vpop.f32.mrb[64].mxu0  ;;  %v2481_v62 = vpop.f32.mrb[63].mxu1 }
 0x2c0   : > { %v2619_v4 = vadd.f32 %v2571_v16, %v2483_v32  ;;  %v2573_v25 = vpop.f32.mrb[65].mxu0 }
 0x2c1   : > { %v2620_v20 = vadd.f32 %v2573_v25, %v2484_v61  ;;  %6822 = vmatmul.mubr.msk.bf16.vlgmr.msra.gmra.mrb[164].mxu1 %vm418_vm3, %v5502_v53  ;;  %v2575_v38 = vpop.f32.mrb[66].mxu0 }
 0x2c2   : > { %5639 = vmatpush1.bf16.msra.mxu1 %v7996_v39  ;;  %v2576_v12 = vpop.f32.mrb[67].mxu0  ;;  %5670 = vmatprep.mubr.bf16.mxu1 %v8894_v33 }
 0x2c3   : > { %6829 = vmatprep.subr.msk.bf16.mxu1 %vm422_vm1, %v8018_v59 }
 0x2c4   : > { %v2612_v31 = vpop.f32.mrb[64].mxu1 }
 0x2c5   : > { %v2621_v42 = vadd.f32 %v2612_v31, %v2485_v41  ;;  %v2614_v47 = vpop.f32.mrb[65].mxu1  ;;  %6824 = vmatmul.mubr.msk.bf16.vlgmr.msra.gmra.mrb[168].mxu0 %vm418_vm3, %v5593_v5 }
 0x2c6   : > { %v2622_v37 = vadd.f32 %v2614_v47, %v2486_v11  ;;  %5689 = vmatpush1.bf16.msra.mxu0 %v8009_v48  ;;  %v2616_v28 = vpop.f32.mrb[66].mxu1  ;;  %5720 = vmatprep.mubr.bf16.mxu0 %v8894_v33 }
 0x2c7   : > { %6831 = vmatprep.subr.msk.bf16.mxu0 %vm422_vm1, %v8039_v7  ;;  %v2617_v39 = vpop.f32.mrb[67].mxu1 }
 0x2c9   : > { %v2707_v2 = vpop.f32.mrb[68].mxu0  ;;  %6826 = vmatmul.mubr.msk.bf16.vlgmr.msra.gmra.mrb[168].mxu1 %vm418_vm3, %v5593_v5 }
 0x2ca   : > { %v8593_v23 = vadd.f32 %v2707_v2, %v2619_v4  ;;  %v2709_v59 = vpop.f32.mrb[69].mxu0  ;;  %5730 = vmatpush1.bf16.msra.mxu1 %v8025_v60  ;;  %5761 = vmatprep.mubr.bf16.mxu1 %v8894_v33 }
 0x2cb   : > { %v8597_v24 = vadd.f32 %v2709_v59, %v2620_v20  ;;  %6833 = vmatprep.subr.msk.bf16.mxu1 %vm422_vm1, %v8054_v26  ;;  %v2711_v48 = vpop.f32.mrb[70].mxu0  ;;  %v8896_v26 = vld [vmem:[#allocation21_spill] sm:$0xff] }
 0x2cc   : > { %v2748_v22 = vpop.f32.mrb[68].mxu1  ;;  %v2712_v7 = vpop.f32.mrb[71].mxu0 }
 0x2cd   : > { %v8601_v14 = vadd.f32 %v2748_v22, %v2621_v42  ;;  %v2750_v34 = vpop.f32.mrb[69].mxu1  ;;  %6828 = vmatmul.mubr.msk.bf16.vlgmr.msra.gmra.mrb[172].mxu0 %vm418_vm3, %v5684_v21 }
 0x2ce   : > { %v8604_v44 = vadd.f32 %v2750_v34, %v2622_v37  ;;  %5780 = vmatpush1.bf16.msra.mxu0 %v8895_v63  ;;  %v2752_v60 = vpop.f32.mrb[70].mxu1  ;;  %5811 = vmatprep.mubr.bf16.mxu0 %v8894_v33 }
 0x2cf   : > { %v2753_v29 = vpop.f32.mrb[71].mxu1 }
 0x2d1   : > { %6830 = vmatmul.mubr.msk.bf16.vlgmr.msra.gmra.mrb[172].mxu1 %vm418_vm3, %v5684_v21  ;;  %v2860_v6 = vpop.f32.mrb[72].mxu0 }
 0x2d2   : > { %5821 = vmatpush1.bf16.msra.mxu1 %v8896_v26  ;;  %5852 = vmatprep.mubr.bf16.mxu1 %v8894_v33  ;;  %v2862_v51 = vpop.f32.mrb[73].mxu0 }
 0x2d3   : > { %v2864_v17 = vpop.f32.mrb[74].mxu0 }
 0x2d4   : > { %v2901_v36 = vpop.f32.mrb[72].mxu1  ;;  %v2865_v27 = vpop.f32.mrb[75].mxu0 }
 0x2d5   : > { %6832 = vmatmul.mubr.msk.bf16.vlgmr.msra.gmra.mrb[176].mxu0 %vm418_vm3, %v5775_v43  ;;  %v2903_v40 = vpop.f32.mrb[73].mxu1 }
 0x2d6   : > { %v2905_v46 = vpop.f32.mrb[74].mxu1  ;;  %5941 = vmatprep.mubr.bf16.mxu0 %v8894_v33 }
 0x2d7   : > { %v2906_v18 = vpop.f32.mrb[75].mxu1 }
 0x2d9   : > { %6834 = vmatmul.mubr.msk.bf16.vlgmr.msra.gmra.mrb[176].mxu1 %vm418_vm3, %v5775_v43 }
 0x2da   : > { %5982 = vmatprep.mubr.bf16.mxu1 %v8894_v33 }
 0x2dc   : > { %v2972_v54 = vpop.f32.mrb[76].mxu0 }
 0x2dd   : > { %v2973_v9 = vadd.f32 %v2972_v54, %v2860_v6  ;;  %v2974_v52 = vpop.f32.mrb[77].mxu0 }
 0x2de   : > { %v2975_v45 = vadd.f32 %v2974_v52, %v2862_v51  ;;  %v2976_v50 = vpop.f32.mrb[78].mxu0 }
 0x2df   : > { %v2977_v0 = vpop.f32.mrb[79].mxu0 }
 0x2e1   : > { %v3013_v55 = vpop.f32.mrb[76].mxu1 }
 0x2e2   : > { %v3014_v8 = vadd.f32 %v3013_v55, %v2901_v36  ;;  %v3015_v57 = vpop.f32.mrb[77].mxu1 }
 0x2e3   : > { %v3016_v3 = vadd.f32 %v3015_v57, %v2903_v40  ;;  %v3017_v32 = vpop.f32.mrb[78].mxu1 }
 0x2e4   : > { %v3018_v58 = vpop.f32.mrb[79].mxu1  ;;  %v3105_v61 = vpop.f32.mrb[80].mxu0 }
 0x2e5   : > { %v3153_v15 = vadd.f32 %v3105_v61, %v2973_v9  ;;  %v3107_v53 = vpop.f32.mrb[81].mxu0 }
 0x2e6   : > { %v3154_v56 = vadd.f32 %v3107_v53, %v2975_v45  ;;  %v3109_v1 = vpop.f32.mrb[82].mxu0 }
 0x2e7   : > { %v3110_v41 = vpop.f32.mrb[83].mxu0 }
 0x2e9   : > { %v3146_v30 = vpop.f32.mrb[80].mxu1 }
 0x2ea   : > { %v3155_v11 = vadd.f32 %v3146_v30, %v3014_v8  ;;  %v3148_v35 = vpop.f32.mrb[81].mxu1 }
 0x2eb   : > { %v3156_v16 = vadd.f32 %v3148_v35, %v3016_v3  ;;  %v3150_v62 = vpop.f32.mrb[82].mxu1 }
 0x2ec   : > { %v3151_v4 = vpop.f32.mrb[83].mxu1 }
 0x2f0   : > { %v3241_v25 = vpop.f32.mrb[84].mxu0 }
 0x2f1   : > { %v3289_v20 = vadd.f32 %v3241_v25, %v3153_v15  ;;  %v3243_v38 = vpop.f32.mrb[85].mxu0 }
 0x2f2   : > { %v3290_v5 = vadd.f32 %v3243_v38, %v3154_v56  ;;  %v3245_v12 = vpop.f32.mrb[86].mxu0 }
 0x2f3   : > { %v3246_v31 = vpop.f32.mrb[87].mxu0 }
 0x2f4   : > { %v3282_v42 = vpop.f32.mrb[84].mxu1 }
 0x2f5   : > { %v3291_v47 = vadd.f32 %v3282_v42, %v3155_v11  ;;  %v3284_v37 = vpop.f32.mrb[85].mxu1 }
 0x2f6   : > { %v3292_v28 = vadd.f32 %v3284_v37, %v3156_v16  ;;  %v3286_v39 = vpop.f32.mrb[86].mxu1 }
 0x2f7   : > { %v3287_v2 = vpop.f32.mrb[87].mxu1 }
 0x2f8   : > { %v3332_v59 = vpop.f32.mrb[88].mxu0 }
 0x2f9   : > { %v3380_v21 = vadd.f32 %v3332_v59, %v3289_v20  ;;  %v3334_v48 = vpop.f32.mrb[89].mxu0 }
 0x2fa   : > { %v3381_v22 = vadd.f32 %v3334_v48, %v3290_v5  ;;  %v3336_v7 = vpop.f32.mrb[90].mxu0 }
 0x2fb   : > { %v3337_v34 = vpop.f32.mrb[91].mxu0 }
 0x2fc   : > { %v3373_v63 = vpop.f32.mrb[88].mxu1 }
 0x2fd   : > { %v3382_v60 = vadd.f32 %v3373_v63, %v3291_v47  ;;  %v3375_v29 = vpop.f32.mrb[89].mxu1 }
 0x2fe   : > { %v3383_v6 = vadd.f32 %v3375_v29, %v3292_v28  ;;  %v3377_v26 = vpop.f32.mrb[90].mxu1 }
 0x2ff   : > { %v3378_v43 = vpop.f32.mrb[91].mxu1 }
 0x300   : > { %v3468_v51 = vpop.f32.mrb[92].mxu0 }
 0x301   : > { %v3516_v17 = vadd.f32 %v3468_v51, %v3380_v21  ;;  %v3470_v36 = vpop.f32.mrb[93].mxu0 }
 0x302   : > { %v3517_v27 = vadd.f32 %v3470_v36, %v3381_v22  ;;  %v3472_v40 = vpop.f32.mrb[94].mxu0 }
 0x303   : > { %v3473_v46 = vpop.f32.mrb[95].mxu0 }
 0x304   : > { %v3509_v18 = vpop.f32.mrb[92].mxu1 }
 0x305   : > { %v3518_v54 = vadd.f32 %v3509_v18, %v3382_v60  ;;  %v3511_v9 = vpop.f32.mrb[93].mxu1 }
 0x306   : > { %v3519_v52 = vadd.f32 %v3511_v9, %v3383_v6  ;;  %v3513_v45 = vpop.f32.mrb[94].mxu1 }
 0x307   : > { %v3514_v50 = vpop.f32.mrb[95].mxu1 }
 0x308   : > { %v3604_v0 = vpop.f32.mrb[96].mxu0 }
 0x309   : > { %v3652_v55 = vadd.f32 %v3604_v0, %v3516_v17  ;;  %v3606_v8 = vpop.f32.mrb[97].mxu0 }
 0x30a   : > { %v3653_v57 = vadd.f32 %v3606_v8, %v3517_v27  ;;  %v3608_v3 = vpop.f32.mrb[98].mxu0 }
 0x30b   : > { %v3609_v32 = vpop.f32.mrb[99].mxu0 }
 0x30c   : > { %v3645_v58 = vpop.f32.mrb[96].mxu1 }
 0x30d   : > { %v3654_v61 = vadd.f32 %v3645_v58, %v3518_v54  ;;  %v3647_v15 = vpop.f32.mrb[97].mxu1 }
 0x30e   : > { %v3655_v53 = vadd.f32 %v3647_v15, %v3519_v52  ;;  %v3649_v56 = vpop.f32.mrb[98].mxu1 }
 0x30f   : > { %v3650_v1 = vpop.f32.mrb[99].mxu1 }
 0x310   : > { %v3740_v41 = vpop.f32.mrb[100].mxu0 }
 0x311   : > { %v3788_v30 = vadd.f32 %v3740_v41, %v3652_v55  ;;  %v3742_v11 = vpop.f32.mrb[101].mxu0 }
 0x312   : > { %v3789_v35 = vadd.f32 %v3742_v11, %v3653_v57  ;;  %v3744_v16 = vpop.f32.mrb[102].mxu0 }
 0x313   : > { %v3745_v62 = vpop.f32.mrb[103].mxu0 }
 0x314   : > { %v3781_v4 = vpop.f32.mrb[100].mxu1 }
 0x315   : > { %v3790_v25 = vadd.f32 %v3781_v4, %v3654_v61  ;;  %v3783_v20 = vpop.f32.mrb[101].mxu1 }
 0x316   : > { %v3791_v38 = vadd.f32 %v3783_v20, %v3655_v53  ;;  %v3785_v5 = vpop.f32.mrb[102].mxu1 }
 0x317   : > { %v3786_v12 = vpop.f32.mrb[103].mxu1 }
 0x318   : > { %v3876_v31 = vpop.f32.mrb[104].mxu0 }
 0x319   : > { %v8615_v42 = vadd.f32 %v3876_v31, %v3788_v30  ;;  %v3878_v47 = vpop.f32.mrb[105].mxu0 }
 0x31a   : > { %v8617_v37 = vadd.f32 %v3878_v47, %v3789_v35  ;;  %v3880_v28 = vpop.f32.mrb[106].mxu0 }
 0x31b   : > { %v3881_v39 = vpop.f32.mrb[107].mxu0 }
 0x31c   : > { %v3917_v2 = vpop.f32.mrb[104].mxu1 }
 0x31d   : > { %v8619_v59 = vadd.f32 %v3917_v2, %v3790_v25  ;;  %v3919_v21 = vpop.f32.mrb[105].mxu1 }
 0x31e   : > { %v8621_v48 = vadd.f32 %v3919_v21, %v3791_v38  ;;  %v3921_v22 = vpop.f32.mrb[106].mxu1 }
 0x31f   : > { %v3922_v7 = vpop.f32.mrb[107].mxu1 }
 0x320   : > { %v4029_v34 = vpop.f32.mrb[108].mxu0 }
 0x321   : > { %v4031_v63 = vpop.f32.mrb[109].mxu0 }
 0x322   : > { %v4033_v60 = vpop.f32.mrb[110].mxu0 }
 0x323   : > { %v4034_v29 = vpop.f32.mrb[111].mxu0 }
 0x324   : > { %v4070_v6 = vpop.f32.mrb[108].mxu1 }
 0x325   : > { %v4072_v26 = vpop.f32.mrb[109].mxu1 }
 0x326   : > { %v4074_v43 = vpop.f32.mrb[110].mxu1 }
 0x327   : > { %v4075_v51 = vpop.f32.mrb[111].mxu1 }
 0x328   : > { %v4126_v17 = vpop.f32.mrb[112].mxu0 }
 0x329   : > { %v4127_v36 = vadd.f32 %v4126_v17, %v4029_v34  ;;  %v4128_v27 = vpop.f32.mrb[113].mxu0 }
 0x32a   : > { %v4129_v40 = vadd.f32 %v4128_v27, %v4031_v63  ;;  %v4130_v46 = vpop.f32.mrb[114].mxu0 }
 0x32b   : > { %v4131_v18 = vpop.f32.mrb[115].mxu0 }
 0x32c   : > { %v4167_v54 = vpop.f32.mrb[112].mxu1 }
 0x32d   : > { %v4168_v9 = vadd.f32 %v4167_v54, %v4070_v6  ;;  %v4169_v52 = vpop.f32.mrb[113].mxu1 }
 0x32e   : > { %v4170_v45 = vadd.f32 %v4169_v52, %v4072_v26  ;;  %v4171_v50 = vpop.f32.mrb[114].mxu1 }
 0x32f   : > { %v4172_v0 = vpop.f32.mrb[115].mxu1 }
 0x330   : > { %v4259_v55 = vpop.f32.mrb[116].mxu0 }
 0x331   : > { %v4307_v8 = vadd.f32 %v4259_v55, %v4127_v36  ;;  %v4261_v57 = vpop.f32.mrb[117].mxu0 }
 0x332   : > { %v4308_v3 = vadd.f32 %v4261_v57, %v4129_v40  ;;  %v4263_v32 = vpop.f32.mrb[118].mxu0 }
 0x333   : > { %v4264_v58 = vpop.f32.mrb[119].mxu0 }
 0x334   : > { %v4300_v61 = vpop.f32.mrb[116].mxu1 }
 0x335   : > { %v4309_v15 = vadd.f32 %v4300_v61, %v4168_v9  ;;  %v4302_v53 = vpop.f32.mrb[117].mxu1 }
 0x336   : > { %v4310_v56 = vadd.f32 %v4302_v53, %v4170_v45  ;;  %v4304_v1 = vpop.f32.mrb[118].mxu1 }
 0x337   : > { %v4305_v41 = vpop.f32.mrb[119].mxu1 }
 0x338   : > { %v4374_v30 = vpop.f32.mrb[120].mxu0 }
 0x339   : > { %v4422_v11 = vadd.f32 %v4374_v30, %v4307_v8  ;;  %v4376_v35 = vpop.f32.mrb[121].mxu0 }
 0x33a   : > { %v4423_v16 = vadd.f32 %v4376_v35, %v4308_v3  ;;  %v4378_v62 = vpop.f32.mrb[122].mxu0 }
 0x33b   : > { %v4379_v4 = vpop.f32.mrb[123].mxu0 }
 0x33c   : > { %v4415_v25 = vpop.f32.mrb[120].mxu1 }
 0x33d   : > { %v4424_v20 = vadd.f32 %v4415_v25, %v4309_v15  ;;  %v4417_v38 = vpop.f32.mrb[121].mxu1 }
 0x33e   : > { %v4425_v5 = vadd.f32 %v4417_v38, %v4310_v56  ;;  %v4419_v12 = vpop.f32.mrb[122].mxu1 }
 0x33f   : > { %v4420_v31 = vpop.f32.mrb[123].mxu1 }
 0x340   : > { %v4465_v47 = vpop.f32.mrb[124].mxu0 }
 0x341   : > { %v4513_v28 = vadd.f32 %v4465_v47, %v4422_v11  ;;  %v4467_v39 = vpop.f32.mrb[125].mxu0 }
 0x342   : > { %v4514_v2 = vadd.f32 %v4467_v39, %v4423_v16  ;;  %v4469_v21 = vpop.f32.mrb[126].mxu0 }
 0x343   : > { %v4470_v22 = vpop.f32.mrb[127].mxu0 }
 0x344   : > { %v4506_v7 = vpop.f32.mrb[124].mxu1 }
 0x345   : > { %v4515_v34 = vadd.f32 %v4506_v7, %v4424_v20  ;;  %v4508_v63 = vpop.f32.mrb[125].mxu1 }
 0x346   : > { %v4516_v60 = vadd.f32 %v4508_v63, %v4425_v5  ;;  %v4510_v29 = vpop.f32.mrb[126].mxu1 }
 0x347   : > { %v4511_v6 = vpop.f32.mrb[127].mxu1 }
 0x348   : > { %v4601_v26 = vpop.f32.mrb[128].mxu0 }
 0x349   : > { %v4649_v43 = vadd.f32 %v4601_v26, %v4513_v28  ;;  %v4603_v51 = vpop.f32.mrb[129].mxu0 }
 0x34a   : > { %v4650_v17 = vadd.f32 %v4603_v51, %v4514_v2  ;;  %v4605_v36 = vpop.f32.mrb[130].mxu0 }
 0x34b   : > { %v4606_v27 = vpop.f32.mrb[131].mxu0 }
 0x34c   : > { %v4642_v40 = vpop.f32.mrb[128].mxu1 }
 0x34d   : > { %v4651_v46 = vadd.f32 %v4642_v40, %v4515_v34  ;;  %v4644_v18 = vpop.f32.mrb[129].mxu1 }
 0x34e   : > { %v4652_v54 = vadd.f32 %v4644_v18, %v4516_v60  ;;  %v4646_v9 = vpop.f32.mrb[130].mxu1 }
 0x34f   : > { %v4647_v52 = vpop.f32.mrb[131].mxu1 }
 0x350   : > { %v4716_v45 = vpop.f32.mrb[132].mxu0 }
 0x351   : > { %v4764_v50 = vadd.f32 %v4716_v45, %v4649_v43  ;;  %v4718_v0 = vpop.f32.mrb[133].mxu0 }
 0x352   : > { %v4765_v55 = vadd.f32 %v4718_v0, %v4650_v17  ;;  %v4720_v8 = vpop.f32.mrb[134].mxu0 }
 0x353   : > { %v4721_v57 = vpop.f32.mrb[135].mxu0 }
 0x354   : > { %v4757_v3 = vpop.f32.mrb[132].mxu1 }
 0x355   : > { %v4766_v32 = vadd.f32 %v4757_v3, %v4651_v46  ;;  %v4759_v58 = vpop.f32.mrb[133].mxu1 }
 0x356   : > { %v4767_v61 = vadd.f32 %v4759_v58, %v4652_v54  ;;  %v4761_v15 = vpop.f32.mrb[134].mxu1 }
 0x357   : > { %v4762_v53 = vpop.f32.mrb[135].mxu1 }
 0x358   : > { %v4852_v56 = vpop.f32.mrb[136].mxu0 }
 0x359   : > { %v4900_v1 = vadd.f32 %v4852_v56, %v4764_v50  ;;  %v4854_v41 = vpop.f32.mrb[137].mxu0 }
 0x35a   : > { %v4901_v30 = vadd.f32 %v4854_v41, %v4765_v55  ;;  %v4856_v11 = vpop.f32.mrb[138].mxu0 }
 0x35b   : > { %v4857_v35 = vpop.f32.mrb[139].mxu0 }
 0x35c   : > { %v4893_v16 = vpop.f32.mrb[136].mxu1 }
 0x35d   : > { %v4902_v62 = vadd.f32 %v4893_v16, %v4766_v32  ;;  %v4895_v4 = vpop.f32.mrb[137].mxu1 }
 0x35e   : > { %v4903_v25 = vadd.f32 %v4895_v4, %v4767_v61  ;;  %v4897_v20 = vpop.f32.mrb[138].mxu1 }
 0x35f   : > { %v4898_v38 = vpop.f32.mrb[139].mxu1 }
 0x360   : > { %v4988_v5 = vpop.f32.mrb[140].mxu0 }
 0x361   : > { %v8623_v12 = vadd.f32 %v4988_v5, %v4900_v1  ;;  %v4990_v31 = vpop.f32.mrb[141].mxu0 }
 0x362   : > { %v8625_v47 = vadd.f32 %v4990_v31, %v4901_v30  ;;  %v4992_v28 = vpop.f32.mrb[142].mxu0 }
 0x363   : > { %v4993_v39 = vpop.f32.mrb[143].mxu0 }
 0x364   : > { %v5029_v2 = vpop.f32.mrb[140].mxu1 }
 0x365   : > { %v8627_v21 = vadd.f32 %v5029_v2, %v4902_v62  ;;  %v5031_v22 = vpop.f32.mrb[141].mxu1 }
 0x366   : > { %v8629_v7 = vadd.f32 %v5031_v22, %v4903_v25  ;;  %v5033_v34 = vpop.f32.mrb[142].mxu1 }
 0x367   : > { %v5034_v63 = vpop.f32.mrb[143].mxu1 }
 0x368   : > { %v5095_v60 = vpop.f32.mrb[144].mxu0 }
 0x369   : > { %v5097_v29 = vpop.f32.mrb[145].mxu0 }
 0x36a   : > { %v5099_v6 = vpop.f32.mrb[146].mxu0 }
 0x36b   : > { %v5100_v26 = vpop.f32.mrb[147].mxu0 }
 0x36c   : > { %v5136_v43 = vpop.f32.mrb[144].mxu1 }
 0x36d   : > { %v5138_v51 = vpop.f32.mrb[145].mxu1 }
 0x36e   : > { %v5140_v17 = vpop.f32.mrb[146].mxu1 }
 0x36f   : > { %v5141_v36 = vpop.f32.mrb[147].mxu1 }
 0x370   : > { %v5180_v27 = vpop.f32.mrb[148].mxu0 }
 0x371   : > { %v5181_v40 = vadd.f32 %v5180_v27, %v5095_v60  ;;  %v5182_v46 = vpop.f32.mrb[149].mxu0 }
 0x372   : > { %v5183_v18 = vadd.f32 %v5182_v46, %v5097_v29  ;;  %v5184_v54 = vpop.f32.mrb[150].mxu0 }
 0x373   : > { %v5185_v9 = vpop.f32.mrb[151].mxu0 }
 0x374   : > { %v5221_v52 = vpop.f32.mrb[148].mxu1 }
 0x375   : > { %v5222_v45 = vadd.f32 %v5221_v52, %v5136_v43  ;;  %v5223_v50 = vpop.f32.mrb[149].mxu1 }
 0x376   : > { %v5224_v0 = vadd.f32 %v5223_v50, %v5138_v51  ;;  %v5225_v55 = vpop.f32.mrb[150].mxu1 }
 0x377   : > { %v5226_v8 = vpop.f32.mrb[151].mxu1 }
 0x378   : > { %v5267_v57 = vpop.f32.mrb[152].mxu0 }
 0x379   : > { %v5315_v3 = vadd.f32 %v5267_v57, %v5181_v40  ;;  %v5269_v32 = vpop.f32.mrb[153].mxu0 }
 0x37a   : > { %v5316_v58 = vadd.f32 %v5269_v32, %v5183_v18  ;;  %v5271_v61 = vpop.f32.mrb[154].mxu0 }
 0x37b   : > { %v5272_v15 = vpop.f32.mrb[155].mxu0 }
 0x37c   : > { %v5308_v53 = vpop.f32.mrb[152].mxu1 }
 0x37d   : > { %v5317_v56 = vadd.f32 %v5308_v53, %v5222_v45  ;;  %v5310_v1 = vpop.f32.mrb[153].mxu1 }
 0x37e   : > { %v5318_v41 = vadd.f32 %v5310_v1, %v5224_v0  ;;  %v5312_v30 = vpop.f32.mrb[154].mxu1 }
 0x37f   : > { %v5313_v11 = vpop.f32.mrb[155].mxu1 }
 0x380   : > { %v5358_v35 = vpop.f32.mrb[156].mxu0 }
 0x381   : > { %v5406_v16 = vadd.f32 %v5358_v35, %v5315_v3  ;;  %v5360_v62 = vpop.f32.mrb[157].mxu0 }
 0x382   : > { %v5407_v4 = vadd.f32 %v5360_v62, %v5316_v58  ;;  %v5362_v25 = vpop.f32.mrb[158].mxu0 }
 0x383   : > { %v5363_v20 = vpop.f32.mrb[159].mxu0 }
 0x384   : > { %v5399_v38 = vpop.f32.mrb[156].mxu1 }
 0x385   : > { %v5408_v5 = vadd.f32 %v5399_v38, %v5317_v56  ;;  %v5401_v31 = vpop.f32.mrb[157].mxu1 }
 0x386   : > { %v5409_v28 = vadd.f32 %v5401_v31, %v5318_v41  ;;  %v5403_v39 = vpop.f32.mrb[158].mxu1 }
 0x387   : > { %v5404_v2 = vpop.f32.mrb[159].mxu1 }
 0x388   : > { %v5449_v22 = vpop.f32.mrb[160].mxu0 }
 0x389   : > { %v5497_v34 = vadd.f32 %v5449_v22, %v5406_v16  ;;  %v5451_v63 = vpop.f32.mrb[161].mxu0 }
 0x38a   : > { %v5498_v60 = vadd.f32 %v5451_v63, %v5407_v4  ;;  %v5453_v29 = vpop.f32.mrb[162].mxu0 }
 0x38b   : > { %v5454_v6 = vpop.f32.mrb[163].mxu0  ;;  %v5869_v29 = vpop.permute.xlu0 %5868 }
 0x38c   : > { %v5490_v26 = vpop.f32.mrb[160].mxu1 }
 0x38d   : > { %v5499_v43 = vadd.f32 %v5490_v26, %v5408_v5  ;;  %v5492_v51 = vpop.f32.mrb[161].mxu1 }
 0x38e   : > { %v5500_v17 = vadd.f32 %v5492_v51, %v5409_v28  ;;  %v5494_v36 = vpop.f32.mrb[162].mxu1 }
 0x38f   : > { %v5495_v27 = vpop.f32.mrb[163].mxu1 }
 0x390   : > { %v5540_v40 = vpop.f32.mrb[164].mxu0 }
 0x391   : > { %v5588_v46 = vadd.f32 %v5540_v40, %v5497_v34  ;;  %v5542_v18 = vpop.f32.mrb[165].mxu0 }
 0x392   : > { %v5589_v54 = vadd.f32 %v5542_v18, %v5498_v60  ;;  %v5544_v9 = vpop.f32.mrb[166].mxu0 }
 0x393   : > { %v5545_v52 = vpop.f32.mrb[167].mxu0 }
 0x394   : > { %v5581_v45 = vpop.f32.mrb[164].mxu1 }
 0x395   : > { %v5590_v50 = vadd.f32 %v5581_v45, %v5499_v43  ;;  %v5583_v0 = vpop.f32.mrb[165].mxu1 }
 0x396   : > { %v5591_v55 = vadd.f32 %v5583_v0, %v5500_v17  ;;  %v5585_v8 = vpop.f32.mrb[166].mxu1 }
 0x397   : > { %v5586_v57 = vpop.f32.mrb[167].mxu1 }
 0x398   : > { %v5631_v3 = vpop.f32.mrb[168].mxu0 }
 0x399   : > { %v5679_v32 = vadd.f32 %v5631_v3, %v5588_v46  ;;  %v5633_v58 = vpop.f32.mrb[169].mxu0 }
 0x39a   : > { %v5680_v61 = vadd.f32 %v5633_v58, %v5589_v54  ;;  %v5635_v15 = vpop.f32.mrb[170].mxu0  ;;  %v5883_v58 = vld [vmem:[#allocation11] sm:$0x1] }
 0x39b   : > { %v5636_v53 = vpop.f32.mrb[171].mxu0 }
 0x39c   : > { %v5672_v56 = vpop.f32.mrb[168].mxu1  ;;  %v5996_v53 = vld [vmem:[#allocation11 + $0x1] sm:$0x1] }
 0x39d   : > { %v5681_v1 = vadd.f32 %v5672_v56, %v5590_v50  ;;  %v5674_v41 = vpop.f32.mrb[169].mxu1  ;;  %v6098_v56 = vld [vmem:[#allocation11 + $0x2] sm:$0x1] }
 0x39e   : > { %v5682_v30 = vadd.f32 %v5674_v41, %v5591_v55  ;;  %v5676_v11 = vpop.f32.mrb[170].mxu1  ;;  %v5890_v41 = vlaneseq }
 0x39f   : > { %v5677_v35 = vpop.f32.mrb[171].mxu1  ;;  %v5888_v11 = vpop.permute.xlu1 %5887 }
 0x3a0   : > { %v5722_v16 = vpop.f32.mrb[172].mxu0 }
 0x3a1   : > { %v5770_v62 = vadd.f32 %v5722_v16, %v5679_v32  ;;  %v5724_v4 = vpop.f32.mrb[173].mxu0 }
 0x3a2   : > { %v5771_v25 = vadd.f32 %v5724_v4, %v5680_v61  ;;  %v5726_v20 = vpop.f32.mrb[174].mxu0 }
 0x3a3   : > { %v5727_v38 = vpop.f32.mrb[175].mxu0 }
 0x3a4   : > { %v5763_v5 = vpop.f32.mrb[172].mxu1  ;;  %v6002_v38 = vpop.permute.xlu1 %6001 }
 0x3a5   : > { %v5772_v31 = vadd.f32 %v5763_v5, %v5681_v1  ;;  %v5765_v28 = vpop.f32.mrb[173].mxu1  ;;  %v6200_v1 = vld [vmem:[#allocation11 + $0x3] sm:$0x1] }
 0x3a6   : > { %v5773_v39 = vadd.f32 %v5765_v28, %v5682_v30  ;;  %v5767_v2 = vpop.f32.mrb[174].mxu1  ;;  %v5891_v30 = vshrl.u32 %v5890_v41, 7 }
 0x3a7   : > { %v5768_v22 = vpop.f32.mrb[175].mxu1 }
 0x3a8   : > { %v5813_v34 = vpop.f32.mrb[176].mxu0  ;;  %v8655_v16 = vsub.s32 0, %v5891_v30 }
 0x3a9   : > { %v5861_v63 = vadd.f32 %v5813_v34, %v5770_v62  ;;  %v5815_v60 = vpop.f32.mrb[177].mxu0 }
 0x3aa   : > { %v5862_v6 = vadd.f32 %v5815_v60, %v5771_v25  ;;  %v5817_v26 = vpop.f32.mrb[178].mxu0  ;;  %v5893_v25 = vrot.slane %v5888_v11, %v8655_v16 }
 0x3ab   : > { %v5871_v43 = vadd.f32 %v5869_v29, %v5861_v63  ;;  %v5818_v51 = vpop.f32.mrb[179].mxu0 }
 0x3ac   : > { %v5872_v17 = vadd.f32 %v5869_v29, %v5862_v6  ;;  %v5854_v36 = vpop.f32.mrb[176].mxu1 }
 0x3ad   : > { %v5875_v27 = vmax.f32 %v5871_v43, 0.0  ;;  %v5863_v40 = vadd.f32 %v5854_v36, %v5772_v31  ;;  %v5856_v46 = vpop.f32.mrb[177].mxu1  ;;  %v6007_v31 = vrot.slane %v6002_v38, %v8655_v16 }
 0x3ae   : > { %v5876_v18 = vmax.f32 %v5872_v17, 0.0  ;;  %v5864_v54 = vadd.f32 %v5856_v46, %v5773_v39  ;;  %v5858_v9 = vpop.f32.mrb[178].mxu1 }
 0x3af   : > { %v5879_v52 = vpack.c.bf16 %v5875_v27, %v5875_v27  ;;  %v5873_v45 = vadd.f32 %v5869_v29, %v5863_v40  ;;  %v5859_v50 = vpop.f32.mrb[179].mxu1 }
 0x3b0   : > { %v5880_v0 = vpack.c.bf16 %v5876_v18, %v5876_v18  ;;  %v5874_v55 = vadd.f32 %v5869_v29, %v5864_v54 }
 0x3b1   : > { %v5877_v8 = vmax.f32 %v5873_v45, 0.0  ;;  %v5898_v57 = vsel %vm422_vm1, %v5879_v52, 0 }
 0x3b2   : > { %v5878_v3 = vmax.f32 %v5874_v55, 0.0  ;;  %6835 = vmatprep.subr.msk.bf16.mxu0 %vm422_vm1, %v5880_v0 }
 0x3b3   : > { %v5881_v32 = vpack.c.bf16 %v5877_v8, %v5877_v8  ;;  %5910 = vmatpush1.bf16.msra.mxu0 %v5898_v57 }
 0x3b4   : > { %v5882_v61 = vpack.c.bf16 %v5878_v3, %v5878_v3  ;;  %6839 = vmatprep.subr.msk.bf16.mxu0 %vm422_vm1, %v5880_v0 }
 0x3b5   : > { %v5904_v15 = vsel %vm422_vm1, %v5881_v32, 0 }
 0x3b6   : > { %6836 = vmatmul.mubr.msk.bf16.vlgmr.msra.gmra.mrb[180].mxu0 %vm418_vm3, %v5883_v58  ;;  %6837 = vmatprep.subr.msk.bf16.mxu1 %vm422_vm1, %v5882_v61 }
 0x3b7   : > { %5951 = vmatpush1.bf16.msra.mxu1 %v5904_v15  ;;  %6012 = vmatpush1.bf16.msra.mxu0 %v5898_v57 }
 0x3b8   : > { %6841 = vmatprep.subr.msk.bf16.mxu1 %vm422_vm1, %v5882_v61  ;;  %6843 = vmatprep.subr.msk.bf16.mxu0 %vm422_vm1, %v5880_v0 }
 0x3b9   : > { %6043 = vmatprep.mubr.bf16.mxu0 %v8894_v33 }
 0x3ba   : > { %6838 = vmatmul.mubr.msk.bf16.vlgmr.msra.gmra.mrb[180].mxu1 %vm418_vm3, %v5883_v58 }
 0x3bb   : > { %6053 = vmatpush1.bf16.msra.mxu1 %v5904_v15  ;;  %6084 = vmatprep.mubr.bf16.mxu1 %v8894_v33 }
 0x3bc   : > { %6845 = vmatprep.subr.msk.bf16.mxu1 %vm422_vm1, %v5882_v61 }
 0x3be   : > { %6840 = vmatmul.mubr.msk.bf16.vlgmr.msra.gmra.mrb[184].mxu0 %vm418_vm3, %v5996_v53 }
 0x3bf   : > { %6114 = vmatpush1.bf16.msra.mxu0 %v5898_v57  ;;  %6145 = vmatprep.mubr.bf16.mxu0 %v8894_v33 }
 0x3c0   : > { %6847 = vmatprep.subr.msk.bf16.mxu0 %vm422_vm1, %v5880_v0 }
 0x3c2   : > { %6842 = vmatmul.mubr.msk.bf16.vlgmr.msra.gmra.mrb[184].mxu1 %vm418_vm3, %v5996_v53 }
 0x3c3   : > { %6155 = vmatpush1.bf16.msra.mxu1 %v5904_v15  ;;  %6186 = vmatprep.mubr.bf16.mxu1 %v8894_v33 }
 0x3c4   : > { %6849 = vmatprep.subr.msk.bf16.mxu1 %vm422_vm1, %v5882_v61 }
 0x3c6   : > { %6844 = vmatmul.mubr.msk.bf16.vlgmr.msra.gmra.mrb[188].mxu0 %vm418_vm3, %v6098_v56 }
 0x3c7   : > { %6216 = vmatpush1.bf16.msra.mxu0 %v5898_v57  ;;  %6247 = vmatprep.mubr.bf16.mxu0 %v8894_v33 }
 0x3ca   : > { %6846 = vmatmul.mubr.msk.bf16.vlgmr.msra.gmra.mrb[188].mxu1 %vm418_vm3, %v6098_v56 }
 0x3cb   : > { %6257 = vmatpush1.bf16.msra.mxu1 %v5904_v15  ;;  %6288 = vmatprep.mubr.bf16.mxu1 %v8894_v33 }
 0x3ce   : > { %6848 = vmatmul.mubr.msk.bf16.vlgmr.msra.gmra.mrb[192].mxu0 %vm418_vm3, %v6200_v1 }
 0x3d2   : > { %6850 = vmatmul.mubr.msk.bf16.vlgmr.msra.gmra.mrb[192].mxu1 %vm418_vm3, %v6200_v1  ;;  %v6104_v1 = vpop.permute.xlu0 %6103 }
 0x3d3   : > { %v6109_v30 = vrot.slane %v6104_v1, %v8655_v16 }
 0x489   : > { %v5943_v35 = vpop.f32.mrb[180].mxu0 }
 0x48a   : > { %v5945_v62 = vpop.f32.mrb[181].mxu0  ;;  %v8659_v39 = vadd.f32 %v5943_v35, %v5893_v25  ;;  %v6206_v35 = vpop.permute.xlu1 %6205 }
 0x48b   : > { %v5947_v4 = vpop.f32.mrb[182].mxu0  ;;  %v8661_v22 = vadd.f32 %v5945_v62, %v5893_v25 }
 0x48c   : > { %v5948_v20 = vpop.f32.mrb[183].mxu0  ;;  %v5991_v26 = vmax.f32 %v8659_v39, 0.0  ;;  %v6211_v4 = vrot.slane %v6206_v35, %v8655_v16 }
 0x48d   : > { %v5984_v5 = vpop.f32.mrb[180].mxu1  ;;  %v5992_v36 = vmax.f32 %v8661_v22, 0.0 }
 0x48e   : > { %v5986_v33 = vpop.f32.mrb[181].mxu1  ;;  %v8668_v43 = vadd.f32 %v5984_v5, %v5893_v25 }
 0x48f   : > { %v5988_v28 = vpop.f32.mrb[182].mxu1  ;;  %v8672_v27 = vadd.f32 %v5986_v33, %v5893_v25 }
 0x490   : > { %v5989_v2 = vpop.f32.mrb[183].mxu1  ;;  %v5993_v0 = vmax.f32 %v8668_v43, 0.0 }
 0x491   : > { %v6045_v34 = vpop.f32.mrb[184].mxu0  ;;  %v5994_v57 = vmax.f32 %v8672_v27, 0.0 }
 0x492   : > { %v8663_v63 = vadd.f32 %v6045_v34, %v6007_v31  ;;  %v6047_v60 = vpop.f32.mrb[185].mxu0 }
 0x493   : > { %v8665_v29 = vadd.f32 %v6047_v60, %v6007_v31  ;;  %v6049_v6 = vpop.f32.mrb[186].mxu0 }
 0x494   : > { %v6093_v51 = vmax.f32 %v8663_v63, 0.0  ;;  %v6050_v17 = vpop.f32.mrb[187].mxu0 }
 0x495   : > { %v6094_v40 = vmax.f32 %v8665_v29, 0.0  ;;  %v6086_v46 = vpop.f32.mrb[184].mxu1 }
 0x496   : > { %v6301_v18 = vmax.f32 %v5991_v26, %v6093_v51  ;;  %v8675_v54 = vadd.f32 %v6086_v46, %v6007_v31  ;;  %v6088_v9 = vpop.f32.mrb[185].mxu1 }
 0x497   : > { %v6302_v52 = vmax.f32 %v5992_v36, %v6094_v40  ;;  %v8677_v45 = vadd.f32 %v6088_v9, %v6007_v31  ;;  %v6090_v50 = vpop.f32.mrb[186].mxu1 }
 0x498   : > { %v6095_v55 = vmax.f32 %v8675_v54, 0.0  ;;  %v6091_v8 = vpop.f32.mrb[187].mxu1 }
 0x499   : > { %v6096_v3 = vmax.f32 %v8677_v45, 0.0  ;;  %v6147_v32 = vpop.f32.mrb[188].mxu0 }
 0x49a   : > { %v6303_v58 = vmax.f32 %v5993_v0, %v6095_v55  ;;  %v6149_v61 = vpop.f32.mrb[189].mxu0  ;;  %v6148_v25 = vadd.f32 %v6147_v32, %v6109_v30 }
 0x49b   : > { %v6304_v15 = vmax.f32 %v5994_v57, %v6096_v3  ;;  %v6151_v53 = vpop.f32.mrb[190].mxu0  ;;  %v6150_v38 = vadd.f32 %v6149_v61, %v6109_v30 }
 0x49c   : > { %v6152_v56 = vpop.f32.mrb[191].mxu0  ;;  %v6195_v2 = vmax.f32 %v6148_v25, 0.0 }
 0x49d   : > { %v6188_v41 = vpop.f32.mrb[188].mxu1  ;;  %v6196_v63 = vmax.f32 %v6150_v38, 0.0 }
 0x49e   : > { %v6190_v11 = vpop.f32.mrb[189].mxu1  ;;  %v6189_v60 = vadd.f32 %v6188_v41, %v6109_v30 }
 0x49f   : > { %v6192_v62 = vpop.f32.mrb[190].mxu1  ;;  %v6191_v29 = vadd.f32 %v6190_v11, %v6109_v30 }
 0x4a0   : > { %v6193_v20 = vpop.f32.mrb[191].mxu1  ;;  %v6197_v35 = vmax.f32 %v6189_v60, 0.0 }
 0x4a1   : > { %v6249_v5 = vpop.f32.mrb[192].mxu0  ;;  %v6198_v62 = vmax.f32 %v6191_v29, 0.0 }
 0x4a2   : > { %v6250_v31 = vadd.f32 %v6249_v5, %v6211_v4  ;;  %v6251_v33 = vpop.f32.mrb[193].mxu0 }
 0x4a3   : > { %v6252_v28 = vadd.f32 %v6251_v33, %v6211_v4  ;;  %v6253_v39 = vpop.f32.mrb[194].mxu0 }
 0x4a4   : > { %v6297_v22 = vmax.f32 %v6250_v31, 0.0  ;;  %v6254_v34 = vpop.f32.mrb[195].mxu0 }
 0x4a5   : > { %v6298_v6 = vmax.f32 %v6252_v28, 0.0  ;;  %v6290_v17 = vpop.f32.mrb[192].mxu1 }
 0x4a6   : > { %v6305_v46 = vmax.f32 %v6195_v2, %v6297_v22  ;;  %v6291_v9 = vadd.f32 %v6290_v17, %v6211_v4  ;;  %v6292_v50 = vpop.f32.mrb[193].mxu1 }
 0x4a7   : > { %v6306_v8 = vmax.f32 %v6196_v63, %v6298_v6  ;;  %v6293_v32 = vadd.f32 %v6292_v50, %v6211_v4  ;;  %v6294_v53 = vpop.f32.mrb[194].mxu1 }
 0x4a8   : > { %v6309_v61 = vmax.f32 %v6301_v18, %v6305_v46  ;;  %v6299_v56 = vmax.f32 %v6291_v9, 0.0  ;;  %v6295_v1 = vpop.f32.mrb[195].mxu1 }
 0x4a9   : > { %v6310_v20 = vmax.f32 %v6302_v52, %v6306_v8  ;;  %v6300_v25 = vmax.f32 %v6293_v32, 0.0 }
 0x4aa   : > { %v6313_v5 = vsub.f32 %v5991_v26, %v6309_v61  ;;  %v6325_v31 = vsub.f32 %v6093_v51, %v6309_v61  ;;  %v6337_v38 = vsub.f32 %v6195_v2, %v6309_v61  ;;  %v6349_v41 = vsub.f32 %v6297_v22, %v6309_v61 }
 0x4ab   : > { %v6314_v30 = vsub.f32 %v5992_v36, %v6310_v20  ;;  %v6326_v11 = vsub.f32 %v6094_v40, %v6310_v20  ;;  %v6338_v33 = vsub.f32 %v6196_v63, %v6310_v20  ;;  %v6350_v28 = vsub.f32 %v6298_v6, %v6310_v20 }
 0x4ac   : > { %v6317_v39 = vmul.f32 1.442695, %v6313_v5  ;;  %v6329_v34 = vmul.f32 1.442695, %v6325_v31  ;;  %v6341_v17 = vmul.f32 1.442695, %v6337_v38  ;;  %v6307_v4 = vmax.f32 %v6197_v35, %v6299_v56  ;;  %v1592_v38 = vpop.permute.xlu0 %1591 }
 0x4ad   : > { %v6353_v50 = vmul.f32 1.442695, %v6349_v41  ;;  %v6308_v18 = vmax.f32 %v6198_v62, %v6300_v25  ;;  %v6319_v46 = vmul.f32 1.442695, %v6314_v30  ;;  %v6331_v60 = vmul.f32 1.442695, %v6326_v11 }
 0x4ae   : > { %7003 = vpow2.f32 %v6317_v39  ;;  %v6311_v29 = vmax.f32 %v6303_v58, %v6307_v4  ;;  %v6343_v52 = vmul.f32 1.442695, %v6338_v33  ;;  %v6355_v26 = vmul.f32 1.442695, %v6350_v28  ;;  %v2764_v33 = vpop.permute.xlu1 %2763 }
 0x4af   : > { %7005 = vpow2.f32 %v6329_v34  ;;  %v6312_v51 = vmax.f32 %v6304_v15, %v6308_v18  ;;  %v8731_v4 = vadd.f32 %v1592_v38, %v8485_v13  ;;  %v8749_v13 = vadd.f32 %v2764_v33, %v8601_v14 }
 0x4b0   : > { %7007 = vpow2.f32 %v6341_v17  ;;  %v6315_v36 = vsub.f32 %v5993_v0, %v6311_v29  ;;  %v6327_v40 = vsub.f32 %v6095_v55, %v6311_v29  ;;  %v6339_v2 = vsub.f32 %v6197_v35, %v6311_v29 }
 0x4b1   : > { %7009 = vpow2.f32 %v6353_v50  ;;  %v6351_v22 = vsub.f32 %v6299_v56, %v6311_v29  ;;  %v6316_v63 = vsub.f32 %v5994_v57, %v6312_v51  ;;  %v6328_v58 = vsub.f32 %v6096_v3, %v6312_v51 }
 0x4b2   : > { %7011 = vpow2.f32 %v6319_v46  ;;  %v6321_v6 = vmul.f32 1.442695, %v6315_v36  ;;  %v6333_v15 = vmul.f32 1.442695, %v6327_v40  ;;  %v6345_v9 = vmul.f32 1.442695, %v6339_v2  ;;  %v5045_v2 = vpop.permute.xlu1 %5044 }
 0x4b3   : > { %7013 = vpow2.f32 %v6331_v60  ;;  %v6340_v43 = vsub.f32 %v6198_v62, %v6312_v51  ;;  %v6352_v0 = vsub.f32 %v6300_v25, %v6312_v51  ;;  %v6357_v54 = vmul.f32 1.442695, %v6351_v22 }
 0x4b4   : > { %7015 = vpow2.f32 %v6343_v52  ;;  %v6323_v55 = vmul.f32 1.442695, %v6316_v63  ;;  %v6335_v8 = vmul.f32 1.442695, %v6328_v58  ;;  %v1594_v17 = vadd.f32 %v1592_v38, %v8482_v49 }
 0x4b5   : > { %7017 = vpow2.f32 %v6355_v26  ;;  %v6347_v45 = vmul.f32 1.442695, %v6340_v43  ;;  %v6359_v61 = vmul.f32 1.442695, %v6352_v0  ;;  %v8734_v50 = vadd.f32 %v1592_v38, %v8493_v19  ;;  %v3933_v19 = vpop.permute.xlu0 %3932 }
 0x4b6   : > { %7019 = vpow2.f32 %v6321_v6  ;;  %v8742_v29 = vadd.f32 %v1592_v38, %v8496_v10  ;;  %v2766_v52 = vadd.f32 %v2764_v33, %v8593_v23  ;;  %v8746_v49 = vadd.f32 %v2764_v33, %v8597_v24 }
 0x4b7   : > { %7021 = vpow2.f32 %v6333_v15  ;;  %v8752_v26 = vadd.f32 %v2764_v33, %v8604_v44  ;;  %v1598_v10 = vmax.f32 %v1594_v17, 0.0  ;;  %v1599_v23 = vmax.f32 %v8731_v4, 0.0 }
 0x4b8   : > { %v8701_v32 = vpop.eup %7003  ;;  %7023 = vpow2.f32 %v6345_v9  ;;  %v1600_v24 = vmax.f32 %v8734_v50, 0.0  ;;  %v3935_v14 = vadd.f32 %v3933_v19, %v8615_v42  ;;  %v3936_v22 = vadd.f32 %v3933_v19, %v8617_v37 }
 0x4b9   : > { %v8703_v27 = vpop.eup %7005  ;;  %7025 = vpow2.f32 %v6357_v54  ;;  %v1601_v58 = vmax.f32 %v8742_v29, 0.0  ;;  %v2770_v6 = vmax.f32 %v2766_v52, 0.0  ;;  %v2771_v15 = vmax.f32 %v8746_v49, 0.0 }
 0x4ba   : > { %v7008_v57 = vpop.eup %7007  ;;  %v6361_v3 = vadd.f32 %v8703_v27, %v8701_v32  ;;  %7027 = vpow2.f32 %v6323_v55  ;;  %v2772_v9 = vmax.f32 %v8749_v13, 0.0  ;;  %v2773_v0 = vmax.f32 %v8752_v26, 0.0 }
 0x4bb   : > { %v7010_v53 = vpop.eup %7009  ;;  %7029 = vpow2.f32 %v6335_v8  ;;  %v3937_v54 = vadd.f32 %v3933_v19, %v8619_v59  ;;  %v5047_v42 = vadd.f32 %v5045_v2, %v8623_v12 }
 0x4bc   : > { %v8707_v56 = vpop.eup %7011  ;;  %v6365_v1 = vadd.f32 %v7008_v57, %v6361_v3  ;;  %7031 = vpow2.f32 %v6347_v45 }
 0x4bd   : > { %v8709_v35 = vpop.eup %7013  ;;  %7033 = vpow2.f32 %v6359_v61  ;;  %v3939_v61 = vmax.f32 %v3935_v14, 0.0  ;;  %v5051_v33 = vmax.f32 %v5047_v42, 0.0 }
 0x4be   : > { %v8711_v62 = vpop.eup %7015  ;;  %v6369_v20 = vadd.f32 %v7010_v53, %v6365_v1  ;;  %v6362_v25 = vadd.f32 %v8709_v35, %v8707_v56  ;;  %v3940_v1 = vmax.f32 %v3936_v22, 0.0 }
 0x4bf   : > { %v8715_v5 = vpop.eup %7017 }
 0x4c0   : > { %v8717_v31 = vpop.eup %7019  ;;  %7035 = vrcp.f32 %v6369_v20  ;;  %v6366_v41 = vadd.f32 %v8711_v62, %v6362_v25  ;;  %v5048_v20 = vadd.f32 %v5045_v2, %v8625_v47 }
 0x4c1   : > { %v8720_v30 = vpop.eup %7021 }
 0x4c2   : > { %v8722_v11 = vpop.eup %7023  ;;  %v6370_v28 = vadd.f32 %v8715_v5, %v6366_v41  ;;  %v6363_v39 = vadd.f32 %v8720_v30, %v8717_v31  ;;  %v5052_v49 = vmax.f32 %v5048_v20, 0.0 }
 0x4c3   : > { %v8727_v34 = vpop.eup %7025 }
 0x4c4   : > { %v8736_v18 = vpop.eup %7027  ;;  %7037 = vrcp.f32 %v6370_v28  ;;  %v6367_v46 = vadd.f32 %v8722_v11, %v6363_v39 }
 0x4c5   : > { %v8739_v60 = vpop.eup %7029 }
 0x4c6   : > { %v6371_v51 = vadd.f32 %v8727_v34, %v6367_v46  ;;  %v6364_v36 = vadd.f32 %v8739_v60, %v8736_v18  ;;  %v8757_v40 = vpop.eup %7031 }
 0x4c7   : > { %v7034_v63 = vpop.eup %7033 }
 0x4c8   : > { %7039 = vrcp.f32 %v6371_v51  ;;  %v6368_v44 = vadd.f32 %v8757_v40, %v6364_v36 }
 0x4ca   : > { %v7036_v43 = vpop.eup %7035  ;;  %v6372_v55 = vadd.f32 %v7034_v63, %v6368_v44 }
 0x4cb   : > { %v6457_v37 = vmul.f32 %v7036_v43, %v7010_v53  ;;  %v6377_v8 = vmul.f32 %v7036_v43, %v8701_v32  ;;  %v6401_v45 = vmul.f32 %v7036_v43, %v8703_v27  ;;  %v6429_v3 = vmul.f32 %v7036_v43, %v7008_v57 }
 0x4cc   : > { %7041 = vrcp.f32 %v6372_v55  ;;  %v3941_v53 = vmax.f32 %v3937_v54, 0.0  ;;  %v3938_v32 = vadd.f32 %v3933_v19, %v8621_v48  ;;  %v5049_v27 = vadd.f32 %v5045_v2, %v8627_v21 }
 0x4cd   : > { %v6464_v25 = vrot.slane %v6457_v37, %v8655_v16  ;;  %v6384_v38 = vrot.slane %v6377_v8, %v8655_v16  ;;  %v6408_v59 = vrot.slane %v6401_v45, %v8655_v16  ;;  %v6436_v12 = vrot.slane %v6429_v3, %v8655_v16 }
 0x4ce   : > { %v7038_v41 = vpop.eup %7037  ;;  %v5053_v51 = vmax.f32 %v5049_v27, 0.0 }
 0x4cf   : > { %v6458_v57 = vmul.f32 %v7038_v41, %v8715_v5  ;;  %v6378_v47 = vmul.f32 %v7038_v41, %v8707_v56  ;;  %v6397_v28 = vmul.f32 %v6384_v38, %v1598_v10  ;;  %v6402_v39 = vmul.f32 %v7038_v41, %v8709_v35 }
 0x4d0   : > { %v6421_v17 = vmul.f32 %v6408_v59, %v2770_v6  ;;  %v6430_v4 = vmul.f32 %v7038_v41, %v8711_v62  ;;  %v6449_v46 = vmul.f32 %v6436_v12, %v3939_v61  ;;  %v6477_v52 = vmul.f32 %v6464_v25, %v5051_v33 }
 0x4d1   : > { %v6468_v13 = vrot.slane %v6458_v57, %v8655_v16  ;;  %v6388_v48 = vrot.slane %v6378_v47, %v8655_v16  ;;  %v6412_v19 = vrot.slane %v6402_v39, %v8655_v16  ;;  %v5050_v5 = vadd.f32 %v5045_v2, %v8629_v7 }
 0x4d2   : > { %v7040_v21 = vpop.eup %7039  ;;  %v6425_v56 = vadd.f32 %v6421_v17, %v6397_v28  ;;  %v6440_v36 = vrot.slane %v6430_v4, %v8655_v16 }
 0x4d3   : > { %v6459_v35 = vmul.f32 %v7040_v21, %v8727_v34  ;;  %v6379_v62 = vmul.f32 %v7040_v21, %v8717_v31  ;;  %v6398_v10 = vmul.f32 %v6388_v48, %v1599_v23  ;;  %v6403_v14 = vmul.f32 %v7040_v21, %v8720_v30 }
 0x4d4   : > { %v6422_v22 = vmul.f32 %v6412_v19, %v2771_v15  ;;  %v6431_v44 = vmul.f32 %v7040_v21, %v8722_v11  ;;  %v6450_v6 = vmul.f32 %v6440_v36, %v3940_v1  ;;  %v6453_v43 = vadd.f32 %v6449_v46, %v6425_v56 }
 0x4d5   : > { %v6472_v54 = vrot.slane %v6459_v35, %v8655_v16  ;;  %v6392_v7 = vrot.slane %v6379_v62, %v8655_v16  ;;  %v6416_v2 = vrot.slane %v6403_v14, %v8655_v16  ;;  %v6478_v42 = vmul.f32 %v6468_v13, %v5052_v49 }
 0x4d6   : > { %v7042_v55 = vpop.eup %7041  ;;  %v5054_v34 = vmax.f32 %v5050_v5, 0.0  ;;  %v6426_v37 = vadd.f32 %v6422_v22, %v6398_v10  ;;  %v6444_v31 = vrot.slane %v6431_v44, %v8655_v16  ;;  %v6481_v23 = vadd.f32 %v6477_v52, %v6453_v43 }
 0x4d7   : > { %v6460_v30 = vmul.f32 %v7042_v55, %v7034_v63  ;;  %v6380_v15 = vmul.f32 %v7042_v55, %v8736_v18  ;;  %v6399_v11 = vmul.f32 %v6392_v7, %v1600_v24  ;;  %v6404_v8 = vmul.f32 %v7042_v55, %v8739_v60 }
 0x4d8   : > { %v6423_v45 = vmul.f32 %v6416_v2, %v2772_v9  ;;  %v6432_v3 = vmul.f32 %v7042_v55, %v8757_v40  ;;  %v6451_v61 = vmul.f32 %v6444_v31, %v3941_v53  ;;  %v6454_v1 = vadd.f32 %v6450_v6, %v6426_v37 }
 0x4d9   : > { %v6476_v20 = vrot.slane %v6460_v30, %v8655_v16  ;;  %v6396_v25 = vrot.slane %v6380_v15, %v8655_v16  ;;  %v6420_v38 = vrot.slane %v6404_v8, %v8655_v16  ;;  %v6479_v63 = vmul.f32 %v6472_v54, %v5053_v51 }
 0x4da   : > { %v3942_v18 = vmax.f32 %v3938_v32, 0.0  ;;  %v6427_v59 = vadd.f32 %v6423_v45, %v6399_v11  ;;  %v6448_v50 = vrot.slane %v6432_v3, %v8655_v16  ;;  %v6482_v24 = vadd.f32 %v6478_v42, %v6454_v1 }
 0x4db   : > { %v6400_v60 = vmul.f32 %v6396_v25, %v1601_v58  ;;  %v6424_v40 = vmul.f32 %v6420_v38, %v2773_v0  ;;  %v6480_v9 = vmul.f32 %v6476_v20, %v5054_v34 }
 0x4dc   : > { %v6452_v12 = vmul.f32 %v6448_v50, %v3942_v18  ;;  %v6455_v41 = vadd.f32 %v6451_v61, %v6427_v59  ;;  %v6489_v53 = vcombine.low %v6481_v23, %v6482_v24 }
 0x4dd   : > { %v6428_v33 = vadd.f32 %v6424_v40, %v6400_v60 }
 0x4de   : > { %v6483_v27 = vadd.f32 %v6479_v63, %v6455_v41  ;;  %6493 = vst [vmem:[%s379_s10] sm:$0xff] %v6489_v53 }
 0x4df   : > { %v6456_v32 = vadd.f32 %v6452_v12, %v6428_v33 }
 0x4e1   : > { %v6484_v16 = vadd.f32 %v6480_v9, %v6456_v32 }
 0x4e3   : > { %v6490_v57 = vcombine.low %v6483_v27, %v6484_v16 }
 0x4e5   : > { %6494 = vst [vmem:[%s379_s10 + $0x8] sm:$0xff] %v6490_v57 }
 0x4e6   : > { %7254 = shalt.err (!%p7251_p3)
}
 0x4e7   : > { %s7255_s23 = scalar_lea.hbm %s8814_s9, 256  ;;  %s7259_s29 = scalar_lea.hbm %s8865_s7, 512 }
 0x4e8   : > { %p7256_p4 = scmp.ne.s32.totalorder %s8814_s9, %s7255_s23  ;;  %p7260_p8 = scmp.lt.u32.totalorder %s8814_s9, %s8865_s7 }
 0x4e9   : > { %p7261_p6 = scmp.lt.u32.totalorder %s7259_s29, %s7255_s23  ;;  %p7263_p5 = scmp.lt.u32.totalorder %s7255_s23, %s8814_s9 }
 0x4ea   : > { %p7257_p10 = pnand %p7256_p4, %p8897_p9 }
 0x4eb   : > { %p7262_p7 = por %p7261_p6, %p7260_p8 }
 0x4ec   : > { %p7258_p11 = pneg %p7257_p10 }
 0x4ed   : > { %p7264_p12 = por %p7263_p5, %p7262_p7 }
 0x4ef   : > { %p7265_p1 = pnand %p7264_p12, %p7258_p11 }
 0x4f1   : > { %7268 = shalt.err (!%p7265_p1)
}
 0x4f2   : > { %6886 = dma.vmem_to_hbm [thread:$0]  (%p8897_p9), %s8816_s14, 256, %s8814_s9, %s6496_s1  }
 0x4f3 PF: > { %s6522_s11 = sand.u32 1, %s7307_s24   ;;  %p8898_p13 = scmp.ne.s32.totalorder %s8883_s15, 0 }
 0x4f4   : > { %p8899_p0 = scmp.ge.s32.totalorder %s7319_s27, 2  ;;  %s6523_s28 = scalar_lea.sflag [#allocation4], %s6522_s11 }
 0x4f6   : > { %p6912_p2 = pnand %p8899_p0, %p8898_p13 }
 0x4f8   : > { %7302 = dma.done.wait (!%p6912_p2), %s6523_s28, 256  }
 0x4f9   : > { %7304 = vsyncadd (!%p6912_p2), %s6523_s28, 4294967040  ;;  %p23_p3 = scmp.ge.s32.totalorder %s7582_s19, 4   ;;  %s8900_s24 = smov %s7311_s25 }
 0x4fa   : > { %s8901_s25 = smov %s7315_s26  ;;  %s8902_s26 = smov %s7593_s22 }
 0x4fb   : > { %s8903_s27 = smov %s7582_s19  ;;  %25 = sbr.rel (!%p23_p3) target bundleno = 10 (0xa), region = 169 }
 0x502   :  { %6528 = vsyncpa [#allocation3], 1 }
 0x503   :  { %6530 = vsyncpa [#allocation3 + $0x1], 1 }
 0x504   :  { %6531 = vsyncpa [#allocation6], 1 }
 0x505   :  { %6532 = vsyncpa [#allocation9], 1 }
 0x506   :  { %6533 = vsyncpa [#allocation12], 1 }
 0x507   :  { %6534 = vsyncpa [#allocation4], 1 }
 0x508   :  { %6536 = vsyncpa [#allocation4 + $0x1], 1 }

</bundles_post_ra>
